<compile_context>
chip_gen: v7x
topology: tpu7x:2x2x1
jax: 0.10.0
libtpu: 0.0.40
codegen_flags: <defaults>
</compile_context>

<pallas_src>
import jax
import jax.numpy as jnp
from jax.experimental import pallas as pl
from jax.experimental.pallas import tpu as pltpu

NUM_KEYPOINTS = 17
COORDS = 2
SEQ_LEN = 8
HIDDEN = 32
NUM_LAYERS = 3
BATCH = 8                            # fills the 8-sublane / MXU-M dimension
FEAT = NUM_KEYPOINTS * COORDS        # 34
BN_EPS = 1e-5
NUM_CLASSES = 2
LOGIT_PAD = 128                      # lane-dense padded logits (real classes = 2)

# ----- packed-parameter row offsets (all block starts are multiples of 8) ----
# p160: lane width 160 = 5*HIDDEN  ([gates(128) | residual(32)])
P160_WXR0 = 0      # rows [0,40):   layer-0 x->[gates|resid] weights (34 used)
P160_BXR0 = 40     # row 40:        layer-0 [gate|resid] bias
P160_WC1 = 48      # rows [48,112): layer-1 fused [[Wx|Wr],[Wh|0]]  (64,160)
P160_BC1 = 112     # row 112
P160_WC2 = 120     # rows [120,184): layer-2 fused weights
P160_BC2 = 184     # row 184
P160_ROWS = 192

# p128: lane width 128
P128_AW1 = 0       # rows [0,72):    attention fc1 weight (68 used, cols 0:17)
P128_AB1 = 72      # row 72
P128_AW2 = 80      # rows [80,104):  attention fc2 weight expanded (17 used, cols 0:34)
P128_AB2 = 104     # row 104
P128_WH0 = 112     # rows [112,144): layer-0 h->gates weights (32,128)
P128_CW1 = 144     # rows [144,176): classifier Linear(32->128)
P128_CB1 = 176
P128_CW2 = 184     # rows [184,312): Linear(128->64), cols 0:64
P128_CB2 = 312
P128_CW3 = 320     # rows [320,384): Linear(64->32), cols 0:32
P128_CB3 = 384
P128_CW4 = 392     # rows [392,424): Linear(32->2), cols 0:2
P128_CB4 = 424
P128_ROWS = 432


# --------------------------- fused Pallas kernel ------------------------------

def kamtfenet_kernel(x_ref, p160_ref, p128_ref, out_ref):
    S, B, F = x_ref.shape            # x is TIME-MAJOR: (S, B, F)
    H = HIDDEN
    f32 = jnp.float32

    # ---------------- AdaptiveKeypointAttention (BN folded into pools) -------
    x = x_ref[...]                                   # (S, B, F)
    n_elem = float(S * B * F)
    sum_x = jnp.sum(x)
    sum_x2 = jnp.sum(x * x)                          # two independent reductions
    mean = sum_x / n_elem
    var = sum_x2 / n_elem - mean * mean
    inv_std = jax.lax.rsqrt(var + BN_EPS)
    # Pool RAW x over the sequence axis first, then apply the (positive) BN
    # affine -- identical to normalizing first (max commutes with it).
    x_avg = (jnp.mean(x, axis=0) - mean) * inv_std   # (B, F)
    x_max = (jnp.max(x, axis=0) - mean) * inv_std    # (B, F)
    pooled = jnp.concatenate([x_avg, x_max], axis=1)  # (B, 2F)

    a_w1 = p128_ref[P128_AW1:P128_AW1 + 2 * F, :]    # (68,128), cols 17+ zero
    a_b1 = p128_ref[P128_AB1:P128_AB1 + 1, :]
    ha = jnp.maximum(
        jnp.dot(pooled, a_w1, preferred_element_type=f32) + a_b1, 0.0)  # (B,128)
    a_w2 = p128_ref[P128_AW2:P128_AW2 + 24, :]       # (24,128), rows 17+ / cols 34+ zero
    a_b2 = p128_ref[P128_AB2:P128_AB2 + 1, :]
    att = jax.nn.sigmoid(
        jnp.dot(ha[:, :24], a_w2, preferred_element_type=f32) + a_b2)   # (B,128)
    w2k = att[:, :F]                                 # (B, F) per-feature weights
    x_att = x * w2k[None, :, :]                      # attention applied to RAW x

    # ---------------- hoisted layer-0 projection (gates + residual) ----------
    # Time-major reshape is layout-free; result lives in vregs (no scratch).
    wxr0 = p160_ref[P160_WXR0:P160_WXR0 + F, :]      # (34, 160)
    bxr0 = p160_ref[P160_BXR0:P160_BXR0 + 1, :]      # (1, 160)
    g0r0 = jnp.dot(x_att.reshape(S * B, F), wxr0,
                   preferred_element_type=f32) + bxr0          # (S*B, 160)

    # ---------------- recurrent weights / biases (loaded once) ---------------
    wh0 = p128_ref[P128_WH0:P128_WH0 + H, :]         # (32, 128)
    wc1 = p160_ref[P160_WC1:P160_WC1 + 2 * H, :]     # (64, 160)
    wc2 = p160_ref[P160_WC2:P160_WC2 + 2 * H, :]     # (64, 160)
    bc1 = jnp.broadcast_to(p160_ref[P160_BC1:P160_BC1 + 1, :], (B, 5 * H))
    bc2 = jnp.broadcast_to(p160_ref[P160_BC2:P160_BC2 + 1, :], (B, 5 * H))

    def cell(z_gates, c_prev):
        # Grouped activations: ONE sigmoid over [f|i|o], ONE tanh for c~.
        s = jax.nn.sigmoid(z_gates[:, :3 * H])
        c_tilde = jnp.tanh(z_gates[:, 3 * H:4 * H])
        c_t = s[:, :H] * c_prev + s[:, H:2 * H] * c_tilde
        h_t = s[:, 2 * H:3 * H] * jnp.tanh(c_t)
        return h_t, c_t

    zeros = jnp.zeros((B, H), f32)
    h0, h1, h2 = zeros, zeros, zeros
    c0, c1, c2 = zeros, zeros, zeros

    # ---------------- wavefront recurrence (fully unrolled) ------------------
    # At wavefront step w: layer0 processes t=w, layer1 t=w-1, layer2 t=w-2.
    # All three read only last step's h/c -> mutually independent within a step.
    for w in range(S + NUM_LAYERS - 1):
        nh0, nc0, nh1, nc1, nh2, nc2 = h0, c0, h1, c1, h2, c2
        if w < S:                                    # layer 0 @ t = w
            g0 = g0r0[w * B:(w + 1) * B, :]          # (B,160) row-tile-aligned slice
            z0 = g0[:, :4 * H] + jnp.dot(h0, wh0, preferred_element_type=f32)
            hcell, nc0 = cell(z0, c0)
            nh0 = hcell + g0[:, 4 * H:]              # hoisted residual
        if 0 <= w - 1 < S:                           # layer 1 @ t = w-1
            z1 = jnp.dot(jnp.concatenate([h0, h1], axis=1), wc1,
                         preferred_element_type=f32) + bc1      # (B,160)
            hcell, nc1 = cell(z1[:, :4 * H], c1)
            nh1 = hcell + z1[:, 4 * H:]
        if 0 <= w - 2 < S:                           # layer 2 @ t = w-2
            z2 = jnp.dot(jnp.concatenate([h1, h2], axis=1), wc2,
                         preferred_element_type=f32) + bc2      # (B,160)
            hcell, nc2 = cell(z2[:, :4 * H], c2)
            nh2 = hcell + z2[:, 4 * H:]
        h0, c0, h1, c1, h2, c2 = nh0, nc0, nh1, nc1, nh2, nc2

    # ---------------- ClassificationLayers (zero-padded to 128 lanes) --------
    # TODO(synk): trailing nn.Dropout(0.3) is identity (eval semantics).
    hc = jnp.maximum(
        jnp.dot(h2, p128_ref[P128_CW1:P128_CW1 + H, :],
                preferred_element_type=f32)
        + p128_ref[P128_CB1:P128_CB1 + 1, :], 0.0)                     # (B,128)
    hc = jnp.maximum(
        jnp.dot(hc, p128_ref[P128_CW2:P128_CW2 + 128, :],
                preferred_element_type=f32)
        + p128_ref[P128_CB2:P128_CB2 + 1, :], 0.0)                     # cols 64+ == 0
    hc = jnp.maximum(
        jnp.dot(hc[:, :64], p128_ref[P128_CW3:P128_CW3 + 64, :],
                preferred_element_type=f32)
        + p128_ref[P128_CB3:P128_CB3 + 1, :], 0.0)                     # cols 32+ == 0
    # Lane-dense (B,128) store; real logits live in columns [0, 2).
    out_ref[...] = (jnp.dot(hc[:, :32], p128_ref[P128_CW4:P128_CW4 + 32, :],
                            preferred_element_type=f32)
                    + p128_ref[P128_CB4:P128_CB4 + 1, :])


# --------------------------- wrapper ------------------------------------------

def _vmem_spec():
    return pl.BlockSpec(memory_space=pltpu.MemorySpace.VMEM)


def kamtfenet_forward(x, p160, p128):
    """x: (B, S, K, 2) keypoints -> (B, 2) logits.  Single fused pallas_call."""
    B, S, K, C = x.shape
    F = K * C
    H = HIDDEN
    # Time-major layout so every per-step slice in the kernel is a contiguous
    # row-tile-aligned (B, *) block.  (Tiny host-side transpose of ~9 KB.)
    x_tm = jnp.transpose(x.reshape(B, S, F), (1, 0, 2))      # (S, B, F)

    flops = 2 * B * (2 * F * K + 24 * F)                               # attention
    flops += 2 * S * B * F * 5 * H                                     # hoisted l0 proj
    flops += 2 * S * (B * H * 4 * H + 2 * B * 2 * H * 5 * H)           # recurrence
    flops += 2 * B * (H * 128 + 128 * 128 + 64 * 128 + 32 * 128)       # classifier
    transcendentals = B * F + 3 * S * NUM_LAYERS * B * H
    bytes_accessed = (x_tm.size + p160.size + p128.size + B * LOGIT_PAD) * 4

    # NOTE: for production batch sizes add a leading grid axis over batch tiles
    # with dimension_semantics=("parallel",) so both v7x TensorCores are used.
    logits_padded = pl.pallas_call(
        kamtfenet_kernel,
        out_shape=jax.ShapeDtypeStruct((B, LOGIT_PAD), jnp.float32),
        in_specs=[_vmem_spec(), _vmem_spec(), _vmem_spec()],
        out_specs=_vmem_spec(),
        cost_estimate=pl.CostEstimate(flops=int(flops),
                                      transcendentals=int(transcendentals),
                                      bytes_accessed=int(bytes_accessed)),
    )(x_tm, p160, p128)
    return logits_padded[:, :NUM_CLASSES]


# --------------------------- pure-JAX reference (validation) ------------------

def kamtfenet_reference(x, raw):
    """Literal sequential (time outer, layers inner) re-implementation."""
    B, S, K, C = x.shape
    F = K * C
    H = HIDDEN
    xf = x.reshape(B, S, F)
    mean = jnp.mean(xf)
    var = jnp.mean((xf - mean) ** 2)
    xn = (xf - mean) * jax.lax.rsqrt(var + BN_EPS)
    pooled = jnp.concatenate([jnp.mean(xn, 1), jnp.max(xn, 1)], axis=1)
    h = jnp.maximum(pooled @ raw["a_w1"] + raw["a_b1"], 0.0)
    wk = jax.nn.sigmoid(h @ raw["a_w2"] + raw["a_b2"])       # (B, K)
    x_att = xf * jnp.repeat(wk, COORDS, axis=1)[:, None, :]  # raw x * weights

    hs = [jnp.zeros((B, H), jnp.float32) for _ in range(NUM_LAYERS)]
    cs = [jnp.zeros((B, H), jnp.float32) for _ in range(NUM_LAYERS)]
    for t in range(S):
        x_t = x_att[:, t, :]
        for l in range(NUM_LAYERS):
            cell = raw["cells"][l]
            comb = jnp.concatenate([x_t, hs[l]], axis=1)
            f_t = jax.nn.sigmoid(comb @ cell["wf"] + cell["bf"])
            i_t = jax.nn.sigmoid(comb @ cell["wi"] + cell["bi"])
            o_t = jax.nn.sigmoid(comb @ cell["wo"] + cell["bo"])
            ct_ = jnp.tanh(comb @ cell["wc"] + cell["bc"])
            c_t = f_t * cs[l] + i_t * ct_
            h_t = o_t * jnp.tanh(c_t) + (x_t @ cell["wr"] + cell["br"])
            hs[l], cs[l] = h_t, c_t
            x_t = h_t
    out = hs[-1]
    out = jnp.maximum(out @ raw["c_w1"] + raw["c_b1"], 0.0)
    out = jnp.maximum(out @ raw["c_w2"] + raw["c_b2"], 0.0)
    out = jnp.maximum(out @ raw["c_w3"] + raw["c_b3"], 0.0)
    return out @ raw["c_w4"] + raw["c_b4"]


# --------------------------- parameter init -----------------------------------

def _linear(key, fan_in, fan_out):
    """PyTorch-style Linear init; weight stored transposed (fan_in, fan_out)."""
    kw, kb = jax.random.split(key)
    bound = 1.0 / float(fan_in) ** 0.5
    w = jax.random.uniform(kw, (fan_in, fan_out), jnp.float32, -bound, bound)
    b = jax.random.uniform(kb, (1, fan_out), jnp.float32, -bound, bound)
    return w, b


def init_params(key):
    K, F, H = NUM_KEYPOINTS, FEAT, HIDDEN
    keys = iter(jax.random.split(key, 64))

    raw = {}
    raw["a_w1"], raw["a_b1"] = _linear(next(keys), 2 * F, K)      # fc1: Linear(4K, K)
    raw["a_w2"], raw["a_b2"] = _linear(next(keys), K, K)          # fc2: Linear(K, K)

    cells = []
    for layer in range(NUM_LAYERS):
        in_dim = F if layer == 0 else H
        cell = {}
        for g in ("f", "i", "o", "c"):                            # forget,input,output,cell
            cell["w" + g], cell["b" + g] = _linear(next(keys), in_dim + H, H)
        cell["wr"], cell["br"] = _linear(next(keys), in_dim, H)   # residual Linear
        cells.append(cell)
    raw["cells"] = cells

    raw["c_w1"], raw["c_b1"] = _linear(next(keys), H, 128)
    raw["c_w2"], raw["c_b2"] = _linear(next(keys), 128, 64)
    raw["c_w3"], raw["c_b3"] = _linear(next(keys), 64, 32)
    raw["c_w4"], raw["c_b4"] = _linear(next(keys), 32, NUM_CLASSES)

    def gate_pack(cell, part):            # lane-wise [f|i|o|c] packing
        return jnp.concatenate([cell["w" + g][part] for g in ("f", "i", "o", "c")],
                               axis=1)

    def bias_pack(cell):
        return jnp.concatenate([cell["bf"], cell["bi"], cell["bo"], cell["bc"],
                                cell["br"]], axis=1)              # (1, 5H)

    # ---- p160: recurrence weights, lane width 160 = [gates(128)|resid(32)] ---
    p160 = jnp.zeros((P160_ROWS, 5 * H), jnp.float32)
    c0 = cells[0]
    wxr0 = jnp.concatenate([gate_pack(c0, slice(0, F)), c0["wr"]], axis=1)  # (F,5H)
    p160 = p160.at[P160_WXR0:P160_WXR0 + F, :].set(wxr0)
    p160 = p160.at[P160_BXR0:P160_BXR0 + 1, :].set(bias_pack(c0))
    for cell, woff, boff in ((cells[1], P160_WC1, P160_BC1),
                             (cells[2], P160_WC2, P160_BC2)):
        top = jnp.concatenate([gate_pack(cell, slice(0, H)), cell["wr"]], axis=1)
        bot = jnp.concatenate([gate_pack(cell, slice(H, 2 * H)),
                               jnp.zeros((H, H), jnp.float32)], axis=1)
        p160 = p160.at[woff:woff + 2 * H, :].set(jnp.concatenate([top, bot], axis=0))
        p160 = p160.at[boff:boff + 1, :].set(bias_pack(cell))

    # ---- p128: attention + layer-0 hidden weights + classifier ---------------
    p128 = jnp.zeros((P128_ROWS, 128), jnp.float32)
    p128 = p128.at[P128_AW1:P128_AW1 + 2 * F, :K].set(raw["a_w1"])
    p128 = p128.at[P128_AB1, :K].set(raw["a_b1"][0])
    # fold the keypoint -> coord expansion into fc2 (repeat each output column).
    p128 = p128.at[P128_AW2:P128_AW2 + K, :F].set(jnp.repeat(raw["a_w2"], COORDS, axis=1))
    p128 = p128.at[P128_AB2, :F].set(jnp.repeat(raw["a_b2"], COORDS, axis=1)[0])
    p128 = p128.at[P128_WH0:P128_WH0 + H, :].set(gate_pack(c0, slice(F, F + H)))
    p128 = p128.at[P128_CW1:P128_CW1 + H, :].set(raw["c_w1"])
    p128 = p128.at[P128_CB1, :].set(raw["c_b1"][0])
    p128 = p128.at[P128_CW2:P128_CW2 + 128, :64].set(raw["c_w2"])
    p128 = p128.at[P128_CB2, :64].set(raw["c_b2"][0])
    p128 = p128.at[P128_CW3:P128_CW3 + 64, :32].set(raw["c_w3"])
    p128 = p128.at[P128_CB3, :32].set(raw["c_b3"][0])
    p128 = p128.at[P128_CW4:P128_CW4 + 32, :NUM_CLASSES].set(raw["c_w4"])
    p128 = p128.at[P128_CB4, :NUM_CLASSES].set(raw["c_b4"][0])

    return {"p160": p160, "p128": p128, "raw": raw}


# --------------------------- demo ----------------------------------------------

if __name__ == "__main__":
    key = jax.random.PRNGKey(0)
    kx, kp = jax.random.split(key)
    x = jax.random.normal(
        kx, (BATCH, SEQ_LEN, NUM_KEYPOINTS, COORDS), jnp.float32)
    params = init_params(kp)

    fwd = jax.jit(kamtfenet_forward)
    out = jax.block_until_ready(fwd(x, params["p160"], params["p128"]))

    assert out.shape == (BATCH, NUM_CLASSES), out.shape
    assert bool(jnp.all(jnp.isfinite(out)))

    # Validate against a literal sequential pure-JAX reference (loose tol:
    # MXU default-precision vs XLA matmul paths).
    ref = kamtfenet_reference(x, params["raw"])
    assert bool(jnp.allclose(out, ref, atol=5e-2, rtol=5e-2)), (out, ref)

    print("KERNEL_OK")
</pallas_src>

<mosaic_0001>
module attributes {stable_mosaic.version = 11 : i64} {
  func.func @kamtfenet_kernel(%arg0: memref<8x8x34xf32, #tpu.memory_space<vmem>>, %arg1: memref<192x160xf32, #tpu.memory_space<vmem>>, %arg2: memref<432x128xf32, #tpu.memory_space<vmem>>, %arg3: memref<8x128xf32, #tpu.memory_space<vmem>>) attributes {dimension_semantics = [], scalar_prefetch = 0 : i64, scratch_operands = 0 : i64, tpu.core_type = #tpu.core_type<tc>} {
    %c0 = arith.constant 0 : index
    %c0_0 = arith.constant 0 : index
    %c0_1 = arith.constant 0 : index
    %0 = vector.load %arg0[%c0, %c0_0, %c0_1] : memref<8x8x34xf32, #tpu.memory_space<vmem>>, vector<8x8x34xf32>
    %1 = vector.shape_cast %0 : vector<8x8x34xf32> to vector<1x8x8x34xf32>
    %cst = arith.constant dense<0.000000e+00> : vector<1xf32>
    %2 = vector.multi_reduction <add>, %1, %cst [1, 2, 3] : vector<1x8x8x34xf32> to vector<1xf32>
    %3 = vector.shape_cast %2 : vector<1xf32> to vector<1x1x1x1xf32>
    %4 = vector.extract %3[0, 0, 0, 0] : f32 from vector<1x1x1x1xf32>
    %5 = arith.mulf %0, %0 : vector<8x8x34xf32>
    %6 = vector.shape_cast %5 : vector<8x8x34xf32> to vector<1x8x8x34xf32>
    %cst_2 = arith.constant dense<0.000000e+00> : vector<1xf32>
    %7 = vector.multi_reduction <add>, %6, %cst_2 [1, 2, 3] : vector<1x8x8x34xf32> to vector<1xf32>
    %8 = vector.shape_cast %7 : vector<1xf32> to vector<1x1x1x1xf32>
    %9 = vector.extract %8[0, 0, 0, 0] : f32 from vector<1x1x1x1xf32>
    %cst_3 = arith.constant 2.176000e+03 : f32
    %10 = arith.divf %4, %cst_3 : f32
    %cst_4 = arith.constant 2.176000e+03 : f32
    %11 = arith.divf %9, %cst_4 : f32
    %12 = arith.mulf %10, %10 : f32
    %13 = arith.subf %11, %12 : f32
    %cst_5 = arith.constant 9.99999974E-6 : f32
    %14 = arith.addf %13, %cst_5 : f32
    %15 = math.rsqrt %14 : f32
    %cst_6 = arith.constant dense<0.000000e+00> : vector<8x34xf32>
    %16 = vector.multi_reduction <add>, %0, %cst_6 [0] : vector<8x8x34xf32> to vector<8x34xf32>
    %cst_7 = arith.constant 8.000000e+00 : f32
    %17 = vector.broadcast %cst_7 : f32 to vector<8x34xf32>
    %18 = arith.divf %16, %17 : vector<8x34xf32>
    %19 = vector.broadcast %10 : f32 to vector<8x34xf32>
    %20 = arith.subf %18, %19 : vector<8x34xf32>
    %21 = vector.broadcast %15 : f32 to vector<8x34xf32>
    %22 = arith.mulf %20, %21 : vector<8x34xf32>
    %cst_8 = arith.constant dense<0xFF800000> : vector<8x34xf32>
    %23 = vector.multi_reduction <maximumf>, %0, %cst_8 [0] : vector<8x8x34xf32> to vector<8x34xf32>
    %24 = vector.broadcast %10 : f32 to vector<8x34xf32>
    %25 = arith.subf %23, %24 : vector<8x34xf32>
    %26 = vector.broadcast %15 : f32 to vector<8x34xf32>
    %27 = arith.mulf %25, %26 : vector<8x34xf32>
    %28 = tpu.concatenate %22, %27 in 1 : vector<8x34xf32>, vector<8x34xf32> -> vector<8x68xf32>
    %c0_9 = arith.constant 0 : index
    %c0_10 = arith.constant 0 : index
    %29 = vector.load %arg2[%c0_9, %c0_10] : memref<432x128xf32, #tpu.memory_space<vmem>>, vector<68x128xf32>
    %c72 = arith.constant 72 : index
    %c0_11 = arith.constant 0 : index
    %30 = vector.load %arg2[%c72, %c0_11] : memref<432x128xf32, #tpu.memory_space<vmem>>, vector<1x128xf32>
    %cst_12 = arith.constant dense<0.000000e+00> : vector<8x128xf32>
    %31 = tpu.matmul %28, %29, %cst_12 {dimension_numbers = #tpu.dot_dimension_numbers<[1], [0], [0], [1], [0, 0, 1, 1], [], []>} : vector<8x68xf32>, vector<68x128xf32>, vector<8x128xf32> -> vector<8x128xf32>
    %32 = vector.broadcast %30 : vector<1x128xf32> to vector<8x128xf32>
    %33 = arith.addf %31, %32 : vector<8x128xf32>
    %cst_13 = arith.constant 0.000000e+00 : f32
    %34 = vector.broadcast %cst_13 : f32 to vector<8x128xf32>
    %35 = arith.maximumf %33, %34 : vector<8x128xf32>
    %c80 = arith.constant 80 : index
    %c0_14 = arith.constant 0 : index
    %36 = vector.load %arg2[%c80, %c0_14] : memref<432x128xf32, #tpu.memory_space<vmem>>, vector<24x128xf32>
    %c104 = arith.constant 104 : index
    %c0_15 = arith.constant 0 : index
    %37 = vector.load %arg2[%c104, %c0_15] : memref<432x128xf32, #tpu.memory_space<vmem>>, vector<1x128xf32>
    %38 = vector.extract_strided_slice %35 {offsets = [0, 0], sizes = [8, 24], strides = [1, 1]} : vector<8x128xf32> to vector<8x24xf32>
    %cst_16 = arith.constant dense<0.000000e+00> : vector<8x128xf32>
    %39 = tpu.matmul %38, %36, %cst_16 {dimension_numbers = #tpu.dot_dimension_numbers<[1], [0], [0], [1], [0, 0, 1, 1], [], []>} : vector<8x24xf32>, vector<24x128xf32>, vector<8x128xf32> -> vector<8x128xf32>
    %40 = vector.broadcast %37 : vector<1x128xf32> to vector<8x128xf32>
    %41 = arith.addf %39, %40 : vector<8x128xf32>
    %42 = arith.negf %41 : vector<8x128xf32>
    %43 = math.exp %42 : vector<8x128xf32>
    %cst_17 = arith.constant 1.000000e+00 : f32
    %44 = vector.broadcast %cst_17 : f32 to vector<8x128xf32>
    %45 = arith.addf %44, %43 : vector<8x128xf32>
    %46 = arith.divf %44, %45 : vector<8x128xf32>
    %47 = vector.extract_strided_slice %46 {offsets = [0, 0], sizes = [8, 34], strides = [1, 1]} : vector<8x128xf32> to vector<8x34xf32>
    %48 = vector.shape_cast %47 : vector<8x34xf32> to vector<1x8x34xf32>
    %49 = vector.broadcast %48 : vector<1x8x34xf32> to vector<8x8x34xf32>
    %50 = arith.mulf %0, %49 : vector<8x8x34xf32>
    %c0_18 = arith.constant 0 : index
    %c0_19 = arith.constant 0 : index
    %51 = vector.load %arg1[%c0_18, %c0_19] : memref<192x160xf32, #tpu.memory_space<vmem>>, vector<34x160xf32>
    %c40 = arith.constant 40 : index
    %c0_20 = arith.constant 0 : index
    %52 = vector.load %arg1[%c40, %c0_20] : memref<192x160xf32, #tpu.memory_space<vmem>>, vector<1x160xf32>
    %53 = vector.shape_cast %50 : vector<8x8x34xf32> to vector<64x34xf32>
    %cst_21 = arith.constant dense<0.000000e+00> : vector<64x160xf32>
    %54 = tpu.matmul %53, %51, %cst_21 {dimension_numbers = #tpu.dot_dimension_numbers<[1], [0], [0], [1], [0, 0, 1, 1], [], []>} : vector<64x34xf32>, vector<34x160xf32>, vector<64x160xf32> -> vector<64x160xf32>
    %55 = vector.broadcast %52 : vector<1x160xf32> to vector<64x160xf32>
    %56 = arith.addf %54, %55 : vector<64x160xf32>
    %c112 = arith.constant 112 : index
    %c0_22 = arith.constant 0 : index
    %57 = vector.load %arg2[%c112, %c0_22] : memref<432x128xf32, #tpu.memory_space<vmem>>, vector<32x128xf32>
    %c48 = arith.constant 48 : index
    %c0_23 = arith.constant 0 : index
    %58 = vector.load %arg1[%c48, %c0_23] : memref<192x160xf32, #tpu.memory_space<vmem>>, vector<64x160xf32>
    %c120 = arith.constant 120 : index
    %c0_24 = arith.constant 0 : index
    %59 = vector.load %arg1[%c120, %c0_24] : memref<192x160xf32, #tpu.memory_space<vmem>>, vector<64x160xf32>
    %c112_25 = arith.constant 112 : index
    %c0_26 = arith.constant 0 : index
    %60 = vector.load %arg1[%c112_25, %c0_26] : memref<192x160xf32, #tpu.memory_space<vmem>>, vector<1x160xf32>
    %61 = vector.shape_cast %60 : vector<1x160xf32> to vector<1x160xf32>
    %62 = vector.broadcast %61 : vector<1x160xf32> to vector<8x160xf32>
    %c184 = arith.constant 184 : index
    %c0_27 = arith.constant 0 : index
    %63 = vector.load %arg1[%c184, %c0_27] : memref<192x160xf32, #tpu.memory_space<vmem>>, vector<1x160xf32>
    %64 = vector.shape_cast %63 : vector<1x160xf32> to vector<1x160xf32>
    %65 = vector.broadcast %64 : vector<1x160xf32> to vector<8x160xf32>
    %cst_28 = arith.constant 0.000000e+00 : f32
    %66 = vector.broadcast %cst_28 : f32 to vector<8x32xf32>
    %67 = vector.extract_strided_slice %56 {offsets = [0, 0], sizes = [8, 160], strides = [1, 1]} : vector<64x160xf32> to vector<8x160xf32>
    %68 = vector.extract_strided_slice %67 {offsets = [0, 0], sizes = [8, 128], strides = [1, 1]} : vector<8x160xf32> to vector<8x128xf32>
    %cst_29 = arith.constant dense<0.000000e+00> : vector<8x128xf32>
    %69 = tpu.matmul %66, %57, %cst_29 {dimension_numbers = #tpu.dot_dimension_numbers<[1], [0], [0], [1], [0, 0, 1, 1], [], []>} : vector<8x32xf32>, vector<32x128xf32>, vector<8x128xf32> -> vector<8x128xf32>
    %70 = arith.addf %68, %69 : vector<8x128xf32>
    %71 = vector.extract_strided_slice %70 {offsets = [0, 0], sizes = [8, 96], strides = [1, 1]} : vector<8x128xf32> to vector<8x96xf32>
    %72 = arith.negf %71 : vector<8x96xf32>
    %73 = math.exp %72 : vector<8x96xf32>
    %cst_30 = arith.constant 1.000000e+00 : f32
    %74 = vector.broadcast %cst_30 : f32 to vector<8x96xf32>
    %75 = arith.addf %74, %73 : vector<8x96xf32>
    %76 = arith.divf %74, %75 : vector<8x96xf32>
    %77 = vector.extract_strided_slice %70 {offsets = [0, 96], sizes = [8, 32], strides = [1, 1]} : vector<8x128xf32> to vector<8x32xf32>
    %78 = math.tanh %77 : vector<8x32xf32>
    %79 = vector.extract_strided_slice %76 {offsets = [0, 0], sizes = [8, 32], strides = [1, 1]} : vector<8x96xf32> to vector<8x32xf32>
    %80 = arith.mulf %79, %66 : vector<8x32xf32>
    %81 = vector.extract_strided_slice %76 {offsets = [0, 32], sizes = [8, 32], strides = [1, 1]} : vector<8x96xf32> to vector<8x32xf32>
    %82 = arith.mulf %81, %78 : vector<8x32xf32>
    %83 = arith.addf %80, %82 : vector<8x32xf32>
    %84 = vector.extract_strided_slice %76 {offsets = [0, 64], sizes = [8, 32], strides = [1, 1]} : vector<8x96xf32> to vector<8x32xf32>
    %85 = math.tanh %83 : vector<8x32xf32>
    %86 = arith.mulf %84, %85 : vector<8x32xf32>
    %87 = vector.extract_strided_slice %67 {offsets = [0, 128], sizes = [8, 32], strides = [1, 1]} : vector<8x160xf32> to vector<8x32xf32>
    %88 = arith.addf %86, %87 : vector<8x32xf32>
    %89 = vector.extract_strided_slice %56 {offsets = [8, 0], sizes = [8, 160], strides = [1, 1]} : vector<64x160xf32> to vector<8x160xf32>
    %90 = vector.extract_strided_slice %89 {offsets = [0, 0], sizes = [8, 128], strides = [1, 1]} : vector<8x160xf32> to vector<8x128xf32>
    %cst_31 = arith.constant dense<0.000000e+00> : vector<8x128xf32>
    %91 = tpu.matmul %88, %57, %cst_31 {dimension_numbers = #tpu.dot_dimension_numbers<[1], [0], [0], [1], [0, 0, 1, 1], [], []>} : vector<8x32xf32>, vector<32x128xf32>, vector<8x128xf32> -> vector<8x128xf32>
    %92 = arith.addf %90, %91 : vector<8x128xf32>
    %93 = vector.extract_strided_slice %92 {offsets = [0, 0], sizes = [8, 96], strides = [1, 1]} : vector<8x128xf32> to vector<8x96xf32>
    %94 = arith.negf %93 : vector<8x96xf32>
    %95 = math.exp %94 : vector<8x96xf32>
    %cst_32 = arith.constant 1.000000e+00 : f32
    %96 = vector.broadcast %cst_32 : f32 to vector<8x96xf32>
    %97 = arith.addf %96, %95 : vector<8x96xf32>
    %98 = arith.divf %96, %97 : vector<8x96xf32>
    %99 = vector.extract_strided_slice %92 {offsets = [0, 96], sizes = [8, 32], strides = [1, 1]} : vector<8x128xf32> to vector<8x32xf32>
    %100 = math.tanh %99 : vector<8x32xf32>
    %101 = vector.extract_strided_slice %98 {offsets = [0, 0], sizes = [8, 32], strides = [1, 1]} : vector<8x96xf32> to vector<8x32xf32>
    %102 = arith.mulf %101, %83 : vector<8x32xf32>
    %103 = vector.extract_strided_slice %98 {offsets = [0, 32], sizes = [8, 32], strides = [1, 1]} : vector<8x96xf32> to vector<8x32xf32>
    %104 = arith.mulf %103, %100 : vector<8x32xf32>
    %105 = arith.addf %102, %104 : vector<8x32xf32>
    %106 = vector.extract_strided_slice %98 {offsets = [0, 64], sizes = [8, 32], strides = [1, 1]} : vector<8x96xf32> to vector<8x32xf32>
    %107 = math.tanh %105 : vector<8x32xf32>
    %108 = arith.mulf %106, %107 : vector<8x32xf32>
    %109 = vector.extract_strided_slice %89 {offsets = [0, 128], sizes = [8, 32], strides = [1, 1]} : vector<8x160xf32> to vector<8x32xf32>
    %110 = arith.addf %108, %109 : vector<8x32xf32>
    %111 = tpu.concatenate %88, %66 in 1 : vector<8x32xf32>, vector<8x32xf32> -> vector<8x64xf32>
    %cst_33 = arith.constant dense<0.000000e+00> : vector<8x160xf32>
    %112 = tpu.matmul %111, %58, %cst_33 {dimension_numbers = #tpu.dot_dimension_numbers<[1], [0], [0], [1], [0, 0, 1, 1], [], []>} : vector<8x64xf32>, vector<64x160xf32>, vector<8x160xf32> -> vector<8x160xf32>
    %113 = arith.addf %112, %62 : vector<8x160xf32>
    %114 = vector.extract_strided_slice %113 {offsets = [0, 0], sizes = [8, 128], strides = [1, 1]} : vector<8x160xf32> to vector<8x128xf32>
    %115 = vector.extract_strided_slice %114 {offsets = [0, 0], sizes = [8, 96], strides = [1, 1]} : vector<8x128xf32> to vector<8x96xf32>
    %116 = arith.negf %115 : vector<8x96xf32>
    %117 = math.exp %116 : vector<8x96xf32>
    %cst_34 = arith.constant 1.000000e+00 : f32
    %118 = vector.broadcast %cst_34 : f32 to vector<8x96xf32>
    %119 = arith.addf %118, %117 : vector<8x96xf32>
    %120 = arith.divf %118, %119 : vector<8x96xf32>
    %121 = vector.extract_strided_slice %114 {offsets = [0, 96], sizes = [8, 32], strides = [1, 1]} : vector<8x128xf32> to vector<8x32xf32>
    %122 = math.tanh %121 : vector<8x32xf32>
    %123 = vector.extract_strided_slice %120 {offsets = [0, 0], sizes = [8, 32], strides = [1, 1]} : vector<8x96xf32> to vector<8x32xf32>
    %124 = arith.mulf %123, %66 : vector<8x32xf32>
    %125 = vector.extract_strided_slice %120 {offsets = [0, 32], sizes = [8, 32], strides = [1, 1]} : vector<8x96xf32> to vector<8x32xf32>
    %126 = arith.mulf %125, %122 : vector<8x32xf32>
    %127 = arith.addf %124, %126 : vector<8x32xf32>
    %128 = vector.extract_strided_slice %120 {offsets = [0, 64], sizes = [8, 32], strides = [1, 1]} : vector<8x96xf32> to vector<8x32xf32>
    %129 = math.tanh %127 : vector<8x32xf32>
    %130 = arith.mulf %128, %129 : vector<8x32xf32>
    %131 = vector.extract_strided_slice %113 {offsets = [0, 128], sizes = [8, 32], strides = [1, 1]} : vector<8x160xf32> to vector<8x32xf32>
    %132 = arith.addf %130, %131 : vector<8x32xf32>
    %133 = vector.extract_strided_slice %56 {offsets = [16, 0], sizes = [8, 160], strides = [1, 1]} : vector<64x160xf32> to vector<8x160xf32>
    %134 = vector.extract_strided_slice %133 {offsets = [0, 0], sizes = [8, 128], strides = [1, 1]} : vector<8x160xf32> to vector<8x128xf32>
    %cst_35 = arith.constant dense<0.000000e+00> : vector<8x128xf32>
    %135 = tpu.matmul %110, %57, %cst_35 {dimension_numbers = #tpu.dot_dimension_numbers<[1], [0], [0], [1], [0, 0, 1, 1], [], []>} : vector<8x32xf32>, vector<32x128xf32>, vector<8x128xf32> -> vector<8x128xf32>
    %136 = arith.addf %134, %135 : vector<8x128xf32>
    %137 = vector.extract_strided_slice %136 {offsets = [0, 0], sizes = [8, 96], strides = [1, 1]} : vector<8x128xf32> to vector<8x96xf32>
    %138 = arith.negf %137 : vector<8x96xf32>
    %139 = math.exp %138 : vector<8x96xf32>
    %cst_36 = arith.constant 1.000000e+00 : f32
    %140 = vector.broadcast %cst_36 : f32 to vector<8x96xf32>
    %141 = arith.addf %140, %139 : vector<8x96xf32>
    %142 = arith.divf %140, %141 : vector<8x96xf32>
    %143 = vector.extract_strided_slice %136 {offsets = [0, 96], sizes = [8, 32], strides = [1, 1]} : vector<8x128xf32> to vector<8x32xf32>
    %144 = math.tanh %143 : vector<8x32xf32>
    %145 = vector.extract_strided_slice %142 {offsets = [0, 0], sizes = [8, 32], strides = [1, 1]} : vector<8x96xf32> to vector<8x32xf32>
    %146 = arith.mulf %145, %105 : vector<8x32xf32>
    %147 = vector.extract_strided_slice %142 {offsets = [0, 32], sizes = [8, 32], strides = [1, 1]} : vector<8x96xf32> to vector<8x32xf32>
    %148 = arith.mulf %147, %144 : vector<8x32xf32>
    %149 = arith.addf %146, %148 : vector<8x32xf32>
    %150 = vector.extract_strided_slice %142 {offsets = [0, 64], sizes = [8, 32], strides = [1, 1]} : vector<8x96xf32> to vector<8x32xf32>
    %151 = math.tanh %149 : vector<8x32xf32>
    %152 = arith.mulf %150, %151 : vector<8x32xf32>
    %153 = vector.extract_strided_slice %133 {offsets = [0, 128], sizes = [8, 32], strides = [1, 1]} : vector<8x160xf32> to vector<8x32xf32>
    %154 = arith.addf %152, %153 : vector<8x32xf32>
    %155 = tpu.concatenate %110, %132 in 1 : vector<8x32xf32>, vector<8x32xf32> -> vector<8x64xf32>
    %cst_37 = arith.constant dense<0.000000e+00> : vector<8x160xf32>
    %156 = tpu.matmul %155, %58, %cst_37 {dimension_numbers = #tpu.dot_dimension_numbers<[1], [0], [0], [1], [0, 0, 1, 1], [], []>} : vector<8x64xf32>, vector<64x160xf32>, vector<8x160xf32> -> vector<8x160xf32>
    %157 = arith.addf %156, %62 : vector<8x160xf32>
    %158 = vector.extract_strided_slice %157 {offsets = [0, 0], sizes = [8, 128], strides = [1, 1]} : vector<8x160xf32> to vector<8x128xf32>
    %159 = vector.extract_strided_slice %158 {offsets = [0, 0], sizes = [8, 96], strides = [1, 1]} : vector<8x128xf32> to vector<8x96xf32>
    %160 = arith.negf %159 : vector<8x96xf32>
    %161 = math.exp %160 : vector<8x96xf32>
    %cst_38 = arith.constant 1.000000e+00 : f32
    %162 = vector.broadcast %cst_38 : f32 to vector<8x96xf32>
    %163 = arith.addf %162, %161 : vector<8x96xf32>
    %164 = arith.divf %162, %163 : vector<8x96xf32>
    %165 = vector.extract_strided_slice %158 {offsets = [0, 96], sizes = [8, 32], strides = [1, 1]} : vector<8x128xf32> to vector<8x32xf32>
    %166 = math.tanh %165 : vector<8x32xf32>
    %167 = vector.extract_strided_slice %164 {offsets = [0, 0], sizes = [8, 32], strides = [1, 1]} : vector<8x96xf32> to vector<8x32xf32>
    %168 = arith.mulf %167, %127 : vector<8x32xf32>
    %169 = vector.extract_strided_slice %164 {offsets = [0, 32], sizes = [8, 32], strides = [1, 1]} : vector<8x96xf32> to vector<8x32xf32>
    %170 = arith.mulf %169, %166 : vector<8x32xf32>
    %171 = arith.addf %168, %170 : vector<8x32xf32>
    %172 = vector.extract_strided_slice %164 {offsets = [0, 64], sizes = [8, 32], strides = [1, 1]} : vector<8x96xf32> to vector<8x32xf32>
    %173 = math.tanh %171 : vector<8x32xf32>
    %174 = arith.mulf %172, %173 : vector<8x32xf32>
    %175 = vector.extract_strided_slice %157 {offsets = [0, 128], sizes = [8, 32], strides = [1, 1]} : vector<8x160xf32> to vector<8x32xf32>
    %176 = arith.addf %174, %175 : vector<8x32xf32>
    %177 = tpu.concatenate %132, %66 in 1 : vector<8x32xf32>, vector<8x32xf32> -> vector<8x64xf32>
    %cst_39 = arith.constant dense<0.000000e+00> : vector<8x160xf32>
    %178 = tpu.matmul %177, %59, %cst_39 {dimension_numbers = #tpu.dot_dimension_numbers<[1], [0], [0], [1], [0, 0, 1, 1], [], []>} : vector<8x64xf32>, vector<64x160xf32>, vector<8x160xf32> -> vector<8x160xf32>
    %179 = arith.addf %178, %65 : vector<8x160xf32>
    %180 = vector.extract_strided_slice %179 {offsets = [0, 0], sizes = [8, 128], strides = [1, 1]} : vector<8x160xf32> to vector<8x128xf32>
    %181 = vector.extract_strided_slice %180 {offsets = [0, 0], sizes = [8, 96], strides = [1, 1]} : vector<8x128xf32> to vector<8x96xf32>
    %182 = arith.negf %181 : vector<8x96xf32>
    %183 = math.exp %182 : vector<8x96xf32>
    %cst_40 = arith.constant 1.000000e+00 : f32
    %184 = vector.broadcast %cst_40 : f32 to vector<8x96xf32>
    %185 = arith.addf %184, %183 : vector<8x96xf32>
    %186 = arith.divf %184, %185 : vector<8x96xf32>
    %187 = vector.extract_strided_slice %180 {offsets = [0, 96], sizes = [8, 32], strides = [1, 1]} : vector<8x128xf32> to vector<8x32xf32>
    %188 = math.tanh %187 : vector<8x32xf32>
    %189 = vector.extract_strided_slice %186 {offsets = [0, 0], sizes = [8, 32], strides = [1, 1]} : vector<8x96xf32> to vector<8x32xf32>
    %190 = arith.mulf %189, %66 : vector<8x32xf32>
    %191 = vector.extract_strided_slice %186 {offsets = [0, 32], sizes = [8, 32], strides = [1, 1]} : vector<8x96xf32> to vector<8x32xf32>
    %192 = arith.mulf %191, %188 : vector<8x32xf32>
    %193 = arith.addf %190, %192 : vector<8x32xf32>
    %194 = vector.extract_strided_slice %186 {offsets = [0, 64], sizes = [8, 32], strides = [1, 1]} : vector<8x96xf32> to vector<8x32xf32>
    %195 = math.tanh %193 : vector<8x32xf32>
    %196 = arith.mulf %194, %195 : vector<8x32xf32>
    %197 = vector.extract_strided_slice %179 {offsets = [0, 128], sizes = [8, 32], strides = [1, 1]} : vector<8x160xf32> to vector<8x32xf32>
    %198 = arith.addf %196, %197 : vector<8x32xf32>
    %199 = vector.extract_strided_slice %56 {offsets = [24, 0], sizes = [8, 160], strides = [1, 1]} : vector<64x160xf32> to vector<8x160xf32>
    %200 = vector.extract_strided_slice %199 {offsets = [0, 0], sizes = [8, 128], strides = [1, 1]} : vector<8x160xf32> to vector<8x128xf32>
    %cst_41 = arith.constant dense<0.000000e+00> : vector<8x128xf32>
    %201 = tpu.matmul %154, %57, %cst_41 {dimension_numbers = #tpu.dot_dimension_numbers<[1], [0], [0], [1], [0, 0, 1, 1], [], []>} : vector<8x32xf32>, vector<32x128xf32>, vector<8x128xf32> -> vector<8x128xf32>
    %202 = arith.addf %200, %201 : vector<8x128xf32>
    %203 = vector.extract_strided_slice %202 {offsets = [0, 0], sizes = [8, 96], strides = [1, 1]} : vector<8x128xf32> to vector<8x96xf32>
    %204 = arith.negf %203 : vector<8x96xf32>
    %205 = math.exp %204 : vector<8x96xf32>
    %cst_42 = arith.constant 1.000000e+00 : f32
    %206 = vector.broadcast %cst_42 : f32 to vector<8x96xf32>
    %207 = arith.addf %206, %205 : vector<8x96xf32>
    %208 = arith.divf %206, %207 : vector<8x96xf32>
    %209 = vector.extract_strided_slice %202 {offsets = [0, 96], sizes = [8, 32], strides = [1, 1]} : vector<8x128xf32> to vector<8x32xf32>
    %210 = math.tanh %209 : vector<8x32xf32>
    %211 = vector.extract_strided_slice %208 {offsets = [0, 0], sizes = [8, 32], strides = [1, 1]} : vector<8x96xf32> to vector<8x32xf32>
    %212 = arith.mulf %211, %149 : vector<8x32xf32>
    %213 = vector.extract_strided_slice %208 {offsets = [0, 32], sizes = [8, 32], strides = [1, 1]} : vector<8x96xf32> to vector<8x32xf32>
    %214 = arith.mulf %213, %210 : vector<8x32xf32>
    %215 = arith.addf %212, %214 : vector<8x32xf32>
    %216 = vector.extract_strided_slice %208 {offsets = [0, 64], sizes = [8, 32], strides = [1, 1]} : vector<8x96xf32> to vector<8x32xf32>
    %217 = math.tanh %215 : vector<8x32xf32>
    %218 = arith.mulf %216, %217 : vector<8x32xf32>
    %219 = vector.extract_strided_slice %199 {offsets = [0, 128], sizes = [8, 32], strides = [1, 1]} : vector<8x160xf32> to vector<8x32xf32>
    %220 = arith.addf %218, %219 : vector<8x32xf32>
    %221 = tpu.concatenate %154, %176 in 1 : vector<8x32xf32>, vector<8x32xf32> -> vector<8x64xf32>
    %cst_43 = arith.constant dense<0.000000e+00> : vector<8x160xf32>
    %222 = tpu.matmul %221, %58, %cst_43 {dimension_numbers = #tpu.dot_dimension_numbers<[1], [0], [0], [1], [0, 0, 1, 1], [], []>} : vector<8x64xf32>, vector<64x160xf32>, vector<8x160xf32> -> vector<8x160xf32>
    %223 = arith.addf %222, %62 : vector<8x160xf32>
    %224 = vector.extract_strided_slice %223 {offsets = [0, 0], sizes = [8, 128], strides = [1, 1]} : vector<8x160xf32> to vector<8x128xf32>
    %225 = vector.extract_strided_slice %224 {offsets = [0, 0], sizes = [8, 96], strides = [1, 1]} : vector<8x128xf32> to vector<8x96xf32>
    %226 = arith.negf %225 : vector<8x96xf32>
    %227 = math.exp %226 : vector<8x96xf32>
    %cst_44 = arith.constant 1.000000e+00 : f32
    %228 = vector.broadcast %cst_44 : f32 to vector<8x96xf32>
    %229 = arith.addf %228, %227 : vector<8x96xf32>
    %230 = arith.divf %228, %229 : vector<8x96xf32>
    %231 = vector.extract_strided_slice %224 {offsets = [0, 96], sizes = [8, 32], strides = [1, 1]} : vector<8x128xf32> to vector<8x32xf32>
    %232 = math.tanh %231 : vector<8x32xf32>
    %233 = vector.extract_strided_slice %230 {offsets = [0, 0], sizes = [8, 32], strides = [1, 1]} : vector<8x96xf32> to vector<8x32xf32>
    %234 = arith.mulf %233, %171 : vector<8x32xf32>
    %235 = vector.extract_strided_slice %230 {offsets = [0, 32], sizes = [8, 32], strides = [1, 1]} : vector<8x96xf32> to vector<8x32xf32>
    %236 = arith.mulf %235, %232 : vector<8x32xf32>
    %237 = arith.addf %234, %236 : vector<8x32xf32>
    %238 = vector.extract_strided_slice %230 {offsets = [0, 64], sizes = [8, 32], strides = [1, 1]} : vector<8x96xf32> to vector<8x32xf32>
    %239 = math.tanh %237 : vector<8x32xf32>
    %240 = arith.mulf %238, %239 : vector<8x32xf32>
    %241 = vector.extract_strided_slice %223 {offsets = [0, 128], sizes = [8, 32], strides = [1, 1]} : vector<8x160xf32> to vector<8x32xf32>
    %242 = arith.addf %240, %241 : vector<8x32xf32>
    %243 = tpu.concatenate %176, %198 in 1 : vector<8x32xf32>, vector<8x32xf32> -> vector<8x64xf32>
    %cst_45 = arith.constant dense<0.000000e+00> : vector<8x160xf32>
    %244 = tpu.matmul %243, %59, %cst_45 {dimension_numbers = #tpu.dot_dimension_numbers<[1], [0], [0], [1], [0, 0, 1, 1], [], []>} : vector<8x64xf32>, vector<64x160xf32>, vector<8x160xf32> -> vector<8x160xf32>
    %245 = arith.addf %244, %65 : vector<8x160xf32>
    %246 = vector.extract_strided_slice %245 {offsets = [0, 0], sizes = [8, 128], strides = [1, 1]} : vector<8x160xf32> to vector<8x128xf32>
    %247 = vector.extract_strided_slice %246 {offsets = [0, 0], sizes = [8, 96], strides = [1, 1]} : vector<8x128xf32> to vector<8x96xf32>
    %248 = arith.negf %247 : vector<8x96xf32>
    %249 = math.exp %248 : vector<8x96xf32>
    %cst_46 = arith.constant 1.000000e+00 : f32
    %250 = vector.broadcast %cst_46 : f32 to vector<8x96xf32>
    %251 = arith.addf %250, %249 : vector<8x96xf32>
    %252 = arith.divf %250, %251 : vector<8x96xf32>
    %253 = vector.extract_strided_slice %246 {offsets = [0, 96], sizes = [8, 32], strides = [1, 1]} : vector<8x128xf32> to vector<8x32xf32>
    %254 = math.tanh %253 : vector<8x32xf32>
    %255 = vector.extract_strided_slice %252 {offsets = [0, 0], sizes = [8, 32], strides = [1, 1]} : vector<8x96xf32> to vector<8x32xf32>
    %256 = arith.mulf %255, %193 : vector<8x32xf32>
    %257 = vector.extract_strided_slice %252 {offsets = [0, 32], sizes = [8, 32], strides = [1, 1]} : vector<8x96xf32> to vector<8x32xf32>
    %258 = arith.mulf %257, %254 : vector<8x32xf32>
    %259 = arith.addf %256, %258 : vector<8x32xf32>
    %260 = vector.extract_strided_slice %252 {offsets = [0, 64], sizes = [8, 32], strides = [1, 1]} : vector<8x96xf32> to vector<8x32xf32>
    %261 = math.tanh %259 : vector<8x32xf32>
    %262 = arith.mulf %260, %261 : vector<8x32xf32>
    %263 = vector.extract_strided_slice %245 {offsets = [0, 128], sizes = [8, 32], strides = [1, 1]} : vector<8x160xf32> to vector<8x32xf32>
    %264 = arith.addf %262, %263 : vector<8x32xf32>
    %265 = vector.extract_strided_slice %56 {offsets = [32, 0], sizes = [8, 160], strides = [1, 1]} : vector<64x160xf32> to vector<8x160xf32>
    %266 = vector.extract_strided_slice %265 {offsets = [0, 0], sizes = [8, 128], strides = [1, 1]} : vector<8x160xf32> to vector<8x128xf32>
    %cst_47 = arith.constant dense<0.000000e+00> : vector<8x128xf32>
    %267 = tpu.matmul %220, %57, %cst_47 {dimension_numbers = #tpu.dot_dimension_numbers<[1], [0], [0], [1], [0, 0, 1, 1], [], []>} : vector<8x32xf32>, vector<32x128xf32>, vector<8x128xf32> -> vector<8x128xf32>
    %268 = arith.addf %266, %267 : vector<8x128xf32>
    %269 = vector.extract_strided_slice %268 {offsets = [0, 0], sizes = [8, 96], strides = [1, 1]} : vector<8x128xf32> to vector<8x96xf32>
    %270 = arith.negf %269 : vector<8x96xf32>
    %271 = math.exp %270 : vector<8x96xf32>
    %cst_48 = arith.constant 1.000000e+00 : f32
    %272 = vector.broadcast %cst_48 : f32 to vector<8x96xf32>
    %273 = arith.addf %272, %271 : vector<8x96xf32>
    %274 = arith.divf %272, %273 : vector<8x96xf32>
    %275 = vector.extract_strided_slice %268 {offsets = [0, 96], sizes = [8, 32], strides = [1, 1]} : vector<8x128xf32> to vector<8x32xf32>
    %276 = math.tanh %275 : vector<8x32xf32>
    %277 = vector.extract_strided_slice %274 {offsets = [0, 0], sizes = [8, 32], strides = [1, 1]} : vector<8x96xf32> to vector<8x32xf32>
    %278 = arith.mulf %277, %215 : vector<8x32xf32>
    %279 = vector.extract_strided_slice %274 {offsets = [0, 32], sizes = [8, 32], strides = [1, 1]} : vector<8x96xf32> to vector<8x32xf32>
    %280 = arith.mulf %279, %276 : vector<8x32xf32>
    %281 = arith.addf %278, %280 : vector<8x32xf32>
    %282 = vector.extract_strided_slice %274 {offsets = [0, 64], sizes = [8, 32], strides = [1, 1]} : vector<8x96xf32> to vector<8x32xf32>
    %283 = math.tanh %281 : vector<8x32xf32>
    %284 = arith.mulf %282, %283 : vector<8x32xf32>
    %285 = vector.extract_strided_slice %265 {offsets = [0, 128], sizes = [8, 32], strides = [1, 1]} : vector<8x160xf32> to vector<8x32xf32>
    %286 = arith.addf %284, %285 : vector<8x32xf32>
    %287 = tpu.concatenate %220, %242 in 1 : vector<8x32xf32>, vector<8x32xf32> -> vector<8x64xf32>
    %cst_49 = arith.constant dense<0.000000e+00> : vector<8x160xf32>
    %288 = tpu.matmul %287, %58, %cst_49 {dimension_numbers = #tpu.dot_dimension_numbers<[1], [0], [0], [1], [0, 0, 1, 1], [], []>} : vector<8x64xf32>, vector<64x160xf32>, vector<8x160xf32> -> vector<8x160xf32>
    %289 = arith.addf %288, %62 : vector<8x160xf32>
    %290 = vector.extract_strided_slice %289 {offsets = [0, 0], sizes = [8, 128], strides = [1, 1]} : vector<8x160xf32> to vector<8x128xf32>
    %291 = vector.extract_strided_slice %290 {offsets = [0, 0], sizes = [8, 96], strides = [1, 1]} : vector<8x128xf32> to vector<8x96xf32>
    %292 = arith.negf %291 : vector<8x96xf32>
    %293 = math.exp %292 : vector<8x96xf32>
    %cst_50 = arith.constant 1.000000e+00 : f32
    %294 = vector.broadcast %cst_50 : f32 to vector<8x96xf32>
    %295 = arith.addf %294, %293 : vector<8x96xf32>
    %296 = arith.divf %294, %295 : vector<8x96xf32>
    %297 = vector.extract_strided_slice %290 {offsets = [0, 96], sizes = [8, 32], strides = [1, 1]} : vector<8x128xf32> to vector<8x32xf32>
    %298 = math.tanh %297 : vector<8x32xf32>
    %299 = vector.extract_strided_slice %296 {offsets = [0, 0], sizes = [8, 32], strides = [1, 1]} : vector<8x96xf32> to vector<8x32xf32>
    %300 = arith.mulf %299, %237 : vector<8x32xf32>
    %301 = vector.extract_strided_slice %296 {offsets = [0, 32], sizes = [8, 32], strides = [1, 1]} : vector<8x96xf32> to vector<8x32xf32>
    %302 = arith.mulf %301, %298 : vector<8x32xf32>
    %303 = arith.addf %300, %302 : vector<8x32xf32>
    %304 = vector.extract_strided_slice %296 {offsets = [0, 64], sizes = [8, 32], strides = [1, 1]} : vector<8x96xf32> to vector<8x32xf32>
    %305 = math.tanh %303 : vector<8x32xf32>
    %306 = arith.mulf %304, %305 : vector<8x32xf32>
    %307 = vector.extract_strided_slice %289 {offsets = [0, 128], sizes = [8, 32], strides = [1, 1]} : vector<8x160xf32> to vector<8x32xf32>
    %308 = arith.addf %306, %307 : vector<8x32xf32>
    %309 = tpu.concatenate %242, %264 in 1 : vector<8x32xf32>, vector<8x32xf32> -> vector<8x64xf32>
    %cst_51 = arith.constant dense<0.000000e+00> : vector<8x160xf32>
    %310 = tpu.matmul %309, %59, %cst_51 {dimension_numbers = #tpu.dot_dimension_numbers<[1], [0], [0], [1], [0, 0, 1, 1], [], []>} : vector<8x64xf32>, vector<64x160xf32>, vector<8x160xf32> -> vector<8x160xf32>
    %311 = arith.addf %310, %65 : vector<8x160xf32>
    %312 = vector.extract_strided_slice %311 {offsets = [0, 0], sizes = [8, 128], strides = [1, 1]} : vector<8x160xf32> to vector<8x128xf32>
    %313 = vector.extract_strided_slice %312 {offsets = [0, 0], sizes = [8, 96], strides = [1, 1]} : vector<8x128xf32> to vector<8x96xf32>
    %314 = arith.negf %313 : vector<8x96xf32>
    %315 = math.exp %314 : vector<8x96xf32>
    %cst_52 = arith.constant 1.000000e+00 : f32
    %316 = vector.broadcast %cst_52 : f32 to vector<8x96xf32>
    %317 = arith.addf %316, %315 : vector<8x96xf32>
    %318 = arith.divf %316, %317 : vector<8x96xf32>
    %319 = vector.extract_strided_slice %312 {offsets = [0, 96], sizes = [8, 32], strides = [1, 1]} : vector<8x128xf32> to vector<8x32xf32>
    %320 = math.tanh %319 : vector<8x32xf32>
    %321 = vector.extract_strided_slice %318 {offsets = [0, 0], sizes = [8, 32], strides = [1, 1]} : vector<8x96xf32> to vector<8x32xf32>
    %322 = arith.mulf %321, %259 : vector<8x32xf32>
    %323 = vector.extract_strided_slice %318 {offsets = [0, 32], sizes = [8, 32], strides = [1, 1]} : vector<8x96xf32> to vector<8x32xf32>
    %324 = arith.mulf %323, %320 : vector<8x32xf32>
    %325 = arith.addf %322, %324 : vector<8x32xf32>
    %326 = vector.extract_strided_slice %318 {offsets = [0, 64], sizes = [8, 32], strides = [1, 1]} : vector<8x96xf32> to vector<8x32xf32>
    %327 = math.tanh %325 : vector<8x32xf32>
    %328 = arith.mulf %326, %327 : vector<8x32xf32>
    %329 = vector.extract_strided_slice %311 {offsets = [0, 128], sizes = [8, 32], strides = [1, 1]} : vector<8x160xf32> to vector<8x32xf32>
    %330 = arith.addf %328, %329 : vector<8x32xf32>
    %331 = vector.extract_strided_slice %56 {offsets = [40, 0], sizes = [8, 160], strides = [1, 1]} : vector<64x160xf32> to vector<8x160xf32>
    %332 = vector.extract_strided_slice %331 {offsets = [0, 0], sizes = [8, 128], strides = [1, 1]} : vector<8x160xf32> to vector<8x128xf32>
    %cst_53 = arith.constant dense<0.000000e+00> : vector<8x128xf32>
    %333 = tpu.matmul %286, %57, %cst_53 {dimension_numbers = #tpu.dot_dimension_numbers<[1], [0], [0], [1], [0, 0, 1, 1], [], []>} : vector<8x32xf32>, vector<32x128xf32>, vector<8x128xf32> -> vector<8x128xf32>
    %334 = arith.addf %332, %333 : vector<8x128xf32>
    %335 = vector.extract_strided_slice %334 {offsets = [0, 0], sizes = [8, 96], strides = [1, 1]} : vector<8x128xf32> to vector<8x96xf32>
    %336 = arith.negf %335 : vector<8x96xf32>
    %337 = math.exp %336 : vector<8x96xf32>
    %cst_54 = arith.constant 1.000000e+00 : f32
    %338 = vector.broadcast %cst_54 : f32 to vector<8x96xf32>
    %339 = arith.addf %338, %337 : vector<8x96xf32>
    %340 = arith.divf %338, %339 : vector<8x96xf32>
    %341 = vector.extract_strided_slice %334 {offsets = [0, 96], sizes = [8, 32], strides = [1, 1]} : vector<8x128xf32> to vector<8x32xf32>
    %342 = math.tanh %341 : vector<8x32xf32>
    %343 = vector.extract_strided_slice %340 {offsets = [0, 0], sizes = [8, 32], strides = [1, 1]} : vector<8x96xf32> to vector<8x32xf32>
    %344 = arith.mulf %343, %281 : vector<8x32xf32>
    %345 = vector.extract_strided_slice %340 {offsets = [0, 32], sizes = [8, 32], strides = [1, 1]} : vector<8x96xf32> to vector<8x32xf32>
    %346 = arith.mulf %345, %342 : vector<8x32xf32>
    %347 = arith.addf %344, %346 : vector<8x32xf32>
    %348 = vector.extract_strided_slice %340 {offsets = [0, 64], sizes = [8, 32], strides = [1, 1]} : vector<8x96xf32> to vector<8x32xf32>
    %349 = math.tanh %347 : vector<8x32xf32>
    %350 = arith.mulf %348, %349 : vector<8x32xf32>
    %351 = vector.extract_strided_slice %331 {offsets = [0, 128], sizes = [8, 32], strides = [1, 1]} : vector<8x160xf32> to vector<8x32xf32>
    %352 = arith.addf %350, %351 : vector<8x32xf32>
    %353 = tpu.concatenate %286, %308 in 1 : vector<8x32xf32>, vector<8x32xf32> -> vector<8x64xf32>
    %cst_55 = arith.constant dense<0.000000e+00> : vector<8x160xf32>
    %354 = tpu.matmul %353, %58, %cst_55 {dimension_numbers = #tpu.dot_dimension_numbers<[1], [0], [0], [1], [0, 0, 1, 1], [], []>} : vector<8x64xf32>, vector<64x160xf32>, vector<8x160xf32> -> vector<8x160xf32>
    %355 = arith.addf %354, %62 : vector<8x160xf32>
    %356 = vector.extract_strided_slice %355 {offsets = [0, 0], sizes = [8, 128], strides = [1, 1]} : vector<8x160xf32> to vector<8x128xf32>
    %357 = vector.extract_strided_slice %356 {offsets = [0, 0], sizes = [8, 96], strides = [1, 1]} : vector<8x128xf32> to vector<8x96xf32>
    %358 = arith.negf %357 : vector<8x96xf32>
    %359 = math.exp %358 : vector<8x96xf32>
    %cst_56 = arith.constant 1.000000e+00 : f32
    %360 = vector.broadcast %cst_56 : f32 to vector<8x96xf32>
    %361 = arith.addf %360, %359 : vector<8x96xf32>
    %362 = arith.divf %360, %361 : vector<8x96xf32>
    %363 = vector.extract_strided_slice %356 {offsets = [0, 96], sizes = [8, 32], strides = [1, 1]} : vector<8x128xf32> to vector<8x32xf32>
    %364 = math.tanh %363 : vector<8x32xf32>
    %365 = vector.extract_strided_slice %362 {offsets = [0, 0], sizes = [8, 32], strides = [1, 1]} : vector<8x96xf32> to vector<8x32xf32>
    %366 = arith.mulf %365, %303 : vector<8x32xf32>
    %367 = vector.extract_strided_slice %362 {offsets = [0, 32], sizes = [8, 32], strides = [1, 1]} : vector<8x96xf32> to vector<8x32xf32>
    %368 = arith.mulf %367, %364 : vector<8x32xf32>
    %369 = arith.addf %366, %368 : vector<8x32xf32>
    %370 = vector.extract_strided_slice %362 {offsets = [0, 64], sizes = [8, 32], strides = [1, 1]} : vector<8x96xf32> to vector<8x32xf32>
    %371 = math.tanh %369 : vector<8x32xf32>
    %372 = arith.mulf %370, %371 : vector<8x32xf32>
    %373 = vector.extract_strided_slice %355 {offsets = [0, 128], sizes = [8, 32], strides = [1, 1]} : vector<8x160xf32> to vector<8x32xf32>
    %374 = arith.addf %372, %373 : vector<8x32xf32>
    %375 = tpu.concatenate %308, %330 in 1 : vector<8x32xf32>, vector<8x32xf32> -> vector<8x64xf32>
    %cst_57 = arith.constant dense<0.000000e+00> : vector<8x160xf32>
    %376 = tpu.matmul %375, %59, %cst_57 {dimension_numbers = #tpu.dot_dimension_numbers<[1], [0], [0], [1], [0, 0, 1, 1], [], []>} : vector<8x64xf32>, vector<64x160xf32>, vector<8x160xf32> -> vector<8x160xf32>
    %377 = arith.addf %376, %65 : vector<8x160xf32>
    %378 = vector.extract_strided_slice %377 {offsets = [0, 0], sizes = [8, 128], strides = [1, 1]} : vector<8x160xf32> to vector<8x128xf32>
    %379 = vector.extract_strided_slice %378 {offsets = [0, 0], sizes = [8, 96], strides = [1, 1]} : vector<8x128xf32> to vector<8x96xf32>
    %380 = arith.negf %379 : vector<8x96xf32>
    %381 = math.exp %380 : vector<8x96xf32>
    %cst_58 = arith.constant 1.000000e+00 : f32
    %382 = vector.broadcast %cst_58 : f32 to vector<8x96xf32>
    %383 = arith.addf %382, %381 : vector<8x96xf32>
    %384 = arith.divf %382, %383 : vector<8x96xf32>
    %385 = vector.extract_strided_slice %378 {offsets = [0, 96], sizes = [8, 32], strides = [1, 1]} : vector<8x128xf32> to vector<8x32xf32>
    %386 = math.tanh %385 : vector<8x32xf32>
    %387 = vector.extract_strided_slice %384 {offsets = [0, 0], sizes = [8, 32], strides = [1, 1]} : vector<8x96xf32> to vector<8x32xf32>
    %388 = arith.mulf %387, %325 : vector<8x32xf32>
    %389 = vector.extract_strided_slice %384 {offsets = [0, 32], sizes = [8, 32], strides = [1, 1]} : vector<8x96xf32> to vector<8x32xf32>
    %390 = arith.mulf %389, %386 : vector<8x32xf32>
    %391 = arith.addf %388, %390 : vector<8x32xf32>
    %392 = vector.extract_strided_slice %384 {offsets = [0, 64], sizes = [8, 32], strides = [1, 1]} : vector<8x96xf32> to vector<8x32xf32>
    %393 = math.tanh %391 : vector<8x32xf32>
    %394 = arith.mulf %392, %393 : vector<8x32xf32>
    %395 = vector.extract_strided_slice %377 {offsets = [0, 128], sizes = [8, 32], strides = [1, 1]} : vector<8x160xf32> to vector<8x32xf32>
    %396 = arith.addf %394, %395 : vector<8x32xf32>
    %397 = vector.extract_strided_slice %56 {offsets = [48, 0], sizes = [8, 160], strides = [1, 1]} : vector<64x160xf32> to vector<8x160xf32>
    %398 = vector.extract_strided_slice %397 {offsets = [0, 0], sizes = [8, 128], strides = [1, 1]} : vector<8x160xf32> to vector<8x128xf32>
    %cst_59 = arith.constant dense<0.000000e+00> : vector<8x128xf32>
    %399 = tpu.matmul %352, %57, %cst_59 {dimension_numbers = #tpu.dot_dimension_numbers<[1], [0], [0], [1], [0, 0, 1, 1], [], []>} : vector<8x32xf32>, vector<32x128xf32>, vector<8x128xf32> -> vector<8x128xf32>
    %400 = arith.addf %398, %399 : vector<8x128xf32>
    %401 = vector.extract_strided_slice %400 {offsets = [0, 0], sizes = [8, 96], strides = [1, 1]} : vector<8x128xf32> to vector<8x96xf32>
    %402 = arith.negf %401 : vector<8x96xf32>
    %403 = math.exp %402 : vector<8x96xf32>
    %cst_60 = arith.constant 1.000000e+00 : f32
    %404 = vector.broadcast %cst_60 : f32 to vector<8x96xf32>
    %405 = arith.addf %404, %403 : vector<8x96xf32>
    %406 = arith.divf %404, %405 : vector<8x96xf32>
    %407 = vector.extract_strided_slice %400 {offsets = [0, 96], sizes = [8, 32], strides = [1, 1]} : vector<8x128xf32> to vector<8x32xf32>
    %408 = math.tanh %407 : vector<8x32xf32>
    %409 = vector.extract_strided_slice %406 {offsets = [0, 0], sizes = [8, 32], strides = [1, 1]} : vector<8x96xf32> to vector<8x32xf32>
    %410 = arith.mulf %409, %347 : vector<8x32xf32>
    %411 = vector.extract_strided_slice %406 {offsets = [0, 32], sizes = [8, 32], strides = [1, 1]} : vector<8x96xf32> to vector<8x32xf32>
    %412 = arith.mulf %411, %408 : vector<8x32xf32>
    %413 = arith.addf %410, %412 : vector<8x32xf32>
    %414 = vector.extract_strided_slice %406 {offsets = [0, 64], sizes = [8, 32], strides = [1, 1]} : vector<8x96xf32> to vector<8x32xf32>
    %415 = math.tanh %413 : vector<8x32xf32>
    %416 = arith.mulf %414, %415 : vector<8x32xf32>
    %417 = vector.extract_strided_slice %397 {offsets = [0, 128], sizes = [8, 32], strides = [1, 1]} : vector<8x160xf32> to vector<8x32xf32>
    %418 = arith.addf %416, %417 : vector<8x32xf32>
    %419 = tpu.concatenate %352, %374 in 1 : vector<8x32xf32>, vector<8x32xf32> -> vector<8x64xf32>
    %cst_61 = arith.constant dense<0.000000e+00> : vector<8x160xf32>
    %420 = tpu.matmul %419, %58, %cst_61 {dimension_numbers = #tpu.dot_dimension_numbers<[1], [0], [0], [1], [0, 0, 1, 1], [], []>} : vector<8x64xf32>, vector<64x160xf32>, vector<8x160xf32> -> vector<8x160xf32>
    %421 = arith.addf %420, %62 : vector<8x160xf32>
    %422 = vector.extract_strided_slice %421 {offsets = [0, 0], sizes = [8, 128], strides = [1, 1]} : vector<8x160xf32> to vector<8x128xf32>
    %423 = vector.extract_strided_slice %422 {offsets = [0, 0], sizes = [8, 96], strides = [1, 1]} : vector<8x128xf32> to vector<8x96xf32>
    %424 = arith.negf %423 : vector<8x96xf32>
    %425 = math.exp %424 : vector<8x96xf32>
    %cst_62 = arith.constant 1.000000e+00 : f32
    %426 = vector.broadcast %cst_62 : f32 to vector<8x96xf32>
    %427 = arith.addf %426, %425 : vector<8x96xf32>
    %428 = arith.divf %426, %427 : vector<8x96xf32>
    %429 = vector.extract_strided_slice %422 {offsets = [0, 96], sizes = [8, 32], strides = [1, 1]} : vector<8x128xf32> to vector<8x32xf32>
    %430 = math.tanh %429 : vector<8x32xf32>
    %431 = vector.extract_strided_slice %428 {offsets = [0, 0], sizes = [8, 32], strides = [1, 1]} : vector<8x96xf32> to vector<8x32xf32>
    %432 = arith.mulf %431, %369 : vector<8x32xf32>
    %433 = vector.extract_strided_slice %428 {offsets = [0, 32], sizes = [8, 32], strides = [1, 1]} : vector<8x96xf32> to vector<8x32xf32>
    %434 = arith.mulf %433, %430 : vector<8x32xf32>
    %435 = arith.addf %432, %434 : vector<8x32xf32>
    %436 = vector.extract_strided_slice %428 {offsets = [0, 64], sizes = [8, 32], strides = [1, 1]} : vector<8x96xf32> to vector<8x32xf32>
    %437 = math.tanh %435 : vector<8x32xf32>
    %438 = arith.mulf %436, %437 : vector<8x32xf32>
    %439 = vector.extract_strided_slice %421 {offsets = [0, 128], sizes = [8, 32], strides = [1, 1]} : vector<8x160xf32> to vector<8x32xf32>
    %440 = arith.addf %438, %439 : vector<8x32xf32>
    %441 = tpu.concatenate %374, %396 in 1 : vector<8x32xf32>, vector<8x32xf32> -> vector<8x64xf32>
    %cst_63 = arith.constant dense<0.000000e+00> : vector<8x160xf32>
    %442 = tpu.matmul %441, %59, %cst_63 {dimension_numbers = #tpu.dot_dimension_numbers<[1], [0], [0], [1], [0, 0, 1, 1], [], []>} : vector<8x64xf32>, vector<64x160xf32>, vector<8x160xf32> -> vector<8x160xf32>
    %443 = arith.addf %442, %65 : vector<8x160xf32>
    %444 = vector.extract_strided_slice %443 {offsets = [0, 0], sizes = [8, 128], strides = [1, 1]} : vector<8x160xf32> to vector<8x128xf32>
    %445 = vector.extract_strided_slice %444 {offsets = [0, 0], sizes = [8, 96], strides = [1, 1]} : vector<8x128xf32> to vector<8x96xf32>
    %446 = arith.negf %445 : vector<8x96xf32>
    %447 = math.exp %446 : vector<8x96xf32>
    %cst_64 = arith.constant 1.000000e+00 : f32
    %448 = vector.broadcast %cst_64 : f32 to vector<8x96xf32>
    %449 = arith.addf %448, %447 : vector<8x96xf32>
    %450 = arith.divf %448, %449 : vector<8x96xf32>
    %451 = vector.extract_strided_slice %444 {offsets = [0, 96], sizes = [8, 32], strides = [1, 1]} : vector<8x128xf32> to vector<8x32xf32>
    %452 = math.tanh %451 : vector<8x32xf32>
    %453 = vector.extract_strided_slice %450 {offsets = [0, 0], sizes = [8, 32], strides = [1, 1]} : vector<8x96xf32> to vector<8x32xf32>
    %454 = arith.mulf %453, %391 : vector<8x32xf32>
    %455 = vector.extract_strided_slice %450 {offsets = [0, 32], sizes = [8, 32], strides = [1, 1]} : vector<8x96xf32> to vector<8x32xf32>
    %456 = arith.mulf %455, %452 : vector<8x32xf32>
    %457 = arith.addf %454, %456 : vector<8x32xf32>
    %458 = vector.extract_strided_slice %450 {offsets = [0, 64], sizes = [8, 32], strides = [1, 1]} : vector<8x96xf32> to vector<8x32xf32>
    %459 = math.tanh %457 : vector<8x32xf32>
    %460 = arith.mulf %458, %459 : vector<8x32xf32>
    %461 = vector.extract_strided_slice %443 {offsets = [0, 128], sizes = [8, 32], strides = [1, 1]} : vector<8x160xf32> to vector<8x32xf32>
    %462 = arith.addf %460, %461 : vector<8x32xf32>
    %463 = vector.extract_strided_slice %56 {offsets = [56, 0], sizes = [8, 160], strides = [1, 1]} : vector<64x160xf32> to vector<8x160xf32>
    %464 = vector.extract_strided_slice %463 {offsets = [0, 0], sizes = [8, 128], strides = [1, 1]} : vector<8x160xf32> to vector<8x128xf32>
    %cst_65 = arith.constant dense<0.000000e+00> : vector<8x128xf32>
    %465 = tpu.matmul %418, %57, %cst_65 {dimension_numbers = #tpu.dot_dimension_numbers<[1], [0], [0], [1], [0, 0, 1, 1], [], []>} : vector<8x32xf32>, vector<32x128xf32>, vector<8x128xf32> -> vector<8x128xf32>
    %466 = arith.addf %464, %465 : vector<8x128xf32>
    %467 = vector.extract_strided_slice %466 {offsets = [0, 0], sizes = [8, 96], strides = [1, 1]} : vector<8x128xf32> to vector<8x96xf32>
    %468 = arith.negf %467 : vector<8x96xf32>
    %469 = math.exp %468 : vector<8x96xf32>
    %cst_66 = arith.constant 1.000000e+00 : f32
    %470 = vector.broadcast %cst_66 : f32 to vector<8x96xf32>
    %471 = arith.addf %470, %469 : vector<8x96xf32>
    %472 = arith.divf %470, %471 : vector<8x96xf32>
    %473 = vector.extract_strided_slice %466 {offsets = [0, 96], sizes = [8, 32], strides = [1, 1]} : vector<8x128xf32> to vector<8x32xf32>
    %474 = math.tanh %473 : vector<8x32xf32>
    %475 = vector.extract_strided_slice %472 {offsets = [0, 0], sizes = [8, 32], strides = [1, 1]} : vector<8x96xf32> to vector<8x32xf32>
    %476 = arith.mulf %475, %413 : vector<8x32xf32>
    %477 = vector.extract_strided_slice %472 {offsets = [0, 32], sizes = [8, 32], strides = [1, 1]} : vector<8x96xf32> to vector<8x32xf32>
    %478 = arith.mulf %477, %474 : vector<8x32xf32>
    %479 = arith.addf %476, %478 : vector<8x32xf32>
    %480 = vector.extract_strided_slice %472 {offsets = [0, 64], sizes = [8, 32], strides = [1, 1]} : vector<8x96xf32> to vector<8x32xf32>
    %481 = math.tanh %479 : vector<8x32xf32>
    %482 = arith.mulf %480, %481 : vector<8x32xf32>
    %483 = vector.extract_strided_slice %463 {offsets = [0, 128], sizes = [8, 32], strides = [1, 1]} : vector<8x160xf32> to vector<8x32xf32>
    %484 = arith.addf %482, %483 : vector<8x32xf32>
    %485 = tpu.concatenate %418, %440 in 1 : vector<8x32xf32>, vector<8x32xf32> -> vector<8x64xf32>
    %cst_67 = arith.constant dense<0.000000e+00> : vector<8x160xf32>
    %486 = tpu.matmul %485, %58, %cst_67 {dimension_numbers = #tpu.dot_dimension_numbers<[1], [0], [0], [1], [0, 0, 1, 1], [], []>} : vector<8x64xf32>, vector<64x160xf32>, vector<8x160xf32> -> vector<8x160xf32>
    %487 = arith.addf %486, %62 : vector<8x160xf32>
    %488 = vector.extract_strided_slice %487 {offsets = [0, 0], sizes = [8, 128], strides = [1, 1]} : vector<8x160xf32> to vector<8x128xf32>
    %489 = vector.extract_strided_slice %488 {offsets = [0, 0], sizes = [8, 96], strides = [1, 1]} : vector<8x128xf32> to vector<8x96xf32>
    %490 = arith.negf %489 : vector<8x96xf32>
    %491 = math.exp %490 : vector<8x96xf32>
    %cst_68 = arith.constant 1.000000e+00 : f32
    %492 = vector.broadcast %cst_68 : f32 to vector<8x96xf32>
    %493 = arith.addf %492, %491 : vector<8x96xf32>
    %494 = arith.divf %492, %493 : vector<8x96xf32>
    %495 = vector.extract_strided_slice %488 {offsets = [0, 96], sizes = [8, 32], strides = [1, 1]} : vector<8x128xf32> to vector<8x32xf32>
    %496 = math.tanh %495 : vector<8x32xf32>
    %497 = vector.extract_strided_slice %494 {offsets = [0, 0], sizes = [8, 32], strides = [1, 1]} : vector<8x96xf32> to vector<8x32xf32>
    %498 = arith.mulf %497, %435 : vector<8x32xf32>
    %499 = vector.extract_strided_slice %494 {offsets = [0, 32], sizes = [8, 32], strides = [1, 1]} : vector<8x96xf32> to vector<8x32xf32>
    %500 = arith.mulf %499, %496 : vector<8x32xf32>
    %501 = arith.addf %498, %500 : vector<8x32xf32>
    %502 = vector.extract_strided_slice %494 {offsets = [0, 64], sizes = [8, 32], strides = [1, 1]} : vector<8x96xf32> to vector<8x32xf32>
    %503 = math.tanh %501 : vector<8x32xf32>
    %504 = arith.mulf %502, %503 : vector<8x32xf32>
    %505 = vector.extract_strided_slice %487 {offsets = [0, 128], sizes = [8, 32], strides = [1, 1]} : vector<8x160xf32> to vector<8x32xf32>
    %506 = arith.addf %504, %505 : vector<8x32xf32>
    %507 = tpu.concatenate %440, %462 in 1 : vector<8x32xf32>, vector<8x32xf32> -> vector<8x64xf32>
    %cst_69 = arith.constant dense<0.000000e+00> : vector<8x160xf32>
    %508 = tpu.matmul %507, %59, %cst_69 {dimension_numbers = #tpu.dot_dimension_numbers<[1], [0], [0], [1], [0, 0, 1, 1], [], []>} : vector<8x64xf32>, vector<64x160xf32>, vector<8x160xf32> -> vector<8x160xf32>
    %509 = arith.addf %508, %65 : vector<8x160xf32>
    %510 = vector.extract_strided_slice %509 {offsets = [0, 0], sizes = [8, 128], strides = [1, 1]} : vector<8x160xf32> to vector<8x128xf32>
    %511 = vector.extract_strided_slice %510 {offsets = [0, 0], sizes = [8, 96], strides = [1, 1]} : vector<8x128xf32> to vector<8x96xf32>
    %512 = arith.negf %511 : vector<8x96xf32>
    %513 = math.exp %512 : vector<8x96xf32>
    %cst_70 = arith.constant 1.000000e+00 : f32
    %514 = vector.broadcast %cst_70 : f32 to vector<8x96xf32>
    %515 = arith.addf %514, %513 : vector<8x96xf32>
    %516 = arith.divf %514, %515 : vector<8x96xf32>
    %517 = vector.extract_strided_slice %510 {offsets = [0, 96], sizes = [8, 32], strides = [1, 1]} : vector<8x128xf32> to vector<8x32xf32>
    %518 = math.tanh %517 : vector<8x32xf32>
    %519 = vector.extract_strided_slice %516 {offsets = [0, 0], sizes = [8, 32], strides = [1, 1]} : vector<8x96xf32> to vector<8x32xf32>
    %520 = arith.mulf %519, %457 : vector<8x32xf32>
    %521 = vector.extract_strided_slice %516 {offsets = [0, 32], sizes = [8, 32], strides = [1, 1]} : vector<8x96xf32> to vector<8x32xf32>
    %522 = arith.mulf %521, %518 : vector<8x32xf32>
    %523 = arith.addf %520, %522 : vector<8x32xf32>
    %524 = vector.extract_strided_slice %516 {offsets = [0, 64], sizes = [8, 32], strides = [1, 1]} : vector<8x96xf32> to vector<8x32xf32>
    %525 = math.tanh %523 : vector<8x32xf32>
    %526 = arith.mulf %524, %525 : vector<8x32xf32>
    %527 = vector.extract_strided_slice %509 {offsets = [0, 128], sizes = [8, 32], strides = [1, 1]} : vector<8x160xf32> to vector<8x32xf32>
    %528 = arith.addf %526, %527 : vector<8x32xf32>
    %529 = tpu.concatenate %484, %506 in 1 : vector<8x32xf32>, vector<8x32xf32> -> vector<8x64xf32>
    %cst_71 = arith.constant dense<0.000000e+00> : vector<8x160xf32>
    %530 = tpu.matmul %529, %58, %cst_71 {dimension_numbers = #tpu.dot_dimension_numbers<[1], [0], [0], [1], [0, 0, 1, 1], [], []>} : vector<8x64xf32>, vector<64x160xf32>, vector<8x160xf32> -> vector<8x160xf32>
    %531 = arith.addf %530, %62 : vector<8x160xf32>
    %532 = vector.extract_strided_slice %531 {offsets = [0, 0], sizes = [8, 128], strides = [1, 1]} : vector<8x160xf32> to vector<8x128xf32>
    %533 = vector.extract_strided_slice %532 {offsets = [0, 0], sizes = [8, 96], strides = [1, 1]} : vector<8x128xf32> to vector<8x96xf32>
    %534 = arith.negf %533 : vector<8x96xf32>
    %535 = math.exp %534 : vector<8x96xf32>
    %cst_72 = arith.constant 1.000000e+00 : f32
    %536 = vector.broadcast %cst_72 : f32 to vector<8x96xf32>
    %537 = arith.addf %536, %535 : vector<8x96xf32>
    %538 = arith.divf %536, %537 : vector<8x96xf32>
    %539 = vector.extract_strided_slice %532 {offsets = [0, 96], sizes = [8, 32], strides = [1, 1]} : vector<8x128xf32> to vector<8x32xf32>
    %540 = math.tanh %539 : vector<8x32xf32>
    %541 = vector.extract_strided_slice %538 {offsets = [0, 0], sizes = [8, 32], strides = [1, 1]} : vector<8x96xf32> to vector<8x32xf32>
    %542 = arith.mulf %541, %501 : vector<8x32xf32>
    %543 = vector.extract_strided_slice %538 {offsets = [0, 32], sizes = [8, 32], strides = [1, 1]} : vector<8x96xf32> to vector<8x32xf32>
    %544 = arith.mulf %543, %540 : vector<8x32xf32>
    %545 = arith.addf %542, %544 : vector<8x32xf32>
    %546 = vector.extract_strided_slice %538 {offsets = [0, 64], sizes = [8, 32], strides = [1, 1]} : vector<8x96xf32> to vector<8x32xf32>
    %547 = math.tanh %545 : vector<8x32xf32>
    %548 = arith.mulf %546, %547 : vector<8x32xf32>
    %549 = vector.extract_strided_slice %531 {offsets = [0, 128], sizes = [8, 32], strides = [1, 1]} : vector<8x160xf32> to vector<8x32xf32>
    %550 = arith.addf %548, %549 : vector<8x32xf32>
    %551 = tpu.concatenate %506, %528 in 1 : vector<8x32xf32>, vector<8x32xf32> -> vector<8x64xf32>
    %cst_73 = arith.constant dense<0.000000e+00> : vector<8x160xf32>
    %552 = tpu.matmul %551, %59, %cst_73 {dimension_numbers = #tpu.dot_dimension_numbers<[1], [0], [0], [1], [0, 0, 1, 1], [], []>} : vector<8x64xf32>, vector<64x160xf32>, vector<8x160xf32> -> vector<8x160xf32>
    %553 = arith.addf %552, %65 : vector<8x160xf32>
    %554 = vector.extract_strided_slice %553 {offsets = [0, 0], sizes = [8, 128], strides = [1, 1]} : vector<8x160xf32> to vector<8x128xf32>
    %555 = vector.extract_strided_slice %554 {offsets = [0, 0], sizes = [8, 96], strides = [1, 1]} : vector<8x128xf32> to vector<8x96xf32>
    %556 = arith.negf %555 : vector<8x96xf32>
    %557 = math.exp %556 : vector<8x96xf32>
    %cst_74 = arith.constant 1.000000e+00 : f32
    %558 = vector.broadcast %cst_74 : f32 to vector<8x96xf32>
    %559 = arith.addf %558, %557 : vector<8x96xf32>
    %560 = arith.divf %558, %559 : vector<8x96xf32>
    %561 = vector.extract_strided_slice %554 {offsets = [0, 96], sizes = [8, 32], strides = [1, 1]} : vector<8x128xf32> to vector<8x32xf32>
    %562 = math.tanh %561 : vector<8x32xf32>
    %563 = vector.extract_strided_slice %560 {offsets = [0, 0], sizes = [8, 32], strides = [1, 1]} : vector<8x96xf32> to vector<8x32xf32>
    %564 = arith.mulf %563, %523 : vector<8x32xf32>
    %565 = vector.extract_strided_slice %560 {offsets = [0, 32], sizes = [8, 32], strides = [1, 1]} : vector<8x96xf32> to vector<8x32xf32>
    %566 = arith.mulf %565, %562 : vector<8x32xf32>
    %567 = arith.addf %564, %566 : vector<8x32xf32>
    %568 = vector.extract_strided_slice %560 {offsets = [0, 64], sizes = [8, 32], strides = [1, 1]} : vector<8x96xf32> to vector<8x32xf32>
    %569 = math.tanh %567 : vector<8x32xf32>
    %570 = arith.mulf %568, %569 : vector<8x32xf32>
    %571 = vector.extract_strided_slice %553 {offsets = [0, 128], sizes = [8, 32], strides = [1, 1]} : vector<8x160xf32> to vector<8x32xf32>
    %572 = arith.addf %570, %571 : vector<8x32xf32>
    %573 = tpu.concatenate %550, %572 in 1 : vector<8x32xf32>, vector<8x32xf32> -> vector<8x64xf32>
    %cst_75 = arith.constant dense<0.000000e+00> : vector<8x160xf32>
    %574 = tpu.matmul %573, %59, %cst_75 {dimension_numbers = #tpu.dot_dimension_numbers<[1], [0], [0], [1], [0, 0, 1, 1], [], []>} : vector<8x64xf32>, vector<64x160xf32>, vector<8x160xf32> -> vector<8x160xf32>
    %575 = arith.addf %574, %65 : vector<8x160xf32>
    %576 = vector.extract_strided_slice %575 {offsets = [0, 0], sizes = [8, 128], strides = [1, 1]} : vector<8x160xf32> to vector<8x128xf32>
    %577 = vector.extract_strided_slice %576 {offsets = [0, 0], sizes = [8, 96], strides = [1, 1]} : vector<8x128xf32> to vector<8x96xf32>
    %578 = arith.negf %577 : vector<8x96xf32>
    %579 = math.exp %578 : vector<8x96xf32>
    %cst_76 = arith.constant 1.000000e+00 : f32
    %580 = vector.broadcast %cst_76 : f32 to vector<8x96xf32>
    %581 = arith.addf %580, %579 : vector<8x96xf32>
    %582 = arith.divf %580, %581 : vector<8x96xf32>
    %583 = vector.extract_strided_slice %576 {offsets = [0, 96], sizes = [8, 32], strides = [1, 1]} : vector<8x128xf32> to vector<8x32xf32>
    %584 = math.tanh %583 : vector<8x32xf32>
    %585 = vector.extract_strided_slice %582 {offsets = [0, 0], sizes = [8, 32], strides = [1, 1]} : vector<8x96xf32> to vector<8x32xf32>
    %586 = arith.mulf %585, %567 : vector<8x32xf32>
    %587 = vector.extract_strided_slice %582 {offsets = [0, 32], sizes = [8, 32], strides = [1, 1]} : vector<8x96xf32> to vector<8x32xf32>
    %588 = arith.mulf %587, %584 : vector<8x32xf32>
    %589 = arith.addf %586, %588 : vector<8x32xf32>
    %590 = vector.extract_strided_slice %582 {offsets = [0, 64], sizes = [8, 32], strides = [1, 1]} : vector<8x96xf32> to vector<8x32xf32>
    %591 = math.tanh %589 : vector<8x32xf32>
    %592 = arith.mulf %590, %591 : vector<8x32xf32>
    %593 = vector.extract_strided_slice %575 {offsets = [0, 128], sizes = [8, 32], strides = [1, 1]} : vector<8x160xf32> to vector<8x32xf32>
    %594 = arith.addf %592, %593 : vector<8x32xf32>
    %c144 = arith.constant 144 : index
    %c0_77 = arith.constant 0 : index
    %595 = vector.load %arg2[%c144, %c0_77] : memref<432x128xf32, #tpu.memory_space<vmem>>, vector<32x128xf32>
    %cst_78 = arith.constant dense<0.000000e+00> : vector<8x128xf32>
    %596 = tpu.matmul %594, %595, %cst_78 {dimension_numbers = #tpu.dot_dimension_numbers<[1], [0], [0], [1], [0, 0, 1, 1], [], []>} : vector<8x32xf32>, vector<32x128xf32>, vector<8x128xf32> -> vector<8x128xf32>
    %c176 = arith.constant 176 : index
    %c0_79 = arith.constant 0 : index
    %597 = vector.load %arg2[%c176, %c0_79] : memref<432x128xf32, #tpu.memory_space<vmem>>, vector<1x128xf32>
    %598 = vector.broadcast %597 : vector<1x128xf32> to vector<8x128xf32>
    %599 = arith.addf %596, %598 : vector<8x128xf32>
    %cst_80 = arith.constant 0.000000e+00 : f32
    %600 = vector.broadcast %cst_80 : f32 to vector<8x128xf32>
    %601 = arith.maximumf %599, %600 : vector<8x128xf32>
    %c184_81 = arith.constant 184 : index
    %c0_82 = arith.constant 0 : index
    %602 = vector.load %arg2[%c184_81, %c0_82] : memref<432x128xf32, #tpu.memory_space<vmem>>, vector<128x128xf32>
    %cst_83 = arith.constant dense<0.000000e+00> : vector<8x128xf32>
    %603 = tpu.matmul %601, %602, %cst_83 {dimension_numbers = #tpu.dot_dimension_numbers<[1], [0], [0], [1], [0, 0, 1, 1], [], []>} : vector<8x128xf32>, vector<128x128xf32>, vector<8x128xf32> -> vector<8x128xf32>
    %c312 = arith.constant 312 : index
    %c0_84 = arith.constant 0 : index
    %604 = vector.load %arg2[%c312, %c0_84] : memref<432x128xf32, #tpu.memory_space<vmem>>, vector<1x128xf32>
    %605 = vector.broadcast %604 : vector<1x128xf32> to vector<8x128xf32>
    %606 = arith.addf %603, %605 : vector<8x128xf32>
    %cst_85 = arith.constant 0.000000e+00 : f32
    %607 = vector.broadcast %cst_85 : f32 to vector<8x128xf32>
    %608 = arith.maximumf %606, %607 : vector<8x128xf32>
    %609 = vector.extract_strided_slice %608 {offsets = [0, 0], sizes = [8, 64], strides = [1, 1]} : vector<8x128xf32> to vector<8x64xf32>
    %c320 = arith.constant 320 : index
    %c0_86 = arith.constant 0 : index
    %610 = vector.load %arg2[%c320, %c0_86] : memref<432x128xf32, #tpu.memory_space<vmem>>, vector<64x128xf32>
    %cst_87 = arith.constant dense<0.000000e+00> : vector<8x128xf32>
    %611 = tpu.matmul %609, %610, %cst_87 {dimension_numbers = #tpu.dot_dimension_numbers<[1], [0], [0], [1], [0, 0, 1, 1], [], []>} : vector<8x64xf32>, vector<64x128xf32>, vector<8x128xf32> -> vector<8x128xf32>
    %c384 = arith.constant 384 : index
    %c0_88 = arith.constant 0 : index
    %612 = vector.load %arg2[%c384, %c0_88] : memref<432x128xf32, #tpu.memory_space<vmem>>, vector<1x128xf32>
    %613 = vector.broadcast %612 : vector<1x128xf32> to vector<8x128xf32>
    %614 = arith.addf %611, %613 : vector<8x128xf32>
    %cst_89 = arith.constant 0.000000e+00 : f32
    %615 = vector.broadcast %cst_89 : f32 to vector<8x128xf32>
    %616 = arith.maximumf %614, %615 : vector<8x128xf32>
    %617 = vector.extract_strided_slice %616 {offsets = [0, 0], sizes = [8, 32], strides = [1, 1]} : vector<8x128xf32> to vector<8x32xf32>
    %c392 = arith.constant 392 : index
    %c0_90 = arith.constant 0 : index
    %618 = vector.load %arg2[%c392, %c0_90] : memref<432x128xf32, #tpu.memory_space<vmem>>, vector<32x128xf32>
    %cst_91 = arith.constant dense<0.000000e+00> : vector<8x128xf32>
    %619 = tpu.matmul %617, %618, %cst_91 {dimension_numbers = #tpu.dot_dimension_numbers<[1], [0], [0], [1], [0, 0, 1, 1], [], []>} : vector<8x32xf32>, vector<32x128xf32>, vector<8x128xf32> -> vector<8x128xf32>
    %c424 = arith.constant 424 : index
    %c0_92 = arith.constant 0 : index
    %620 = vector.load %arg2[%c424, %c0_92] : memref<432x128xf32, #tpu.memory_space<vmem>>, vector<1x128xf32>
    %621 = vector.broadcast %620 : vector<1x128xf32> to vector<8x128xf32>
    %622 = arith.addf %619, %621 : vector<8x128xf32>
    %c0_93 = arith.constant 0 : index
    %c0_94 = arith.constant 0 : index
    %623 = vector.load %arg3[%c0_93, %c0_94] : memref<8x128xf32, #tpu.memory_space<vmem>>, vector<8x128xf32>
    tpu.vector_store %arg3[%c0_93, %c0_94], %622 {strides = array<i32>} : memref<8x128xf32, #tpu.memory_space<vmem>>, vector<8x128xf32>,
    return
  }
}

</mosaic_0001>

<bundles_post_ra>
// kernel: kamtfenet_forward.1
= control target key start
LH: loop header
LB: loop body
LE: loop exit
PB: predicated region body
PF: predicated region fallthrough
CT: control target
= control target key end

     0   :  { %vm22_vm0 = vcmask 277504   ;;  %v4426_v58 = vmov 0.0|0.0   ;;  %vm137_vm1 = vcmask 1043456   ;;  %vm4428_vm2 = vmmov 0   ;;  %s4429_s26 = smov 34   ;;  %s4430_s11 = smov 64   ;;  %s5496_s0 = inlined_call_operand.vmem [shape: f32[8,8,34], index: 0, kind: input, shape index: {}]   ;;  %s5497_s2 = inlined_call_operand.vmem [shape: f32[432,128], index: 2, kind: input, shape index: {}]   ;;  %s5498_s1 = inlined_call_operand.vmem [shape: f32[192,160], index: 1, kind: input, shape index: {}]   ;;  %s5499_s3 = inlined_call_operand.vmem [shape: f32[8,128], index: 3, kind: output, shape index: {}]  }
   0x1   :  { %v4455_v0 = vld [vmem:[%s5496_s0] sm:$0xff]  ;;  %v4460_v1 = vld [vmem:[%s5496_s0 + $0x8] sm:$0xff]  ;;  %v4465_v2 = vld [vmem:[%s5496_s0 + $0x10] sm:$0xff]  ;;  %3841 = vmatprep.subr.bf16.mxu0 %v4426_v58  ;;  %3853 = vmatprep.subr.bf16.mxu1 %v4426_v58  ;;  %vm133_vm3 = vcmask 556032   ;;  %vm220_vm4 = vcmask 195584   ;;  %vm355_vm5 = vcmask 1041408  }
   0x2   :  { %v4470_v3 = vld [vmem:[%s5496_s0 + $0x18] sm:$0xff]  ;;  %v23_v4 = vsel %vm22_vm0, %v4455_v0, 0.0  ;;  %v24_v5 = vsel %vm22_vm0, %v4460_v1, 0.0  ;;  %v26_v6 = vsel %vm22_vm0, %v4465_v2, 0.0  ;;  %v47_v7 = vmul.f32 %v4455_v0, %v4455_v0  ;;  %v4483_v8 = vld [vmem:[%s5496_s0 + $0x20] sm:$0xff]  ;;  %v4494_v13 = vld [vmem:[%s5496_s0 + $0x28] sm:$0xff] }
   0x3   :  { %v25_v9 = vadd.f32 %v24_v5, %v23_v4  ;;  %v28_v10 = vsel %vm22_vm0, %v4470_v3, 0.0  ;;  %v48_v11 = vmul.f32 %v4460_v1, %v4460_v1  ;;  %v49_v12 = vmul.f32 %v4465_v2, %v4465_v2  ;;  %v4507_v20 = vld [vmem:[%s5496_s0 + $0x30] sm:$0xff]  ;;  %v4518_v27 = vld [vmem:[%s5496_s0 + $0x38] sm:$0xff]  ;;  %v119_v59 = vld [vmem:[%s5497_s2] sm:$0xff]  ;;  %s4431_s12 = smov 96  }
   0x4   :  { %v50_v15 = vmul.f32 %v4470_v3, %v4470_v3  ;;  %v30_v16 = vsel %vm22_vm0, %v4483_v8, 0.0  ;;  %v51_v17 = vmul.f32 %v4483_v8, %v4483_v8  ;;  %v55_v18 = vsel %vm22_vm0, %v47_v7, 0.0  ;;  %v120_v60 = vld [vmem:[%s5497_s2 + $0x8] sm:$0xff]  ;;  %v121_v61 = vld [vmem:[%s5497_s2 + $0x10] sm:$0xff]  ;;  %v122_v63 = vld [vmem:[%s5497_s2 + $0x18] sm:$0xff] }
   0x5   :  { %v27_v14 = vadd.f32 %v26_v6, %v25_v9  ;;  %v56_v19 = vsel %vm22_vm0, %v48_v11, 0.0  ;;  %v58_v23 = vsel %vm22_vm0, %v49_v12, 0.0  ;;  %v32_v24 = vsel %vm22_vm0, %v4494_v13, 0.0  ;;  %v123_v7 = vld [vmem:[%s5497_s2 + $0x20] sm:$0xff]  ;;  %v124_v9 = vld [vmem:[%s5497_s2 + $0x28] sm:$0xff]  ;;  %v125_v11 = vld [vmem:[%s5497_s2 + $0x30] sm:$0xff] }
   0x6   :  { %v57_v22 = vadd.f32 %v56_v19, %v55_v18  ;;  %v52_v25 = vmul.f32 %v4494_v13, %v4494_v13  ;;  %v60_v26 = vsel %vm22_vm0, %v50_v15, 0.0  ;;  %v34_v30 = vsel %vm22_vm0, %v4507_v20, 0.0  ;;  %v126_v12 = vld [vmem:[%s5497_s2 + $0x38] sm:$0xff] }
   0x7   :  { %v29_v21 = vadd.f32 %v28_v10, %v27_v14  ;;  %v53_v31 = vmul.f32 %v4507_v20, %v4507_v20  ;;  %v62_v32 = vsel %vm22_vm0, %v51_v17, 0.0  ;;  %v36_v35 = vsel %vm22_vm0, %v4518_v27, 0.0 }
   0x8   :  { %v59_v29 = vadd.f32 %v58_v23, %v57_v22  ;;  %v54_v36 = vmul.f32 %v4518_v27, %v4518_v27  ;;  %v64_v37 = vsel %vm22_vm0, %v52_v25, 0.0  ;;  %v3842_v62 = vpack.c.bf16 %v120_v60, %v119_v59  ;;  %v310_v59 = vld [vmem:[%s5498_s1 + $0x10] sm:$0xff]  ;;  %v313_v60 = vld [vmem:[%s5498_s1 + $0x28] sm:$0xff] }
   0x9   :  { %v31_v28 = vadd.f32 %v30_v16, %v29_v21  ;;  %v66_v40 = vsel %vm22_vm0, %v53_v31, 0.0  ;;  %v3845_v5 = vpack.c.bf16 %v122_v63, %v121_v61  ;;  %v3848_v10 = vpack.c.bf16 %v124_v9, %v123_v7  ;;  %v315_v61 = vld [vmem:[%s5498_s1 + $0x38] sm:$0xff]  ;;  %v314_v9 = vld [vmem:[%s5498_s1 + $0x30] sm:$0xff] }
   0xa   :  { %v61_v34 = vadd.f32 %v60_v26, %v59_v29  ;;  %v68_v43 = vsel %vm22_vm0, %v54_v36, 0.0  ;;  %3843 = vmatpush3.bf16.msra.mxu0 %v3842_v62  ;;  %v3851_v14 = vpack.c.bf16 %v126_v12, %v125_v11  ;;  %v4427_v15 = vmov 0.0   ;;  %v478_v12 = vld [vmem:[%s5497_s2 + $0x88] sm:$0xff] }
   0xb   :  { %v33_v33 = vadd.f32 %v32_v24, %v31_v28  ;;  %3844 = vmatprep.subr.bf16.mxu0 %v4426_v58  ;;  %v97_v22 = vsel %vm22_vm0, %v4455_v0, -inf  ;;  %v98_v23 = vsel %vm22_vm0, %v4460_v1, -inf  ;;  %v99_v24 = vsel %vm22_vm0, %v4465_v2, -inf  ;;  %3665 = vmatprep.mubr.msk.f32.mxu0 %vm4428_vm2, %v4427_v15 }
   0xc   :  { %v63_v39 = vadd.f32 %v62_v32, %v61_v34  ;;  %v100_v25 = vsel %vm22_vm0, %v4470_v3, -inf  ;;  %v101_v26 = vsel %vm22_vm0, %v4483_v8, -inf  ;;  %v103_v28 = vsel %vm22_vm0, %v4494_v13, -inf  ;;  %3674 = vmatprep.mubr.msk.f32.mxu1 %vm4428_vm2, %v4427_v15 }
   0xd   :  { %v35_v38 = vadd.f32 %v34_v30, %v33_v33  ;;  %v105_v29 = vsel %vm22_vm0, %v4507_v20, -inf  ;;  %v107_v30 = vsel %vm22_vm0, %v4518_v27, -inf  ;;  %v102_v31 = vmax.f32 %v97_v22, %v101_v26 }
   0xe   :  { %v65_v42 = vadd.f32 %v64_v37, %v63_v39  ;;  %3846 = vmatpush3.bf16.msra.mxu0 %v3845_v5  ;;  %v104_v32 = vmax.f32 %v98_v23, %v103_v28  ;;  %v106_v33 = vmax.f32 %v99_v24, %v105_v29  ;;  %v108_v34 = vmax.f32 %v100_v25, %v107_v30  ;;  %v476_v5 = vld [vmem:[%s5497_s2 + $0x78] sm:$0xff] }
   0xf   :  { %v37_v41 = vadd.f32 %v36_v35, %v35_v38  ;;  %3847 = vmatprep.subr.bf16.mxu0 %v4426_v58  ;;  %v127_v35 = vld [vmem:[%s5497_s2 + $0x40] sm:$0xf]  ;;  %v3860_v63 = vpack.c.bf16 %v315_v61, %v313_v60  ;;  %vm537_vm6 = vcmask 261120   ;;  %vm748_vm7 = vcmask 523264  }
  0x10   :  { %v67_v44 = vadd.f32 %v66_v40, %v65_v42  ;;  %v109_v36 = vmax.f32 %v102_v31, %v104_v32  ;;  %v110_v37 = vmax.f32 %v106_v33, %v108_v34  ;;  %v321_v33 = vlaneseq }
  0x11   :  { %38 = vadd.xlane.f32.xlu0 %v37_v41  ;;  %v92_v16 = vmul.f32 0.125, %v37_v41 }
  0x12   :  { %v69_v45 = vadd.f32 %v68_v43, %v67_v44  ;;  %3849 = vmatpush3.bf16.msra.mxu0 %v3848_v10  ;;  %v111_v38 = vmax.f32 %v109_v36, %v110_v37  ;;  %v477_v10 = vld [vmem:[%s5497_s2 + $0x80] sm:$0xff] }
  0x13   :  { %3850 = vmatprep.subr.bf16.mxu0 %v4426_v58 }
  0x15   :  { %70 = vadd.xlane.f32.xlu0 %v69_v45  ;;  %v212_v45 = vld [vmem:[%s5497_s2 + $0x50] sm:$0xff] }
  0x16   :  { %3852 = vmatpush3.bf16.msra.mxu0 %v3851_v14  ;;  %v4647_v14 = vpack.c.bf16 %v478_v12, %v477_v10 }
  0x17   :  { %3663 = vmatprep.subr.mxu0 %v4427_v15 }
  0x1a   :  { %3664 = vmatpush3.msk.msra.mxu0 %vm137_vm1, %v127_v35 }
  0x1b   :  { %3864 = vmatprep.subr.bf16.mxu0 %v4426_v58 }
  0x9e   :  { %v39_v46 = vpop.xlane.xlu0 %38 }
  0x9f   :  { %v40_v47 = vrot.slane %v39_v46, 4 }
  0xa1   :  { %v41_v48 = vadd.f32 %v40_v47, %v39_v46  ;;  %v213_v46 = vld [vmem:[%s5497_s2 + $0x58] sm:$0xff] }
  0xa2   :  { %v71_v49 = vpop.xlane.xlu0 %70  ;;  %v3854_v47 = vpack.c.bf16 %v213_v46, %v212_v45 }
  0xa3   :  { %v72_v50 = vrot.slane %v71_v49, 4  ;;  %v42_v51 = vrot.slane %v41_v48, 2 }
  0xa4   :  { %3855 = vmatpush3.bf16.msra.mxu1 %v3854_v47 }
  0xa5   :  { %v73_v52 = vadd.f32 %v72_v50, %v71_v49  ;;  %v43_v53 = vadd.f32 %v42_v51, %v41_v48  ;;  %3672 = vmatprep.subr.mxu1 %v4427_v15  ;;  %v214_v48 = vld [vmem:[%s5497_s2 + $0x60] sm:$0xff]  ;;  %v3484_v49 = vld [vmem:[%s5497_s2 + $0x48] ss:$0 sm:$0xff] }
  0xa7   :  { %v44_v54 = vrot.slane %v43_v53, 1  ;;  %v74_v55 = vrot.slane %v73_v52, 2 }
  0xa8   :  { %3673 = vmatpush3.msra.mxu1 %v214_v48 }
  0xa9   :  { %v45_v56 = vadd.f32 %v44_v54, %v43_v53  ;;  %v75_v57 = vadd.f32 %v74_v55, %v73_v52  ;;  %v309_v54 = vld [vmem:[%s5498_s1 + $0x8] sm:$0xff]  ;;  %v311_v55 = vld [vmem:[%s5498_s1 + $0x18] sm:$0xff] }
  0xab   :  { %4216 = vpush %v45_v56  ;;  %v76_v4 = vrot.slane %v75_v57, 1  ;;  %v308_v56 = vld [vmem:[%s5498_s1] sm:$0xff] }
  0xac   :  { %v3858_v62 = vpack.c.bf16 %v310_v59, %v308_v56 }
  0xad   :  { %v77_v6 = vadd.f32 %v76_v4, %v75_v57  ;;  %v3856_v57 = vpack.c.bf16 %v311_v55, %v309_v54  ;;  %v475_v4 = vld [vmem:[%s5497_s2 + $0x70] sm:$0xff] }
  0xae   :  { %v4635_v7 = vpack.c.bf16 %v476_v5, %v475_v4 }
  0xaf   :  { %4218 = vpush %v77_v6  ;;  %v312_v6 = vld [vmem:[%s5498_s1 + $0x20] sm:$0xff]  ;;  %3857 = vmatprep.subr.bf16.mxu1 %v3856_v57 }
  0xb0   :  { %v3862_v11 = vpack.c.bf16 %v314_v9, %v312_v6 }
  0xdc   :  { %s4217_s16 = spop %4216 }
  0xdd   :  { %s4562_s17 = smul.f32 0.00045955883, %s4217_s16 }
  0xdf   :  { %v93_v17 = vstv %s4562_s17  ;;  %s85_s18 = smul.f32 %s4562_s17, %s4562_s17 }
  0xe0   :  { %s4219_s19 = spop %4218  ;;  %v94_v18 = vsub.f32 %v92_v16, %v93_v17  ;;  %v112_v39 = vsub.f32 %v111_v38, %v93_v17  ;;  %v317_v16 = vld [vmem:[%s5498_s1 + $0x48] sm:$0x3]  ;;  %v316_v17 = vld [vmem:[%s5498_s1 + $0x40] sm:$0x3] }
  0xe1   :  { %s84_s20 = smul.f32 0.00045955883, %s4219_s19 }
  0xe3   :  { %s86_s21 = ssub.f32 %s84_s20, %s85_s18 }
  0xe5   :  { %s87_s22 = sadd.f32 1e-05, %s86_s21 }
  0xe7   :  { %v88_v19 = vstv %s87_s22 }
  0xe8   :  { %4228 = vrsqrt.f32 %v88_v19 }
  0xf2   :  { %v4229_v21 = vpop.eup %4228 }
  0xf3   :  { %4220 = vpush %v4229_v21 }
 0x124   :  { %s4221_s25 = spop %4220 }
 0x125   :  { %v95_v40 = vstv %s4221_s25 }
 0x126   :  { %v96_v41 = vmul.f32 %v95_v40, %v94_v18  ;;  %v113_v42 = vmul.f32 %v112_v39, %v95_v40  ;;  %v3487_v18 = vld [vmem:[%s5497_s2 + $0x68] ss:$0 sm:$0xff] }
 0x128   :  { %115 = vrot.lane.b32.xlu1 %v113_v42, %s4429_s26 }
 0x19a   :  { %v116_v43 = vpop.permute.xlu1 %115 }
 0x19b   :  { %v118_v44 = vsel %vm22_vm0, %v96_v41, %v116_v43 }
 0x19c   :  { %3666 = vmatmul.mubr.msk.f32.vlgmr.msra.gmra.mrb[0].mxu0 %vm133_vm3, %v118_v44 }
 0x19d   :  { %3685 = vmatprep.mubr.msk.f32.mxu0 %vm4428_vm2, %v4427_v15  ;;  %3866 = vmatpush3.bf16.msra.mxu0 %v4635_v7 }
 0x19e   :  { %3867 = vmatprep.subr.bf16.mxu0 %v4426_v58 }
 0x1a1   :  { %3869 = vmatpush3.bf16.msra.mxu0 %v4647_v14 }
 0x1a2   :  { %3870 = vmatprep.subr.bf16.mxu0 %v4426_v58 }
 0x1a4   :  { %3686 = vmatmul.mubr.f32.vlgmr.msra.gmra.mrb[2].mxu0 %v4427_v15 }
 0x1a5   :  { %3872 = vmatpush3.bf16.msra.mxu0 %v4635_v7  ;;  %3696 = vmatprep.mubr.msk.f32.mxu0 %vm4428_vm2, %v4427_v15 }
 0x1a6   :  { %3873 = vmatprep.subr.bf16.mxu0 %v4426_v58 }
 0x1a9   :  { %3875 = vmatpush3.bf16.msra.mxu0 %v4647_v14 }
 0x1aa   :  { %3892 = vmatprep.subr.bf16.mxu0 %v4426_v58 }
 0x26f   :  { %v207_v50 = vpop.f32.mrb[0].mxu0 }
 0x270   :  { %v208_v51 = vadd.f32 %v3484_v49, %v207_v50  ;;  %v3667_v52 = vpop.f32.mrb[1].mxu0 }
 0x272   :  { %v211_v53 = vmax.f32 %v208_v51, 0.0 }
 0x274   :  { %3675 = vmatmul.mubr.msk.f32.vlgmr.msra.gmra.mrb[0].mxu1 %vm220_vm4, %v211_v53 }
 0x275   :  { %426 = vmatprep.mubr.f32.mxu1 %v4427_v15  ;;  %3859 = vmatpush1.bf16.msra.mxu1 %v3858_v62 }
 0x276   :  { %3861 = vmatprep.subr.bf16.mxu1 %v3860_v63 }
 0x279   :  { %3863 = vmatpush1.bf16.msra.mxu1 %v3862_v11 }
 0x27a   :  { %3491 = vmatprep.subr.msk.mxu1 %vm355_vm5, %v317_v16 }
 0x27d   :  { %3492 = vmatpush1.msk.msra.mxu1 %vm355_vm5, %v316_v17 }
 0x347   :  { %v290_v19 = vpop.f32.mrb[0].mxu1 }
 0x348   :  { %v291_v21 = vadd.f32 %v3487_v18, %v290_v19  ;;  %v3676_v22 = vpop.f32.mrb[1].mxu1 }
 0x34a   :  { %v3489_v23 = vmul.f32 -1.442695, %v291_v21 }
 0x34c   :  { %4230 = vpow2.f32 %v3489_v23 }
 0x356   :  { %v4231_v24 = vpop.eup %4230 }
 0x357   :  { %v297_v25 = vadd.f32 1.0, %v4231_v24 }
 0x359   :  { %4232 = vrcp.f32 %v297_v25 }
 0x363   :  { %v4233_v26 = vpop.eup %4232 }
 0x364   :  { %v300_v28 = vmul.f32 %v4233_v26, %v4455_v0  ;;  %v301_v29 = vmul.f32 %v4233_v26, %v4460_v1  ;;  %v302_v30 = vmul.f32 %v4233_v26, %v4465_v2  ;;  %v303_v31 = vmul.f32 %v4233_v26, %v4470_v3 }
 0x365   :  { %v304_v0 = vmul.f32 %v4233_v26, %v4483_v8  ;;  %v305_v1 = vmul.f32 %v4233_v26, %v4494_v13  ;;  %v306_v2 = vmul.f32 %v4233_v26, %v4507_v20  ;;  %v307_v3 = vmul.f32 %v4233_v26, %v4518_v27  ;;  %v607_v8 = vpop.f32.mrb[2].mxu0  ;;  %v3490_v20 = vld [vmem:[%s5498_s1 + $0x50] ss:$8 sm:$0x3]  ;;  %v480_v26 = vld [vmem:[%s5498_s1 + $0x68] sm:$0xff] }
 0x366   :  { %3493 = vmatmul.mubr.msk.f32.vlgmr.msra.gmra.mrb[2].mxu1 %vm22_vm0, %v300_v28  ;;  %v3687_v32 = vpop.f32.mrb[3].mxu0  ;;  %v322_v13 = vshrl.u32 %v321_v33, 7  ;;  %v482_v28 = vld [vmem:[%s5498_s1 + $0x78] sm:$0xff]  ;;  %v488_v33 = vld [vmem:[%s5498_s1 + $0xa8] sm:$0xff] }
 0x367   :  { %432 = vmatprep.mubr.f32.mxu1 %v4427_v15  ;;  %v485_v32 = vld [vmem:[%s5498_s1 + $0x90] sm:$0xff] }
 0x368   :  { %v4692_v34 = vsub.s32 0, %v322_v13  ;;  %v4698_v37 = vsub.s32 1, %v322_v13  ;;  %v490_v13 = vld [vmem:[%s5498_s1 + $0xb8] sm:$0xff] }
 0x36a   :  { %3494 = vmatmul.mubr.msk.f32.gmra.mrb[4].mxu1 %vm22_vm0, %v301_v29  ;;  %v324_v35 = vrot.slane %v3490_v20, %v4692_v34  ;;  %v4703_v40 = vrot.slane %v3490_v20, %v4698_v37  ;;  %v479_v29 = vld [vmem:[%s5498_s1 + $0x60] sm:$0xff] }
 0x36b   :  { %438 = vmatprep.mubr.f32.mxu1 %v4427_v15 }
 0x36e   :  { %3495 = vmatmul.mubr.msk.f32.gmra.mrb[6].mxu1 %vm22_vm0, %v302_v30  ;;  %v4754_v30 = vpack.c.bf16 %v482_v28, %v480_v26 }
 0x36f   :  { %444 = vmatprep.mubr.f32.mxu1 %v4427_v15 }
 0x370   :  { %3877 = vmatprep.subr.bf16.mxu1 %v4754_v30 }
 0x372   :  { %3496 = vmatmul.mubr.msk.f32.gmra.mrb[8].mxu1 %vm22_vm0, %v303_v31  ;;  %v481_v31 = vld [vmem:[%s5498_s1 + $0x70] sm:$0xff] }
 0x373   :  { %450 = vmatprep.mubr.f32.mxu1 %v4427_v15 }
 0x376   :  { %3497 = vmatmul.mubr.msk.f32.gmra.mrb[10].mxu1 %vm22_vm0, %v304_v0  ;;  %v484_v0 = vld [vmem:[%s5498_s1 + $0x88] sm:$0xff] }
 0x377   :  { %456 = vmatprep.mubr.f32.mxu1 %v4427_v15 }
 0x37a   :  { %3498 = vmatmul.mubr.msk.f32.gmra.mrb[12].mxu1 %vm22_vm0, %v305_v1  ;;  %v486_v1 = vld [vmem:[%s5498_s1 + $0x98] sm:$0xff] }
 0x37b   :  { %462 = vmatprep.mubr.f32.mxu1 %v4427_v15 }
 0x37e   :  { %3499 = vmatmul.mubr.msk.f32.gmra.mrb[14].mxu1 %vm22_vm0, %v306_v2  ;;  %v4765_v2 = vpack.c.bf16 %v481_v31, %v479_v29 }
 0x37f   :  { %468 = vmatprep.mubr.f32.mxu1 %v4427_v15 }
 0x380   :  { %3879 = vmatpush1.bf16.msra.mxu1 %v4765_v2 }
 0x382   :  { %3500 = vmatmul.mubr.msk.f32.gmra.mrb[16].mxu1 %vm22_vm0, %v307_v3  ;;  %v4767_v3 = vpack.c.bf16 %v486_v1, %v484_v0 }
 0x383   :  { %816 = vmatprep.mubr.f32.mxu1 %v4427_v15 }
 0x384   :  { %3881 = vmatprep.subr.bf16.mxu1 %v4767_v3 }
 0x439   :  { %v428_v36 = vpop.f32.mrb[2].mxu1 }
 0x43a   :  { %v429_v27 = vadd.f32 %v428_v36, %v324_v35  ;;  %v4700_v38 = vpop.f32.mrb[3].mxu1  ;;  %v487_v36 = vld [vmem:[%s5498_s1 + $0xa0] sm:$0xff] }
 0x43c   :  { %v611_v39 = vadd.f32 %v607_v8, %v429_v27  ;;  %v483_v8 = vld [vmem:[%s5498_s1 + $0x80] sm:$0xff]  ;;  %v489_v27 = vld [vmem:[%s5498_s1 + $0xb0] sm:$0xff] }
 0x43d   :  { %v434_v41 = vpop.f32.mrb[4].mxu1  ;;  %v4783_v20 = vpack.c.bf16 %v485_v32, %v483_v8 }
 0x43e   :  { %4234 = vtanh.f32 %v611_v39  ;;  %v4705_v42 = vadd.f32 %v434_v41, %v324_v35  ;;  %v436_v43 = vpop.f32.mrb[5].mxu1  ;;  %v3503_v16 = vmul.f32 -1.442695, %v611_v39  ;;  %v492_v41 = vld [vmem:[%s5498_s1 + $0xc8] sm:$0xff] }
 0x43f   :  { %v4708_v44 = vadd.f32 %v436_v43, %v4703_v40  ;;  %v494_v43 = vld [vmem:[%s5498_s1 + $0xd8] sm:$0xff]  ;;  %3883 = vmatpush1.bf16.msra.mxu1 %v4783_v20 }
 0x440   :  { %4236 = vpow2.f32 %v3503_v16 }
 0x441   :  { %v440_v45 = vpop.f32.mrb[6].mxu1 }
 0x442   :  { %v4710_v46 = vadd.f32 %v440_v45, %v324_v35  ;;  %v442_v47 = vpop.f32.mrb[7].mxu1  ;;  %v4802_v45 = vpack.c.bf16 %v489_v27, %v487_v36 }
 0x443   :  { %v4713_v48 = vadd.f32 %v442_v47, %v4703_v40  ;;  %v431_v47 = vadd.f32 %v4700_v38, %v4703_v40 }
 0x445   :  { %v446_v49 = vpop.f32.mrb[8].mxu1 }
 0x446   :  { %v4715_v50 = vadd.f32 %v446_v49, %v324_v35  ;;  %v448_v51 = vpop.f32.mrb[9].mxu1  ;;  %v4807_v49 = vpack.c.bf16 %v494_v43, %v492_v41 }
 0x447   :  { %v4718_v52 = vadd.f32 %v448_v51, %v4703_v40  ;;  %v491_v51 = vld [vmem:[%s5498_s1 + $0xc0] sm:$0xff] }
 0x448   :  { %v4235_v53 = vpop.eup %4234 }
 0x449   :  { %v452_v54 = vpop.f32.mrb[10].mxu1  ;;  %621 = vrot.lane.b32.xlu1 %v4235_v53, %s4430_s11  ;;  %v493_v53 = vld [vmem:[%s5498_s1 + $0xd0] sm:$0xff] }
 0x44a   :  { %v4721_v55 = vadd.f32 %v452_v54, %v324_v35  ;;  %v454_v56 = vpop.f32.mrb[11].mxu1  ;;  %v4237_v17 = vpop.eup %4236  ;;  %v4817_v54 = vpack.c.bf16 %v493_v53, %v491_v51 }
 0x44b   :  { %v4724_v57 = vadd.f32 %v454_v56, %v4703_v40  ;;  %v615_v18 = vadd.f32 1.0, %v4237_v17 }
 0x44d   :  { %v458_v59 = vpop.f32.mrb[12].mxu1  ;;  %4238 = vrcp.f32 %v615_v18 }
 0x44e   :  { %v4726_v60 = vadd.f32 %v458_v59, %v324_v35  ;;  %v460_v61 = vpop.f32.mrb[13].mxu1 }
 0x44f   :  { %v4729_v62 = vadd.f32 %v460_v61, %v4703_v40 }
 0x451   :  { %v464_v63 = vpop.f32.mrb[14].mxu1 }
 0x452   :  { %v4731_v4 = vadd.f32 %v464_v63, %v324_v35  ;;  %v466_v5 = vpop.f32.mrb[15].mxu1 }
 0x453   :  { %v4734_v6 = vadd.f32 %v466_v5, %v4703_v40  ;;  %v3501_v5 = vld [vmem:[%s5498_s1 + $0xe0] ss:$8 sm:$0x3] }
 0x454   :  { %v4845_v36 = vrot.slane %v3501_v5, %v4698_v37 }
 0x455   :  { %v470_v9 = vpop.f32.mrb[16].mxu1 }
 0x456   :  { %v4736_v10 = vadd.f32 %v470_v9, %v324_v35  ;;  %v472_v11 = vpop.f32.mrb[17].mxu1  ;;  %v4786_v35 = vpack.c.bf16 %v490_v13, %v488_v33  ;;  %v4836_v9 = vrot.slane %v3501_v5, %v4692_v34 }
 0x457   :  { %v4739_v12 = vadd.f32 %v472_v11, %v4703_v40  ;;  %v4239_v19 = vpop.eup %4238 }
 0x458   :  { %v619_v23 = vmul.f32 0.0, %v4239_v19  ;;  %3885 = vmatprep.subr.bf16.mxu1 %v4786_v35 }
 0x459   :  { %3887 = vmatpush1.bf16.msra.mxu1 %v4802_v45 }
 0x45a   :  { %3889 = vmatprep.subr.bf16.mxu1 %v4807_v49 }
 0x45d   :  { %3891 = vmatpush1.bf16.msra.mxu1 %v4817_v54 }
 0x4bb   :  { %v622_v21 = vpop.permute.xlu1 %621 }
 0x4bc   :  { %v624_v22 = vmul.f32 %v4239_v19, %v622_v21 }
 0x4be   :  { %626 = vrot.lane.b32.xlu0 %v624_v22, %s4431_s12 }
 0x530   :  { %v627_v24 = vpop.permute.xlu0 %626 }
 0x531   :  { %v4742_v25 = vadd.f32 %v627_v24, %v619_v23 }
 0x533   :  { %4240 = vtanh.f32 %v4742_v25 }
 0x53d   :  { %v4241_v39 = vpop.eup %4240 }
 0x53e   :  { %632 = vrot.lane.b32.xlu1 %v4241_v39, %s4430_s11 }
 0x542   :  { %637 = vrot.lane.b32.xlu1 %v431_v47, %s4430_s11 }
 0x5b0   :  { %v633_v38 = vpop.permute.xlu1 %632 }
 0x5b1   :  { %v635_v40 = vmul.f32 %v4239_v19, %v633_v38  ;;  %v498_v38 = vld [vmem:[%s5498_s1 + $0x108] sm:$0xff] }
 0x5b4   :  { %v638_v56 = vpop.permute.xlu1 %637 }
 0x5b5   :  { %v640_v59 = vadd.f32 %v638_v56, %v635_v40  ;;  %v497_v56 = vld [vmem:[%s5498_s1 + $0x100] sm:$0xff] }
 0x5b7   :  { %642 = vrot.lane.b32.xlu1 %v640_v59, %s4430_s11  ;;  %v500_v59 = vld [vmem:[%s5498_s1 + $0x118] sm:$0xff] }
 0x629   :  { %v643_v61 = vpop.permute.xlu1 %642 }
 0x62a   :  { %v747_v63 = vsel %vm537_vm6, %v643_v61, 0.0  ;;  %3697 = vmatmul.mubr.msk.f32.vlgmr.msra.gmra.mrb[4].mxu0 %vm537_vm6, %v643_v61  ;;  %v502_v61 = vld [vmem:[%s5498_s1 + $0x128] sm:$0xff] }
 0x62b   :  { %3506 = vmatmul.mubr.msk.f32.vlgmr.msra.gmra.mrb[18].mxu1 %vm748_vm7, %v747_v63  ;;  %3894 = vmatpush3.bf16.msra.mxu0 %v4635_v7  ;;  %v4880_v5 = vpack.c.bf16 %v502_v61, %v500_v59  ;;  %v3502_v61 = vld [vmem:[%s5498_s1 + $0x170] ss:$8 sm:$0x3] }
 0x62c   :  { %3895 = vmatprep.subr.bf16.mxu0 %v4426_v58  ;;  %3707 = vmatprep.mubr.msk.f32.mxu0 %vm4428_vm2, %v4427_v15 }
 0x62d   :  { %1137 = vmatprep.mubr.f32.mxu1 %v4427_v15 }
 0x62f   :  { %3897 = vmatpush3.bf16.msra.mxu0 %v4647_v14 }
 0x630   :  { %3899 = vmatprep.subr.bf16.mxu0 %v4754_v30 }
 0x6fd   :  { %v712_v11 = vpop.f32.mrb[4].mxu0 }
 0x6fe   :  { %v716_v16 = vadd.f32 %v712_v11, %v4705_v42  ;;  %v3698_v17 = vpop.f32.mrb[5].mxu0  ;;  %v818_v18 = vpop.f32.mrb[18].mxu1  ;;  %v499_v11 = vld [vmem:[%s5498_s1 + $0x110] sm:$0xff] }
 0x6ff   :  { %v820_v19 = vpop.f32.mrb[19].mxu1  ;;  %v819_v21 = vadd.f32 %v818_v18, %v4836_v9  ;;  %v504_v17 = vld [vmem:[%s5498_s1 + $0x138] sm:$0xff]  ;;  %v506_v18 = vld [vmem:[%s5498_s1 + $0x148] sm:$0xff] }
 0x700   :  { %4242 = vtanh.f32 %v716_v16  ;;  %v3505_v24 = vmul.f32 -1.442695, %v716_v16  ;;  %v821_v27 = vadd.f32 %v820_v19, %v4845_v36  ;;  %v501_v16 = vld [vmem:[%s5498_s1 + $0x120] sm:$0xff] }
 0x701   :  { %4244 = vtanh.f32 %v819_v21  ;;  %v3507_v26 = vmul.f32 -1.442695, %v819_v21  ;;  %v4896_v21 = vpack.c.bf16 %v501_v16, %v499_v11 }
 0x702   :  { %4246 = vpow2.f32 %v3505_v24  ;;  %v505_v24 = vld [vmem:[%s5498_s1 + $0x140] sm:$0xff] }
 0x703   :  { %4248 = vpow2.f32 %v3507_v26 }
 0x70a   :  { %v4243_v22 = vpop.eup %4242 }
 0x70b   :  { %726 = vrot.lane.b32.xlu1 %v4243_v22, %s4430_s11  ;;  %v4245_v23 = vpop.eup %4244  ;;  %v4900_v22 = vpack.c.bf16 %v506_v18, %v504_v17  ;;  %v4970_v18 = vrot.slane %v3502_v61, %v4692_v34 }
 0x70c   :  { %v4247_v28 = vpop.eup %4246 }
 0x70d   :  { %v720_v29 = vadd.f32 1.0, %v4247_v28  ;;  %v4249_v42 = vpop.eup %4248 }
 0x70e   :  { %v826_v31 = vadd.f32 1.0, %v4249_v42  ;;  %v510_v42 = vld [vmem:[%s5498_s1 + $0x168] sm:$0xff] }
 0x70f   :  { %832 = vrot.lane.b32.xlu1 %v4245_v23, %s4430_s11  ;;  %4250 = vrcp.f32 %v720_v29  ;;  %v503_v23 = vld [vmem:[%s5498_s1 + $0x130] sm:$0xff]  ;;  %v508_v29 = vld [vmem:[%s5498_s1 + $0x158] sm:$0xff] }
 0x710   :  { %4252 = vrcp.f32 %v826_v31  ;;  %v4909_v28 = vpack.c.bf16 %v505_v24, %v503_v23  ;;  %v4920_v31 = vpack.c.bf16 %v510_v42, %v508_v29 }
 0x719   :  { %v4251_v0 = vpop.eup %4250 }
 0x71a   :  { %v4253_v32 = vpop.eup %4252  ;;  %v724_v39 = vmul.f32 %v4251_v0, %v4742_v25  ;;  %v495_v25 = vld [vmem:[%s5498_s1 + $0xf0] sm:$0xff] }
 0x71b   :  { %v830_v47 = vmul.f32 0.0, %v4253_v32  ;;  %v4878_v63 = vpack.c.bf16 %v497_v56, %v495_v25 }
 0x77d   :  { %v727_v1 = vpop.permute.xlu1 %726 }
 0x77e   :  { %v729_v8 = vmul.f32 %v4251_v0, %v727_v1  ;;  %v507_v1 = vld [vmem:[%s5498_s1 + $0x150] sm:$0xff] }
 0x780   :  { %731 = vrot.lane.b32.xlu1 %v729_v8, %s4431_s12  ;;  %v509_v8 = vld [vmem:[%s5498_s1 + $0x160] sm:$0xff] }
 0x781   :  { %v833_v33 = vpop.permute.xlu1 %832 }
 0x782   :  { %v835_v13 = vmul.f32 %v4253_v32, %v833_v33  ;;  %v4928_v33 = vpack.c.bf16 %v509_v8, %v507_v1 }
 0x784   :  { %837 = vrot.lane.b32.xlu0 %v835_v13, %s4431_s12 }
 0x788   :  { %742 = vrot.lane.b32.xlu0 %v4708_v44, %s4430_s11  ;;  %v496_v44 = vld [vmem:[%s5498_s1 + $0xf8] sm:$0xff] }
 0x789   :  { %v4867_v40 = vpack.c.bf16 %v498_v38, %v496_v44 }
 0x78b   :  { %3915 = vmatprep.subr.bf16.mxu1 %v4867_v40 }
 0x78c   :  { %848 = vrot.lane.b32.xlu0 %v821_v27, %s4430_s11  ;;  %3917 = vmatpush1.bf16.msra.mxu1 %v4878_v63 }
 0x78d   :  { %3919 = vmatprep.subr.bf16.mxu1 %v4880_v5 }
 0x790   :  { %3921 = vmatpush1.bf16.msra.mxu1 %v4896_v21 }
 0x791   :  { %3923 = vmatprep.subr.bf16.mxu1 %v4900_v22 }
 0x794   :  { %3925 = vmatpush1.bf16.msra.mxu1 %v4909_v28 }
 0x795   :  { %3927 = vmatprep.subr.bf16.mxu1 %v4920_v31 }
 0x798   :  { %3929 = vmatpush1.bf16.msra.mxu1 %v4928_v33 }
 0x799   :  { %3937 = vmatprep.subr.bf16.mxu1 %v4754_v30 }
 0x7f2   :  { %v732_v41 = vpop.permute.xlu1 %731 }
 0x7f3   :  { %v4852_v43 = vadd.f32 %v732_v41, %v724_v39 }
 0x7f5   :  { %4254 = vtanh.f32 %v4852_v43 }
 0x7f6   :  { %v838_v51 = vpop.permute.xlu0 %837 }
 0x7f7   :  { %v4855_v53 = vadd.f32 %v838_v51, %v830_v47 }
 0x7f9   :  { %4256 = vtanh.f32 %v4855_v53 }
 0x7fa   :  { %v743_v13 = vpop.permute.xlu0 %742 }
 0x7fe   :  { %v849_v44 = vpop.permute.xlu0 %848 }
 0x7ff   :  { %v4255_v19 = vpop.eup %4254 }
 0x800   :  { %737 = vrot.lane.b32.xlu1 %v4255_v19, %s4430_s11 }
 0x803   :  { %v4257_v26 = vpop.eup %4256 }
 0x804   :  { %843 = vrot.lane.b32.xlu1 %v4257_v26, %s4430_s11 }
 0x872   :  { %v738_v27 = vpop.permute.xlu1 %737 }
 0x873   :  { %v740_v39 = vmul.f32 %v4251_v0, %v738_v27 }
 0x875   :  { %v745_v41 = vadd.f32 %v743_v13, %v740_v39 }
 0x876   :  { %v844_v47 = vpop.permute.xlu1 %843 }
 0x877   :  { %v846_v51 = vmul.f32 %v4253_v32, %v844_v47  ;;  %853 = vrot.lane.b32.xlu1 %v745_v41, %s4430_s11 }
 0x879   :  { %v851_v38 = vadd.f32 %v849_v44, %v846_v51 }
 0x87b   :  { %1066 = vrot.lane.b32.xlu1 %v851_v38, %s4430_s11  ;;  %959 = vrot.lane.b32.xlu0 %v851_v38, %s4431_s12 }
 0x8e9   :  { %v854_v25 = vpop.permute.xlu1 %853 }
 0x8ea   :  { %3708 = vmatmul.mubr.msk.f32.vlgmr.msra.gmra.mrb[6].mxu0 %vm537_vm6, %v854_v25 }
 0x8eb   :  { %3901 = vmatpush1.bf16.msra.mxu0 %v4765_v2  ;;  %1030 = vmatprep.mubr.f32.mxu0 %v4427_v15 }
 0x8ec   :  { %3903 = vmatprep.subr.bf16.mxu0 %v4767_v3 }
 0x8ed   :  { %v1067_v0 = vpop.permute.xlu1 %1066  ;;  %v960_v56 = vpop.permute.xlu0 %959 }
 0x8ee   :  { %v1069_v32 = vsel %vm537_vm6, %v1067_v0, 0.0  ;;  %v962_v59 = vsel %vm537_vm6, %v854_v25, %v960_v56 }
 0x8ef   :  { %3905 = vmatpush1.bf16.msra.mxu0 %v4783_v20  ;;  %3512 = vmatmul.mubr.msk.f32.vlgmr.msra.gmra.mrb[20].mxu1 %vm748_vm7, %v1069_v32 }
 0x8f0   :  { %3907 = vmatprep.subr.bf16.mxu0 %v4786_v35  ;;  %3939 = vmatpush1.bf16.msra.mxu1 %v4765_v2 }
 0x8f1   :  { %3941 = vmatprep.subr.bf16.mxu1 %v4767_v3  ;;  %1351 = vmatprep.mubr.f32.mxu1 %v4427_v15 }
 0x8f3   :  { %3909 = vmatpush1.bf16.msra.mxu0 %v4802_v45 }
 0x8f4   :  { %3911 = vmatprep.subr.bf16.mxu0 %v4807_v49  ;;  %3943 = vmatpush1.bf16.msra.mxu1 %v4783_v20 }
 0x8f5   :  { %3945 = vmatprep.subr.bf16.mxu1 %v4786_v35 }
 0x8f7   :  { %3913 = vmatpush1.bf16.msra.mxu0 %v4817_v54 }
 0x8f8   :  { %3930 = vmatprep.subr.bf16.mxu0 %v4426_v58  ;;  %3947 = vmatpush1.bf16.msra.mxu1 %v4802_v45 }
 0x8f9   :  { %3949 = vmatprep.subr.bf16.mxu1 %v4807_v49 }
 0x8fa   :  { %3510 = vmatmul.mubr.msk.f32.vlgmr.msra.gmra.mrb[8].mxu0 %vm748_vm7, %v962_v59 }
 0x8fb   :  { %3932 = vmatpush3.bf16.msra.mxu0 %v4635_v7  ;;  %3718 = vmatprep.mubr.msk.f32.mxu0 %vm4428_vm2, %v4427_v15 }
 0x8fc   :  { %3933 = vmatprep.subr.bf16.mxu0 %v4426_v58  ;;  %3951 = vmatpush1.bf16.msra.mxu1 %v4817_v54 }
 0x8fd   :  { %3968 = vmatprep.subr.bf16.mxu1 %v4426_v58 }
 0x8ff   :  { %3935 = vmatpush3.bf16.msra.mxu0 %v4647_v14 }
 0x900   :  { %3953 = vmatprep.subr.bf16.mxu0 %v4867_v40 }
 0x9bd   :  { %v923_v11 = vpop.f32.mrb[6].mxu0 }
 0x9be   :  { %v927_v16 = vadd.f32 %v923_v11, %v4710_v46  ;;  %v3709_v17 = vpop.f32.mrb[7].mxu0 }
 0x9c0   :  { %4258 = vtanh.f32 %v927_v16  ;;  %v3509_v34 = vmul.f32 -1.442695, %v927_v16 }
 0x9c2   :  { %v1139_v19 = vpop.f32.mrb[20].mxu1 }
 0x9c3   :  { %v1140_v23 = vadd.f32 %v1139_v19, %v4970_v18  ;;  %v1141_v24 = vpop.f32.mrb[21].mxu1 }
 0x9c5   :  { %4260 = vtanh.f32 %v1140_v23  ;;  %v3513_v13 = vmul.f32 -1.442695, %v1140_v23 }
 0x9ca   :  { %v4259_v26 = vpop.eup %4258 }
 0x9cb   :  { %937 = vrot.lane.b32.xlu0 %v4259_v26, %s4430_s11 }
 0x9cd   :  { %v1032_v29 = vpop.f32.mrb[8].mxu0 }
 0x9ce   :  { %v1033_v42 = vadd.f32 %v1032_v29, %v4836_v9  ;;  %v1034_v1 = vpop.f32.mrb[9].mxu0 }
 0x9cf   :  { %v4261_v8 = vpop.eup %4260 }
 0x9d0   :  { %4262 = vtanh.f32 %v1033_v42  ;;  %1153 = vrot.lane.b32.xlu0 %v4261_v8, %s4430_s11  ;;  %v3511_v39 = vmul.f32 -1.442695, %v1033_v42 }
 0x9d1   :  { %4264 = vpow2.f32 %v3509_v34 }
 0x9d2   :  { %4266 = vpow2.f32 %v3513_v13 }
 0x9d3   :  { %4268 = vpow2.f32 %v3511_v39 }
 0x9da   :  { %v4263_v46 = vpop.eup %4262 }
 0x9db   :  { %1046 = vrot.lane.b32.xlu1 %v4263_v46, %s4430_s11  ;;  %v4265_v27 = vpop.eup %4264 }
 0x9dc   :  { %v931_v41 = vadd.f32 1.0, %v4265_v27  ;;  %v4267_v47 = vpop.eup %4266  ;;  %v4992_v27 = vrot.slane %v3502_v61, %v4698_v37 }
 0x9dd   :  { %v1147_v51 = vadd.f32 1.0, %v4267_v47  ;;  %v4269_v44 = vpop.eup %4268 }
 0x9de   :  { %4270 = vrcp.f32 %v931_v41  ;;  %v1040_v32 = vadd.f32 1.0, %v4269_v44  ;;  %v1142_v41 = vadd.f32 %v1141_v24, %v4992_v27 }
 0x9df   :  { %4272 = vrcp.f32 %v1147_v51 }
 0x9e0   :  { %4274 = vrcp.f32 %v1040_v32 }
 0x9e8   :  { %v4271_v38 = vpop.eup %4270 }
 0x9e9   :  { %v4273_v56 = vpop.eup %4272  ;;  %v935_v23 = vmul.f32 %v4271_v38, %v4852_v43 }
 0x9ea   :  { %v4275_v16 = vpop.eup %4274  ;;  %v1151_v42 = vmul.f32 0.0, %v4273_v56 }
 0xa3d   :  { %v938_v25 = vpop.permute.xlu0 %937 }
 0xa3e   :  { %v940_v0 = vmul.f32 %v4271_v38, %v938_v25 }
 0xa40   :  { %942 = vrot.lane.b32.xlu1 %v940_v0, %s4431_s12 }
 0xa42   :  { %v1154_v59 = vpop.permute.xlu0 %1153 }
 0xa43   :  { %v1156_v11 = vmul.f32 %v4273_v56, %v1154_v59 }
 0xa45   :  { %1158 = vrot.lane.b32.xlu1 %v1156_v11, %s4431_s12 }
 0xa49   :  { %953 = vrot.lane.b32.xlu1 %v4713_v48, %s4430_s11  ;;  %v1044_v48 = vmul.f32 %v4275_v16, %v4855_v53  ;;  %v1035_v53 = vadd.f32 %v1034_v1, %v4845_v36 }
 0xa4d   :  { %v1047_v17 = vpop.permute.xlu1 %1046 }
 0xa4e   :  { %v1049_v19 = vmul.f32 %v4275_v16, %v1047_v17 }
 0xa50   :  { %1051 = vrot.lane.b32.xlu0 %v1049_v19, %s4431_s12 }
 0xab2   :  { %v943_v26 = vpop.permute.xlu1 %942 }
 0xab3   :  { %v4983_v29 = vadd.f32 %v943_v26, %v935_v23 }
 0xab5   :  { %4276 = vtanh.f32 %v4983_v29 }
 0xab7   :  { %v1159_v8 = vpop.permute.xlu1 %1158 }
 0xab8   :  { %v4986_v46 = vadd.f32 %v1159_v8, %v1151_v42 }
 0xaba   :  { %4278 = vtanh.f32 %v4986_v46 }
 0xabb   :  { %v954_v51 = vpop.permute.xlu1 %953 }
 0xabf   :  { %v4277_v34 = vpop.eup %4276 }
 0xac0   :  { %948 = vrot.lane.b32.xlu0 %v4277_v34, %s4430_s11 }
 0xac2   :  { %v1052_v13 = vpop.permute.xlu0 %1051 }
 0xac3   :  { %v4994_v43 = vadd.f32 %v1052_v13, %v1044_v48 }
 0xac4   :  { %v4279_v39 = vpop.eup %4278 }
 0xac5   :  { %4280 = vtanh.f32 %v4994_v43  ;;  %1164 = vrot.lane.b32.xlu1 %v4279_v39, %s4430_s11 }
 0xac9   :  { %1169 = vrot.lane.b32.xlu1 %v1142_v41, %s4430_s11 }
 0xacf   :  { %v4281_v47 = vpop.eup %4280 }
 0xad0   :  { %1057 = vrot.lane.b32.xlu0 %v4281_v47, %s4430_s11 }
 0xad4   :  { %1062 = vrot.lane.b32.xlu0 %v1035_v53, %s4430_s11 }
 0xb32   :  { %v949_v37 = vpop.permute.xlu0 %948 }
 0xb33   :  { %v951_v61 = vmul.f32 %v4271_v38, %v949_v37 }
 0xb35   :  { %v956_v44 = vadd.f32 %v954_v51, %v951_v61 }
 0xb37   :  { %1174 = vrot.lane.b32.xlu0 %v956_v44, %s4430_s11  ;;  %v1165_v25 = vpop.permute.xlu1 %1164 }
 0xb38   :  { %v1167_v17 = vmul.f32 %v4273_v56, %v1165_v25 }
 0xb3b   :  { %v1170_v11 = vpop.permute.xlu1 %1169 }
 0xb3c   :  { %v1172_v1 = vadd.f32 %v1170_v11, %v1167_v17 }
 0xb42   :  { %v1058_v0 = vpop.permute.xlu0 %1057 }
 0xb43   :  { %v1060_v32 = vmul.f32 %v4275_v16, %v1058_v0 }
 0xb46   :  { %v1063_v59 = vpop.permute.xlu0 %1062 }
 0xb47   :  { %v1065_v24 = vadd.f32 %v1063_v59, %v1060_v32 }
 0xb49   :  { %1387 = vrot.lane.b32.xlu0 %v1065_v24, %s4430_s11  ;;  %1280 = vrot.lane.b32.xlu1 %v1065_v24, %s4431_s12 }
 0xb4d   :  { %1391 = vrot.lane.b32.xlu1 %v1172_v1, %s4431_s12 }
 0xba9   :  { %v1175_v19 = vpop.permute.xlu0 %1174 }
 0xbaa   :  { %3719 = vmatmul.mubr.msk.f32.vlgmr.msra.gmra.mrb[10].mxu0 %vm537_vm6, %v1175_v19 }
 0xbab   :  { %3955 = vmatpush1.bf16.msra.mxu0 %v4878_v63  ;;  %1462 = vmatprep.mubr.f32.mxu0 %v4427_v15 }
 0xbac   :  { %3957 = vmatprep.subr.bf16.mxu0 %v4880_v5 }
 0xbaf   :  { %3959 = vmatpush1.bf16.msra.mxu0 %v4896_v21 }
 0xbb0   :  { %3961 = vmatprep.subr.bf16.mxu0 %v4900_v22 }
 0xbb3   :  { %3963 = vmatpush1.bf16.msra.mxu0 %v4909_v28 }
 0xbb4   :  { %3965 = vmatprep.subr.bf16.mxu0 %v4920_v31 }
 0xbb7   :  { %3967 = vmatpush1.bf16.msra.mxu0 %v4928_v33 }
 0xbb8   :  { %3975 = vmatprep.subr.bf16.mxu0 %v4754_v30 }
 0xbbb   :  { %v1281_v38 = vpop.permute.xlu1 %1280  ;;  %v1388_v16 = vpop.permute.xlu0 %1387 }
 0xbbc   :  { %v1283_v56 = vsel %vm537_vm6, %v1175_v19, %v1281_v38 }
 0xbbd   :  { %3516 = vmatmul.mubr.msk.f32.vlgmr.msra.gmra.mrb[22].mxu1 %vm748_vm7, %v1283_v56 }
 0xbbe   :  { %3970 = vmatpush3.bf16.msra.mxu1 %v4635_v7  ;;  %3729 = vmatprep.mubr.msk.f32.mxu1 %vm4428_vm2, %v4427_v15 }
 0xbbf   :  { %v1392_v23 = vpop.permute.xlu1 %1391  ;;  %3971 = vmatprep.subr.bf16.mxu1 %v4426_v58 }
 0xbc0   :  { %v1394_v26 = vsel %vm537_vm6, %v1388_v16, %v1392_v23 }
 0xbc1   :  { %3518 = vmatmul.mubr.msk.f32.vlgmr.msra.gmra.mrb[12].mxu0 %vm748_vm7, %v1394_v26 }
 0xbc2   :  { %3973 = vmatpush3.bf16.msra.mxu1 %v4647_v14  ;;  %3977 = vmatpush1.bf16.msra.mxu0 %v4765_v2 }
 0xbc3   :  { %3979 = vmatprep.subr.bf16.mxu0 %v4767_v3  ;;  %3991 = vmatprep.subr.bf16.mxu1 %v4867_v40 }
 0xbc4   :  { %1676 = vmatprep.mubr.f32.mxu0 %v4427_v15 }
 0xbc6   :  { %3981 = vmatpush1.bf16.msra.mxu0 %v4783_v20 }
 0xbc7   :  { %3983 = vmatprep.subr.bf16.mxu0 %v4786_v35 }
 0xbca   :  { %3985 = vmatpush1.bf16.msra.mxu0 %v4802_v45 }
 0xbcb   :  { %3987 = vmatprep.subr.bf16.mxu0 %v4807_v49 }
 0xbce   :  { %3989 = vmatpush1.bf16.msra.mxu0 %v4817_v54 }
 0xbcf   :  { %4006 = vmatprep.subr.bf16.mxu0 %v4426_v58 }
 0xc7d   :  { %v1244_v42 = vpop.f32.mrb[10].mxu0 }
 0xc7e   :  { %v1248_v8 = vadd.f32 %v1244_v42, %v4715_v50  ;;  %v3720_v34 = vpop.f32.mrb[11].mxu0 }
 0xc80   :  { %4282 = vtanh.f32 %v1248_v8  ;;  %v3515_v50 = vmul.f32 -1.442695, %v1248_v8 }
 0xc8a   :  { %v4283_v48 = vpop.eup %4282 }
 0xc8b   :  { %1258 = vrot.lane.b32.xlu0 %v4283_v48, %s4430_s11 }
 0xc90   :  { %v1353_v13 = vpop.f32.mrb[22].mxu1 }
 0xc91   :  { %v1354_v39 = vadd.f32 %v1353_v13, %v4836_v9  ;;  %v1355_v41 = vpop.f32.mrb[23].mxu1 }
 0xc93   :  { %4284 = vtanh.f32 %v1354_v39  ;;  %v3517_v0 = vmul.f32 -1.442695, %v1354_v39 }
 0xc94   :  { %v1464_v47 = vpop.f32.mrb[12].mxu0 }
 0xc95   :  { %v1465_v53 = vadd.f32 %v1464_v47, %v4970_v18  ;;  %v1466_v37 = vpop.f32.mrb[13].mxu0 }
 0xc97   :  { %4286 = vtanh.f32 %v1465_v53  ;;  %v3519_v32 = vmul.f32 -1.442695, %v1465_v53 }
 0xc98   :  { %4288 = vpow2.f32 %v3515_v50 }
 0xc9d   :  { %v4285_v61 = vpop.eup %4284 }
 0xc9e   :  { %1367 = vrot.lane.b32.xlu1 %v4285_v61, %s4430_s11 }
 0xca1   :  { %v4287_v51 = vpop.eup %4286 }
 0xca2   :  { %1478 = vrot.lane.b32.xlu0 %v4287_v51, %s4430_s11  ;;  %v4289_v44 = vpop.eup %4288 }
 0xca3   :  { %v1252_v25 = vadd.f32 1.0, %v4289_v44  ;;  %v1356_v44 = vadd.f32 %v1355_v41, %v4845_v36 }
 0xca5   :  { %4290 = vrcp.f32 %v1252_v25 }
 0xca6   :  { %4292 = vpow2.f32 %v3517_v0 }
 0xca7   :  { %4294 = vpow2.f32 %v3519_v32 }
 0xcaf   :  { %v4291_v59 = vpop.eup %4290 }
 0xcb0   :  { %v4293_v17 = vpop.eup %4292  ;;  %v1256_v34 = vmul.f32 %v4291_v59, %v4983_v29 }
 0xcb1   :  { %v1361_v1 = vadd.f32 1.0, %v4293_v17  ;;  %v4295_v19 = vpop.eup %4294 }
 0xcb2   :  { %v1472_v38 = vadd.f32 1.0, %v4295_v19 }
 0xcb3   :  { %4296 = vrcp.f32 %v1361_v1 }
 0xcb4   :  { %4298 = vrcp.f32 %v1472_v38 }
 0xcbd   :  { %v4297_v56 = vpop.eup %4296 }
 0xcbe   :  { %v4299_v26 = vpop.eup %4298  ;;  %v1365_v47 = vmul.f32 %v4297_v56, %v4994_v43  ;;  %v1467_v43 = vadd.f32 %v1466_v37, %v4992_v27 }
 0xcbf   :  { %v1476_v51 = vmul.f32 %v4299_v26, %v4986_v46 }
 0xcfd   :  { %v1259_v24 = vpop.permute.xlu0 %1258 }
 0xcfe   :  { %v1261_v11 = vmul.f32 %v4291_v59, %v1259_v24 }
 0xd00   :  { %1263 = vrot.lane.b32.xlu1 %v1261_v11, %s4431_s12 }
 0xd10   :  { %v1368_v16 = vpop.permute.xlu1 %1367 }
 0xd11   :  { %v1370_v23 = vmul.f32 %v4297_v56, %v1368_v16 }
 0xd13   :  { %1372 = vrot.lane.b32.xlu0 %v1370_v23, %s4431_s12 }
 0xd14   :  { %v1479_v42 = vpop.permute.xlu0 %1478 }
 0xd15   :  { %v1481_v8 = vmul.f32 %v4299_v26, %v1479_v42 }
 0xd17   :  { %1483 = vrot.lane.b32.xlu1 %v1481_v8, %s4431_s12 }
 0xd1b   :  { %1274 = vrot.lane.b32.xlu1 %v4718_v52, %s4430_s11 }
 0xd72   :  { %v1264_v48 = vpop.permute.xlu1 %1263 }
 0xd73   :  { %v5048_v13 = vadd.f32 %v1264_v48, %v1256_v34 }
 0xd75   :  { %4300 = vtanh.f32 %v5048_v13 }
 0xd7f   :  { %v4301_v39 = vpop.eup %4300 }
 0xd80   :  { %1269 = vrot.lane.b32.xlu0 %v4301_v39, %s4430_s11 }
 0xd85   :  { %v1373_v53 = vpop.permute.xlu0 %1372 }
 0xd86   :  { %v5053_v61 = vadd.f32 %v1373_v53, %v1365_v47 }
 0xd88   :  { %4302 = vtanh.f32 %v5053_v61 }
 0xd89   :  { %v1484_v52 = vpop.permute.xlu1 %1483 }
 0xd8a   :  { %v5057_v50 = vadd.f32 %v1484_v52, %v1476_v51 }
 0xd8c   :  { %4304 = vtanh.f32 %v5057_v50 }
 0xd8d   :  { %v1275_v32 = vpop.permute.xlu1 %1274 }
 0xd92   :  { %v4303_v29 = vpop.eup %4302 }
 0xd93   :  { %1378 = vrot.lane.b32.xlu0 %v4303_v29, %s4430_s11 }
 0xd96   :  { %v4305_v25 = vpop.eup %4304 }
 0xd97   :  { %1489 = vrot.lane.b32.xlu1 %v4305_v25, %s4430_s11  ;;  %1383 = vrot.lane.b32.xlu0 %v1356_v44, %s4430_s11 }
 0xd9b   :  { %1494 = vrot.lane.b32.xlu1 %v1467_v43, %s4430_s11 }
 0xdf2   :  { %v1270_v46 = vpop.permute.xlu0 %1269 }
 0xdf3   :  { %v1272_v0 = vmul.f32 %v4291_v59, %v1270_v46 }
 0xdf5   :  { %v1277_v24 = vadd.f32 %v1275_v32, %v1272_v0 }
 0xdf7   :  { %1499 = vrot.lane.b32.xlu0 %v1277_v24, %s4430_s11 }
 0xe05   :  { %v1379_v11 = vpop.permute.xlu0 %1378 }
 0xe06   :  { %v1381_v17 = vmul.f32 %v4297_v56, %v1379_v11 }
 0xe09   :  { %v1490_v1 = vpop.permute.xlu1 %1489  ;;  %v1384_v19 = vpop.permute.xlu0 %1383 }
 0xe0a   :  { %v1386_v41 = vadd.f32 %v1384_v19, %v1381_v17  ;;  %v1492_v38 = vmul.f32 %v4299_v26, %v1490_v1 }
 0xe0c   :  { %1712 = vrot.lane.b32.xlu0 %v1386_v41, %s4430_s11  ;;  %1605 = vrot.lane.b32.xlu1 %v1386_v41, %s4431_s12 }
 0xe0d   :  { %v1495_v16 = vpop.permute.xlu1 %1494 }
 0xe0e   :  { %v1497_v37 = vadd.f32 %v1495_v16, %v1492_v38 }
 0xe10   :  { %1716 = vrot.lane.b32.xlu1 %v1497_v37, %s4431_s12 }
 0xe69   :  { %v1500_v23 = vpop.permute.xlu0 %1499 }
 0xe6a   :  { %3730 = vmatmul.mubr.msk.f32.vlgmr.msra.gmra.mrb[24].mxu1 %vm537_vm6, %v1500_v23 }
 0xe6b   :  { %3993 = vmatpush1.bf16.msra.mxu1 %v4878_v63  ;;  %1787 = vmatprep.mubr.f32.mxu1 %v4427_v15 }
 0xe6c   :  { %3995 = vmatprep.subr.bf16.mxu1 %v4880_v5 }
 0xe6f   :  { %3997 = vmatpush1.bf16.msra.mxu1 %v4896_v21 }
 0xe70   :  { %3999 = vmatprep.subr.bf16.mxu1 %v4900_v22 }
 0xe73   :  { %4001 = vmatpush1.bf16.msra.mxu1 %v4909_v28 }
 0xe74   :  { %4003 = vmatprep.subr.bf16.mxu1 %v4920_v31 }
 0xe77   :  { %4005 = vmatpush1.bf16.msra.mxu1 %v4928_v33 }
 0xe78   :  { %4013 = vmatprep.subr.bf16.mxu1 %v4754_v30 }
 0xe7e   :  { %v1606_v59 = vpop.permute.xlu1 %1605  ;;  %v1713_v26 = vpop.permute.xlu0 %1712 }
 0xe7f   :  { %v1608_v56 = vsel %vm537_vm6, %v1500_v23, %v1606_v59 }
 0xe80   :  { %3522 = vmatmul.mubr.msk.f32.vlgmr.msra.gmra.mrb[14].mxu0 %vm748_vm7, %v1608_v56 }
 0xe81   :  { %4008 = vmatpush3.bf16.msra.mxu0 %v4635_v7  ;;  %3740 = vmatprep.mubr.msk.f32.mxu0 %vm4428_vm2, %v4427_v15 }
 0xe82   :  { %v1717_v42 = vpop.permute.xlu1 %1716  ;;  %4009 = vmatprep.subr.bf16.mxu0 %v4426_v58 }
 0xe83   :  { %v1719_v8 = vsel %vm537_vm6, %v1713_v26, %v1717_v42 }
 0xe84   :  { %3524 = vmatmul.mubr.msk.f32.vlgmr.msra.gmra.mrb[26].mxu1 %vm748_vm7, %v1719_v8 }
 0xe85   :  { %4011 = vmatpush3.bf16.msra.mxu0 %v4647_v14  ;;  %4015 = vmatpush1.bf16.msra.mxu1 %v4765_v2 }
 0xe86   :  { %4017 = vmatprep.subr.bf16.mxu1 %v4767_v3  ;;  %4029 = vmatprep.subr.bf16.mxu0 %v4867_v40 }
 0xe87   :  { %2001 = vmatprep.mubr.f32.mxu1 %v4427_v15 }
 0xe89   :  { %4019 = vmatpush1.bf16.msra.mxu1 %v4783_v20 }
 0xe8a   :  { %4021 = vmatprep.subr.bf16.mxu1 %v4786_v35 }
 0xe8d   :  { %4023 = vmatpush1.bf16.msra.mxu1 %v4802_v45 }
 0xe8e   :  { %4025 = vmatprep.subr.bf16.mxu1 %v4807_v49 }
 0xe91   :  { %4027 = vmatpush1.bf16.msra.mxu1 %v4817_v54 }
 0xe92   :  { %4044 = vmatprep.subr.bf16.mxu1 %v4426_v58 }
 0xf3d   :  { %v1569_v34 = vpop.f32.mrb[24].mxu1 }
 0xf3e   :  { %v1573_v48 = vadd.f32 %v1569_v34, %v4721_v55  ;;  %v3731_v39 = vpop.f32.mrb[25].mxu1 }
 0xf40   :  { %4306 = vtanh.f32 %v1573_v48  ;;  %v3521_v55 = vmul.f32 -1.442695, %v1573_v48 }
 0xf4a   :  { %v4307_v47 = vpop.eup %4306 }
 0xf4b   :  { %1583 = vrot.lane.b32.xlu0 %v4307_v47, %s4430_s11 }
 0xf53   :  { %v1678_v53 = vpop.f32.mrb[14].mxu0 }
 0xf54   :  { %v1679_v51 = vadd.f32 %v1678_v53, %v4836_v9  ;;  %v1680_v52 = vpop.f32.mrb[15].mxu0 }
 0xf56   :  { %4308 = vtanh.f32 %v1679_v51  ;;  %v3523_v24 = vmul.f32 -1.442695, %v1679_v51 }
 0xf57   :  { %v1789_v29 = vpop.f32.mrb[26].mxu1 }
 0xf58   :  { %v1790_v44 = vadd.f32 %v1789_v29, %v4970_v18  ;;  %v1791_v25 = vpop.f32.mrb[27].mxu1 }
 0xf5a   :  { %4310 = vtanh.f32 %v1790_v44  ;;  %v3525_v11 = vmul.f32 -1.442695, %v1790_v44 }
 0xf5b   :  { %4312 = vpow2.f32 %v3521_v55 }
 0xf60   :  { %v4309_v43 = vpop.eup %4308 }
 0xf61   :  { %1692 = vrot.lane.b32.xlu1 %v4309_v43, %s4430_s11 }
 0xf64   :  { %v4311_v46 = vpop.eup %4310 }
 0xf65   :  { %1803 = vrot.lane.b32.xlu0 %v4311_v46, %s4430_s11  ;;  %v4313_v0 = vpop.eup %4312  ;;  %v1681_v46 = vadd.f32 %v1680_v52, %v4845_v36 }
 0xf66   :  { %v1577_v32 = vadd.f32 1.0, %v4313_v0 }
 0xf68   :  { %4314 = vrcp.f32 %v1577_v32 }
 0xf69   :  { %4316 = vpow2.f32 %v3523_v24 }
 0xf6a   :  { %4318 = vpow2.f32 %v3525_v11 }
 0xf72   :  { %v4315_v17 = vpop.eup %4314 }
 0xf73   :  { %v4317_v41 = vpop.eup %4316  ;;  %v1581_v34 = vmul.f32 %v4315_v17, %v5048_v13 }
 0xf74   :  { %v1686_v38 = vadd.f32 1.0, %v4317_v41  ;;  %v4319_v16 = vpop.eup %4318 }
 0xf75   :  { %v1797_v37 = vadd.f32 1.0, %v4319_v16 }
 0xf76   :  { %4320 = vrcp.f32 %v1686_v38 }
 0xf77   :  { %4322 = vrcp.f32 %v1797_v37 }
 0xf80   :  { %v4321_v23 = vpop.eup %4320 }
 0xf81   :  { %v4323_v26 = vpop.eup %4322  ;;  %v1690_v53 = vmul.f32 %v4321_v23, %v5053_v61  ;;  %v1792_v61 = vadd.f32 %v1791_v25, %v4992_v27 }
 0xf82   :  { %v1801_v44 = vmul.f32 %v4323_v26, %v5057_v50 }
 0xfbd   :  { %v1584_v1 = vpop.permute.xlu0 %1583 }
 0xfbe   :  { %v1586_v19 = vmul.f32 %v4315_v17, %v1584_v1 }
 0xfc0   :  { %1588 = vrot.lane.b32.xlu1 %v1586_v19, %s4431_s12 }
 0xfd3   :  { %v1693_v59 = vpop.permute.xlu1 %1692 }
 0xfd4   :  { %v1695_v56 = vmul.f32 %v4321_v23, %v1693_v59 }
 0xfd6   :  { %1697 = vrot.lane.b32.xlu0 %v1695_v56, %s4431_s12 }
 0xfd7   :  { %v1804_v42 = vpop.permute.xlu0 %1803 }
 0xfd8   :  { %v1806_v8 = vmul.f32 %v4323_v26, %v1804_v42 }
 0xfda   :  { %1808 = vrot.lane.b32.xlu1 %v1806_v8, %s4431_s12 }
 0xfde   :  { %1599 = vrot.lane.b32.xlu1 %v4724_v57, %s4430_s11 }
0x1032   :  { %v1589_v48 = vpop.permute.xlu1 %1588 }
0x1033   :  { %v5111_v39 = vadd.f32 %v1589_v48, %v1581_v34 }
0x1035   :  { %4324 = vtanh.f32 %v5111_v39 }
0x103f   :  { %v4325_v47 = vpop.eup %4324 }
0x1040   :  { %1594 = vrot.lane.b32.xlu0 %v4325_v47, %s4430_s11 }
0x1048   :  { %v1698_v51 = vpop.permute.xlu0 %1697 }
0x1049   :  { %v5116_v29 = vadd.f32 %v1698_v51, %v1690_v53 }
0x104b   :  { %4326 = vtanh.f32 %v5116_v29 }
0x104c   :  { %v1809_v57 = vpop.permute.xlu1 %1808 }
0x104d   :  { %v5120_v43 = vadd.f32 %v1809_v57, %v1801_v44 }
0x104f   :  { %4328 = vtanh.f32 %v5120_v43 }
0x1050   :  { %v1600_v32 = vpop.permute.xlu1 %1599 }
0x1055   :  { %v4327_v13 = vpop.eup %4326 }
0x1056   :  { %1703 = vrot.lane.b32.xlu0 %v4327_v13, %s4430_s11 }
0x1059   :  { %v4329_v55 = vpop.eup %4328 }
0x105a   :  { %1814 = vrot.lane.b32.xlu1 %v4329_v55, %s4430_s11  ;;  %1708 = vrot.lane.b32.xlu0 %v1681_v46, %s4430_s11 }
0x105e   :  { %1819 = vrot.lane.b32.xlu1 %v1792_v61, %s4430_s11 }
0x10b2   :  { %v1595_v50 = vpop.permute.xlu0 %1594 }
0x10b3   :  { %v1597_v0 = vmul.f32 %v4315_v17, %v1595_v50 }
0x10b5   :  { %v1602_v24 = vadd.f32 %v1600_v32, %v1597_v0 }
0x10b7   :  { %1824 = vrot.lane.b32.xlu0 %v1602_v24, %s4430_s11 }
0x10c8   :  { %v1704_v11 = vpop.permute.xlu0 %1703 }
0x10c9   :  { %v1706_v1 = vmul.f32 %v4321_v23, %v1704_v11 }
0x10cc   :  { %v1815_v19 = vpop.permute.xlu1 %1814  ;;  %v1709_v41 = vpop.permute.xlu0 %1708 }
0x10cd   :  { %v1711_v52 = vadd.f32 %v1709_v41, %v1706_v1  ;;  %v1817_v38 = vmul.f32 %v4323_v26, %v1815_v19 }
0x10cf   :  { %2037 = vrot.lane.b32.xlu0 %v1711_v52, %s4430_s11  ;;  %1930 = vrot.lane.b32.xlu1 %v1711_v52, %s4431_s12 }
0x10d0   :  { %v1820_v16 = vpop.permute.xlu1 %1819 }
0x10d1   :  { %v1822_v25 = vadd.f32 %v1820_v16, %v1817_v38 }
0x10d3   :  { %2041 = vrot.lane.b32.xlu1 %v1822_v25, %s4431_s12 }
0x1129   :  { %v1825_v37 = vpop.permute.xlu0 %1824 }
0x112a   :  { %3741 = vmatmul.mubr.msk.f32.vlgmr.msra.gmra.mrb[16].mxu0 %vm537_vm6, %v1825_v37 }
0x112b   :  { %4031 = vmatpush1.bf16.msra.mxu0 %v4878_v63  ;;  %2112 = vmatprep.mubr.f32.mxu0 %v4427_v15 }
0x112c   :  { %4033 = vmatprep.subr.bf16.mxu0 %v4880_v5 }
0x112f   :  { %4035 = vmatpush1.bf16.msra.mxu0 %v4896_v21 }
0x1130   :  { %4037 = vmatprep.subr.bf16.mxu0 %v4900_v22 }
0x1133   :  { %4039 = vmatpush1.bf16.msra.mxu0 %v4909_v28 }
0x1134   :  { %4041 = vmatprep.subr.bf16.mxu0 %v4920_v31 }
0x1137   :  { %4043 = vmatpush1.bf16.msra.mxu0 %v4928_v33 }
0x1138   :  { %4051 = vmatprep.subr.bf16.mxu0 %v4754_v30 }
0x1141   :  { %v1931_v17 = vpop.permute.xlu1 %1930  ;;  %v2038_v59 = vpop.permute.xlu0 %2037 }
0x1142   :  { %v1933_v23 = vsel %vm537_vm6, %v1825_v37, %v1931_v17 }
0x1143   :  { %3528 = vmatmul.mubr.msk.f32.vlgmr.msra.gmra.mrb[28].mxu1 %vm748_vm7, %v1933_v23 }
0x1144   :  { %4046 = vmatpush3.bf16.msra.mxu1 %v4635_v7  ;;  %3751 = vmatprep.mubr.msk.f32.mxu1 %vm4428_vm2, %v4427_v15 }
0x1145   :  { %v2042_v56 = vpop.permute.xlu1 %2041  ;;  %4047 = vmatprep.subr.bf16.mxu1 %v4426_v58 }
0x1146   :  { %v2044_v26 = vsel %vm537_vm6, %v2038_v59, %v2042_v56 }
0x1147   :  { %3530 = vmatmul.mubr.msk.f32.vlgmr.msra.gmra.mrb[18].mxu0 %vm748_vm7, %v2044_v26 }
0x1148   :  { %4049 = vmatpush3.bf16.msra.mxu1 %v4647_v14  ;;  %4053 = vmatpush1.bf16.msra.mxu0 %v4765_v2 }
0x1149   :  { %4055 = vmatprep.subr.bf16.mxu0 %v4767_v3  ;;  %4067 = vmatprep.subr.bf16.mxu1 %v4867_v40 }
0x114a   :  { %2326 = vmatprep.mubr.f32.mxu0 %v4427_v15 }
0x114c   :  { %4057 = vmatpush1.bf16.msra.mxu0 %v4783_v20 }
0x114d   :  { %4059 = vmatprep.subr.bf16.mxu0 %v4786_v35 }
0x1150   :  { %4061 = vmatpush1.bf16.msra.mxu0 %v4802_v45 }
0x1151   :  { %4063 = vmatprep.subr.bf16.mxu0 %v4807_v49 }
0x1154   :  { %4065 = vmatpush1.bf16.msra.mxu0 %v4817_v54 }
0x1155   :  { %4082 = vmatprep.subr.bf16.mxu0 %v4426_v58 }
0x11fd   :  { %v1894_v42 = vpop.f32.mrb[16].mxu0 }
0x11fe   :  { %v1898_v8 = vadd.f32 %v1894_v42, %v4726_v60  ;;  %v3742_v34 = vpop.f32.mrb[17].mxu0 }
0x1200   :  { %4330 = vtanh.f32 %v1898_v8  ;;  %v3527_v60 = vmul.f32 -1.442695, %v1898_v8 }
0x120a   :  { %v4331_v48 = vpop.eup %4330 }
0x120b   :  { %1908 = vrot.lane.b32.xlu0 %v4331_v48, %s4430_s11 }
0x1216   :  { %v2003_v47 = vpop.f32.mrb[28].mxu1 }
0x1217   :  { %v2004_v53 = vadd.f32 %v2003_v47, %v4836_v9  ;;  %v2005_v51 = vpop.f32.mrb[29].mxu1 }
0x1219   :  { %4332 = vtanh.f32 %v2004_v53  ;;  %v3529_v0 = vmul.f32 -1.442695, %v2004_v53 }
0x121a   :  { %v2114_v44 = vpop.f32.mrb[18].mxu0 }
0x121b   :  { %v2115_v57 = vadd.f32 %v2114_v44, %v4970_v18  ;;  %v2116_v13 = vpop.f32.mrb[19].mxu0 }
0x121d   :  { %4334 = vtanh.f32 %v2115_v57  ;;  %v3531_v32 = vmul.f32 -1.442695, %v2115_v57  ;;  %v2006_v57 = vadd.f32 %v2005_v51, %v4845_v36 }
0x121e   :  { %4336 = vpow2.f32 %v3527_v60 }
0x1223   :  { %v4333_v46 = vpop.eup %4332 }
0x1224   :  { %2017 = vrot.lane.b32.xlu1 %v4333_v46, %s4430_s11 }
0x1227   :  { %v4335_v55 = vpop.eup %4334 }
0x1228   :  { %2128 = vrot.lane.b32.xlu0 %v4335_v55, %s4430_s11  ;;  %v4337_v61 = vpop.eup %4336 }
0x1229   :  { %v1902_v50 = vadd.f32 1.0, %v4337_v61 }
0x122b   :  { %4338 = vrcp.f32 %v1902_v50 }
0x122c   :  { %4340 = vpow2.f32 %v3529_v0 }
0x122d   :  { %4342 = vpow2.f32 %v3531_v32 }
0x1235   :  { %v4339_v24 = vpop.eup %4338 }
0x1236   :  { %v4341_v19 = vpop.eup %4340  ;;  %v1906_v56 = vmul.f32 %v4339_v24, %v5111_v39 }
0x1237   :  { %v2011_v41 = vadd.f32 1.0, %v4341_v19  ;;  %v4343_v52 = vpop.eup %4342 }
0x1238   :  { %v2122_v38 = vadd.f32 1.0, %v4343_v52 }
0x1239   :  { %4344 = vrcp.f32 %v2011_v41 }
0x123a   :  { %4346 = vrcp.f32 %v2122_v38 }
0x1243   :  { %v4345_v16 = vpop.eup %4344 }
0x1244   :  { %v4347_v17 = vpop.eup %4346  ;;  %v2015_v34 = vmul.f32 %v4345_v16, %v5116_v29  ;;  %v2117_v29 = vadd.f32 %v2116_v13, %v4992_v27 }
0x1245   :  { %v2126_v53 = vmul.f32 %v4347_v17, %v5120_v43 }
0x127d   :  { %v1909_v11 = vpop.permute.xlu0 %1908 }
0x127e   :  { %v1911_v1 = vmul.f32 %v4339_v24, %v1909_v11 }
0x1280   :  { %1913 = vrot.lane.b32.xlu1 %v1911_v1, %s4431_s12 }
0x1296   :  { %v2018_v25 = vpop.permute.xlu1 %2017 }
0x1297   :  { %v2020_v37 = vmul.f32 %v4345_v16, %v2018_v25 }
0x1299   :  { %2022 = vrot.lane.b32.xlu0 %v2020_v37, %s4431_s12 }
0x129a   :  { %v2129_v23 = vpop.permute.xlu0 %2128 }
0x129b   :  { %v2131_v59 = vmul.f32 %v4347_v17, %v2129_v23 }
0x129d   :  { %2133 = vrot.lane.b32.xlu1 %v2131_v59, %s4431_s12 }
0x12a1   :  { %1924 = vrot.lane.b32.xlu1 %v4729_v62, %s4430_s11 }
0x12f2   :  { %v1914_v26 = vpop.permute.xlu1 %1913 }
0x12f3   :  { %v5174_v42 = vadd.f32 %v1914_v26, %v1906_v56 }
0x12f5   :  { %4348 = vtanh.f32 %v5174_v42 }
0x12ff   :  { %v4349_v8 = vpop.eup %4348 }
0x1300   :  { %1919 = vrot.lane.b32.xlu0 %v4349_v8, %s4430_s11 }
0x130b   :  { %v2023_v48 = vpop.permute.xlu0 %2022 }
0x130c   :  { %v5179_v47 = vadd.f32 %v2023_v48, %v2015_v34 }
0x130e   :  { %4350 = vtanh.f32 %v5179_v47 }
0x130f   :  { %v2134_v62 = vpop.permute.xlu1 %2133 }
0x1310   :  { %v5183_v44 = vadd.f32 %v2134_v62, %v2126_v53 }
0x1312   :  { %4352 = vtanh.f32 %v5183_v44 }
0x1313   :  { %v1925_v60 = vpop.permute.xlu1 %1924 }
0x1318   :  { %v4351_v39 = vpop.eup %4350 }
0x1319   :  { %2028 = vrot.lane.b32.xlu0 %v4351_v39, %s4430_s11 }
0x131c   :  { %v4353_v46 = vpop.eup %4352 }
0x131d   :  { %2139 = vrot.lane.b32.xlu1 %v4353_v46, %s4430_s11  ;;  %2033 = vrot.lane.b32.xlu0 %v2006_v57, %s4430_s11 }
0x1321   :  { %2144 = vrot.lane.b32.xlu1 %v2117_v29, %s4430_s11 }
0x1372   :  { %v1920_v43 = vpop.permute.xlu0 %1919 }
0x1373   :  { %v1922_v55 = vmul.f32 %v4339_v24, %v1920_v43 }
0x1375   :  { %v1927_v61 = vadd.f32 %v1925_v60, %v1922_v55 }
0x1377   :  { %2149 = vrot.lane.b32.xlu0 %v1927_v61, %s4430_s11 }
0x138b   :  { %v2029_v50 = vpop.permute.xlu0 %2028 }
0x138c   :  { %v2031_v0 = vmul.f32 %v4345_v16, %v2029_v50 }
0x138f   :  { %v2140_v32 = vpop.permute.xlu1 %2139  ;;  %v2034_v11 = vpop.permute.xlu0 %2033 }
0x1390   :  { %v2036_v51 = vadd.f32 %v2034_v11, %v2031_v0  ;;  %v2142_v1 = vmul.f32 %v4347_v17, %v2140_v32 }
0x1392   :  { %2362 = vrot.lane.b32.xlu0 %v2036_v51, %s4430_s11  ;;  %2255 = vrot.lane.b32.xlu1 %v2036_v51, %s4431_s12 }
0x1393   :  { %v2145_v19 = vpop.permute.xlu1 %2144 }
0x1394   :  { %v2147_v13 = vadd.f32 %v2145_v19, %v2142_v1 }
0x1396   :  { %2366 = vrot.lane.b32.xlu1 %v2147_v13, %s4431_s12 }
0x13e9   :  { %v2150_v41 = vpop.permute.xlu0 %2149 }
0x13ea   :  { %3752 = vmatmul.mubr.msk.f32.vlgmr.msra.gmra.mrb[30].mxu1 %vm537_vm6, %v2150_v41 }
0x13eb   :  { %4069 = vmatpush1.bf16.msra.mxu1 %v4878_v63  ;;  %2437 = vmatprep.mubr.f32.mxu1 %v4427_v15 }
0x13ec   :  { %4071 = vmatprep.subr.bf16.mxu1 %v4880_v5 }
0x13ef   :  { %4073 = vmatpush1.bf16.msra.mxu1 %v4896_v21 }
0x13f0   :  { %4075 = vmatprep.subr.bf16.mxu1 %v4900_v22 }
0x13f3   :  { %4077 = vmatpush1.bf16.msra.mxu1 %v4909_v28 }
0x13f4   :  { %4079 = vmatprep.subr.bf16.mxu1 %v4920_v31 }
0x13f7   :  { %4081 = vmatpush1.bf16.msra.mxu1 %v4928_v33 }
0x13f8   :  { %4089 = vmatprep.subr.bf16.mxu1 %v4754_v30 }
0x1404   :  { %v2256_v24 = vpop.permute.xlu1 %2255  ;;  %v2363_v38 = vpop.permute.xlu0 %2362 }
0x1405   :  { %v2258_v52 = vsel %vm537_vm6, %v2150_v41, %v2256_v24 }
0x1406   :  { %3534 = vmatmul.mubr.msk.f32.vlgmr.msra.gmra.mrb[20].mxu0 %vm748_vm7, %v2258_v52 }
0x1407   :  { %4084 = vmatpush3.bf16.msra.mxu0 %v4635_v7  ;;  %3762 = vmatprep.mubr.msk.f32.mxu0 %vm4428_vm2, %v4427_v15 }
0x1408   :  { %v2367_v16 = vpop.permute.xlu1 %2366  ;;  %4085 = vmatprep.subr.bf16.mxu0 %v4426_v58 }
0x1409   :  { %v2369_v25 = vsel %vm537_vm6, %v2363_v38, %v2367_v16 }
0x140a   :  { %3536 = vmatmul.mubr.msk.f32.vlgmr.msra.gmra.mrb[32].mxu1 %vm748_vm7, %v2369_v25 }
0x140b   :  { %4087 = vmatpush3.bf16.msra.mxu0 %v4647_v14  ;;  %4091 = vmatpush1.bf16.msra.mxu1 %v4765_v2 }
0x140c   :  { %4093 = vmatprep.subr.bf16.mxu1 %v4767_v3  ;;  %4105 = vmatprep.subr.bf16.mxu0 %v4867_v40 }
0x140d   :  { %2651 = vmatprep.mubr.f32.mxu1 %v4427_v15 }
0x140f   :  { %4095 = vmatpush1.bf16.msra.mxu1 %v4783_v20 }
0x1410   :  { %4097 = vmatprep.subr.bf16.mxu1 %v4786_v35 }
0x1413   :  { %4099 = vmatpush1.bf16.msra.mxu1 %v4802_v45 }
0x1414   :  { %4101 = vmatprep.subr.bf16.mxu1 %v4807_v49 }
0x1417   :  { %4103 = vmatpush1.bf16.msra.mxu1 %v4817_v54 }
0x1418   :  { %4121 = vmatprep.subr.bf16.mxu1 %v4754_v30 }
0x14bd   :  { %v2219_v7 = vpop.f32.mrb[30].mxu1 }
0x14be   :  { %v2223_v14 = vadd.f32 %v2219_v7, %v4731_v4  ;;  %v3753_v37 = vpop.f32.mrb[31].mxu1 }
0x14c0   :  { %4354 = vtanh.f32 %v2223_v14  ;;  %v3533_v4 = vmul.f32 -1.442695, %v2223_v14 }
0x14ca   :  { %v4355_v17 = vpop.eup %4354 }
0x14cb   :  { %2233 = vrot.lane.b32.xlu0 %v4355_v17, %s4430_s11 }
0x14d9   :  { %v2328_v23 = vpop.f32.mrb[20].mxu0 }
0x14da   :  { %v2329_v59 = vadd.f32 %v2328_v23, %v4836_v9  ;;  %v2330_v56 = vpop.f32.mrb[21].mxu0 }
0x14db   :  { %v2331_v37 = vadd.f32 %v2330_v56, %v4845_v36 }
0x14dc   :  { %4356 = vtanh.f32 %v2329_v59  ;;  %v3535_v39 = vmul.f32 -1.442695, %v2329_v59 }
0x14dd   :  { %v2439_v26 = vpop.f32.mrb[32].mxu1 }
0x14de   :  { %v2440_v8 = vadd.f32 %v2439_v26, %v4970_v18  ;;  %v2441_v34 = vpop.f32.mrb[33].mxu1 }
0x14e0   :  { %4358 = vtanh.f32 %v2440_v8  ;;  %v3537_v29 = vmul.f32 -1.442695, %v2440_v8 }
0x14e1   :  { %4360 = vpow2.f32 %v3533_v4 }
0x14e6   :  { %v4357_v48 = vpop.eup %4356 }
0x14e7   :  { %2342 = vrot.lane.b32.xlu1 %v4357_v48, %s4430_s11 }
0x14ea   :  { %v4359_v30 = vpop.eup %4358 }
0x14eb   :  { %2453 = vrot.lane.b32.xlu0 %v4359_v30, %s4430_s11  ;;  %v4361_v53 = vpop.eup %4360 }
0x14ec   :  { %v2227_v62 = vadd.f32 1.0, %v4361_v53 }
0x14ee   :  { %4362 = vrcp.f32 %v2227_v62 }
0x14ef   :  { %4364 = vpow2.f32 %v3535_v39 }
0x14f0   :  { %4366 = vpow2.f32 %v3537_v29 }
0x14f8   :  { %v4363_v57 = vpop.eup %4362 }
0x14f9   :  { %v4365_v55 = vpop.eup %4364  ;;  %v2231_v13 = vmul.f32 %v4363_v57, %v5174_v42 }
0x14fa   :  { %v2336_v60 = vadd.f32 1.0, %v4365_v55  ;;  %v4367_v61 = vpop.eup %4366 }
0x14fb   :  { %v2447_v50 = vadd.f32 1.0, %v4367_v61 }
0x14fc   :  { %4368 = vrcp.f32 %v2336_v60 }
0x14fd   :  { %4370 = vrcp.f32 %v2447_v50 }
0x1506   :  { %v4369_v0 = vpop.eup %4368 }
0x1507   :  { %v4371_v51 = vpop.eup %4370  ;;  %v2340_v38 = vmul.f32 %v4369_v0, %v5179_v47  ;;  %v2442_v47 = vadd.f32 %v2441_v34, %v4992_v27 }
0x1508   :  { %v2451_v7 = vmul.f32 %v4371_v51, %v5183_v44 }
0x153d   :  { %v2234_v46 = vpop.permute.xlu0 %2233 }
0x153e   :  { %v2236_v43 = vmul.f32 %v4363_v57, %v2234_v46 }
0x1540   :  { %2238 = vrot.lane.b32.xlu1 %v2236_v43, %s4431_s12 }
0x1559   :  { %v2343_v32 = vpop.permute.xlu1 %2342 }
0x155a   :  { %v2345_v11 = vmul.f32 %v4369_v0, %v2343_v32 }
0x155c   :  { %2347 = vrot.lane.b32.xlu0 %v2345_v11, %s4431_s12 }
0x155d   :  { %v2454_v1 = vpop.permute.xlu0 %2453 }
0x155e   :  { %v2456_v19 = vmul.f32 %v4371_v51, %v2454_v1 }
0x1560   :  { %2458 = vrot.lane.b32.xlu1 %v2456_v19, %s4431_s12 }
0x1564   :  { %2249 = vrot.lane.b32.xlu1 %v4734_v6, %s4430_s11 }
0x15b2   :  { %v2239_v41 = vpop.permute.xlu1 %2238 }
0x15b3   :  { %v5237_v24 = vadd.f32 %v2239_v41, %v2231_v13 }
0x15b5   :  { %4372 = vtanh.f32 %v5237_v24 }
0x15bf   :  { %v4373_v52 = vpop.eup %4372 }
0x15c0   :  { %2244 = vrot.lane.b32.xlu0 %v4373_v52, %s4430_s11 }
0x15ce   :  { %v2348_v16 = vpop.permute.xlu0 %2347 }
0x15cf   :  { %v5242_v25 = vadd.f32 %v2348_v16, %v2340_v38 }
0x15d1   :  { %4374 = vtanh.f32 %v5242_v25 }
0x15d2   :  { %v2459_v6 = vpop.permute.xlu1 %2458 }
0x15d3   :  { %v5246_v14 = vadd.f32 %v2459_v6, %v2451_v7 }
0x15d5   :  { %4376 = vtanh.f32 %v5246_v14 }
0x15d6   :  { %v2250_v59 = vpop.permute.xlu1 %2249 }
0x15db   :  { %v4375_v42 = vpop.eup %4374 }
0x15dc   :  { %2353 = vrot.lane.b32.xlu0 %v4375_v42, %s4430_s11 }
0x15df   :  { %v4377_v17 = vpop.eup %4376 }
0x15e0   :  { %2464 = vrot.lane.b32.xlu1 %v4377_v17, %s4430_s11  ;;  %2358 = vrot.lane.b32.xlu0 %v2331_v37, %s4430_s11 }
0x15e4   :  { %2469 = vrot.lane.b32.xlu1 %v2442_v47, %s4430_s11 }
0x1632   :  { %v2245_v44 = vpop.permute.xlu0 %2244 }
0x1633   :  { %v2247_v23 = vmul.f32 %v4363_v57, %v2245_v44 }
0x1635   :  { %v2252_v26 = vadd.f32 %v2250_v59, %v2247_v23 }
0x1637   :  { %2474 = vrot.lane.b32.xlu0 %v2252_v26, %s4430_s11 }
0x164e   :  { %v2354_v8 = vpop.permute.xlu0 %2353 }
0x164f   :  { %v2356_v48 = vmul.f32 %v4369_v0, %v2354_v8 }
0x1652   :  { %v2465_v30 = vpop.permute.xlu1 %2464  ;;  %v2359_v4 = vpop.permute.xlu0 %2358 }
0x1653   :  { %v2361_v56 = vadd.f32 %v2359_v4, %v2356_v48  ;;  %v2467_v53 = vmul.f32 %v4371_v51, %v2465_v30 }
0x1655   :  { %2687 = vrot.lane.b32.xlu0 %v2361_v56, %s4430_s11  ;;  %2580 = vrot.lane.b32.xlu1 %v2361_v56, %s4431_s12 }
0x1656   :  { %v2470_v62 = vpop.permute.xlu1 %2469 }
0x1657   :  { %v2472_v34 = vadd.f32 %v2470_v62, %v2467_v53 }
0x1659   :  { %2691 = vrot.lane.b32.xlu1 %v2472_v34, %s4431_s12 }
0x16a9   :  { %v2475_v39 = vpop.permute.xlu0 %2474 }
0x16aa   :  { %3763 = vmatmul.mubr.msk.f32.vlgmr.msra.gmra.mrb[22].mxu0 %vm537_vm6, %v2475_v39 }
0x16ab   :  { %4107 = vmatpush1.bf16.msra.mxu0 %v4878_v63  ;;  %2762 = vmatprep.mubr.f32.mxu0 %v4427_v15 }
0x16ac   :  { %4109 = vmatprep.subr.bf16.mxu0 %v4880_v5 }
0x16af   :  { %4111 = vmatpush1.bf16.msra.mxu0 %v4896_v21 }
0x16b0   :  { %4113 = vmatprep.subr.bf16.mxu0 %v4900_v22 }
0x16b3   :  { %4115 = vmatpush1.bf16.msra.mxu0 %v4909_v28 }
0x16b4   :  { %4117 = vmatprep.subr.bf16.mxu0 %v4920_v31 }
0x16b7   :  { %4119 = vmatpush1.bf16.msra.mxu0 %v4928_v33 }
0x16b8   :  { %4137 = vmatprep.subr.bf16.mxu0 %v4867_v40 }
0x16c7   :  { %v2581_v57 = vpop.permute.xlu1 %2580  ;;  %v2688_v29 = vpop.permute.xlu0 %2687 }
0x16c8   :  { %v2583_v46 = vsel %vm537_vm6, %v2475_v39, %v2581_v57 }
0x16c9   :  { %3540 = vmatmul.mubr.msk.f32.vlgmr.msra.gmra.mrb[34].mxu1 %vm748_vm7, %v2583_v46 }
0x16ca   :  { %4123 = vmatpush1.bf16.msra.mxu1 %v4765_v2  ;;  %2874 = vmatprep.mubr.f32.mxu1 %v4427_v15 }
0x16cb   :  { %v2692_v43 = vpop.permute.xlu1 %2691  ;;  %4125 = vmatprep.subr.bf16.mxu1 %v4767_v3 }
0x16cc   :  { %v2694_v55 = vsel %vm537_vm6, %v2688_v29, %v2692_v43 }
0x16cd   :  { %3542 = vmatmul.mubr.msk.f32.vlgmr.msra.gmra.mrb[24].mxu0 %vm748_vm7, %v2694_v55 }
0x16ce   :  { %4127 = vmatpush1.bf16.msra.mxu1 %v4783_v20  ;;  %4139 = vmatpush1.bf16.msra.mxu0 %v4878_v63 }
0x16cf   :  { %4129 = vmatprep.subr.bf16.mxu1 %v4786_v35  ;;  %4141 = vmatprep.subr.bf16.mxu0 %v4880_v5 }
0x16d0   :  { %2985 = vmatprep.mubr.f32.mxu0 %v4427_v15 }
0x16d2   :  { %4131 = vmatpush1.bf16.msra.mxu1 %v4802_v45  ;;  %4143 = vmatpush1.bf16.msra.mxu0 %v4896_v21 }
0x16d3   :  { %4133 = vmatprep.subr.bf16.mxu1 %v4807_v49  ;;  %4145 = vmatprep.subr.bf16.mxu0 %v4900_v22 }
0x16d6   :  { %4135 = vmatpush1.bf16.msra.mxu1 %v4817_v54  ;;  %4147 = vmatpush1.bf16.msra.mxu0 %v4909_v28 }
0x16d7   :  { %4149 = vmatprep.subr.bf16.mxu0 %v4920_v31  ;;  %4153 = vmatprep.subr.bf16.mxu1 %v4867_v40 }
0x16da   :  { %4151 = vmatpush1.bf16.msra.mxu0 %v4928_v33 }
0x16db   :  { %4168 = vmatprep.subr.bf16.mxu0 %v4426_v58 }
0x177d   :  { %v2544_v2 = vpop.f32.mrb[22].mxu0 }
0x177e   :  { %v2548_v3 = vadd.f32 %v2544_v2, %v4736_v10  ;;  %v3764_v20 = vpop.f32.mrb[23].mxu0 }
0x1780   :  { %4378 = vtanh.f32 %v2548_v3  ;;  %v3539_v10 = vmul.f32 -1.442695, %v2548_v3 }
0x178a   :  { %v4379_v35 = vpop.eup %4378 }
0x178b   :  { %2558 = vrot.lane.b32.xlu0 %v4379_v35, %s4430_s11 }
0x179c   :  { %v2653_v45 = vpop.f32.mrb[34].mxu1 }
0x179d   :  { %v2654_v49 = vadd.f32 %v2653_v45, %v4836_v9  ;;  %v2655_v54 = vpop.f32.mrb[35].mxu1 }
0x179f   :  { %4380 = vtanh.f32 %v2654_v49  ;;  %v3541_v1 = vmul.f32 -1.442695, %v2654_v49 }
0x17a0   :  { %v2764_v60 = vpop.f32.mrb[24].mxu0 }
0x17a1   :  { %v2765_v40 = vadd.f32 %v2764_v60, %v4970_v18  ;;  %v2766_v61 = vpop.f32.mrb[25].mxu0 }
0x17a3   :  { %4382 = vtanh.f32 %v2765_v40  ;;  %v3543_v41 = vmul.f32 -1.442695, %v2765_v40 }
0x17a4   :  { %4384 = vpow2.f32 %v3539_v10 }
0x17a9   :  { %v4381_v50 = vpop.eup %4380 }
0x17aa   :  { %2667 = vrot.lane.b32.xlu1 %v4381_v50, %s4430_s11 }
0x17ad   :  { %v4383_v0 = vpop.eup %4382 }
0x17ae   :  { %2778 = vrot.lane.b32.xlu0 %v4383_v0, %s4430_s11  ;;  %v4385_v32 = vpop.eup %4384 }
0x17af   :  { %v2552_v11 = vadd.f32 1.0, %v4385_v32 }
0x17b1   :  { %4386 = vrcp.f32 %v2552_v11 }
0x17b2   :  { %4388 = vpow2.f32 %v3541_v1 }
0x17b3   :  { %4390 = vpow2.f32 %v3543_v41 }
0x17bb   :  { %v4387_v51 = vpop.eup %4386 }
0x17bc   :  { %v4389_v52 = vpop.eup %4388  ;;  %v2556_v23 = vmul.f32 %v4387_v51, %v5237_v24  ;;  %v2767_v24 = vadd.f32 %v2766_v61, %v4992_v27 }
0x17bd   :  { %v2661_v38 = vadd.f32 1.0, %v4389_v52  ;;  %v4391_v16 = vpop.eup %4390 }
0x17be   :  { %v2772_v7 = vadd.f32 1.0, %v4391_v16 }
0x17bf   :  { %4392 = vrcp.f32 %v2661_v38 }
0x17c0   :  { %4394 = vrcp.f32 %v2772_v7 }
0x17c9   :  { %v4393_v6 = vpop.eup %4392 }
0x17ca   :  { %v4395_v17 = vpop.eup %4394  ;;  %v2665_v48 = vmul.f32 %v4393_v6, %v5242_v25  ;;  %v2656_v25 = vadd.f32 %v2655_v54, %v4845_v36 }
0x17cb   :  { %v2776_v56 = vmul.f32 %v4395_v17, %v5246_v14 }
0x17fd   :  { %v2559_v19 = vpop.permute.xlu0 %2558 }
0x17fe   :  { %v2561_v13 = vmul.f32 %v4387_v51, %v2559_v19 }
0x1800   :  { %2563 = vrot.lane.b32.xlu1 %v2561_v13, %s4431_s12 }
0x181c   :  { %v2668_v42 = vpop.permute.xlu1 %2667 }
0x181d   :  { %v2670_v37 = vmul.f32 %v4393_v6, %v2668_v42 }
0x181f   :  { %2672 = vrot.lane.b32.xlu0 %v2670_v37, %s4431_s12 }
0x1820   :  { %v2779_v47 = vpop.permute.xlu0 %2778 }
0x1821   :  { %v2781_v44 = vmul.f32 %v4395_v17, %v2779_v47 }
0x1823   :  { %2783 = vrot.lane.b32.xlu1 %v2781_v44, %s4431_s12 }
0x1827   :  { %2574 = vrot.lane.b32.xlu1 %v4739_v12, %s4430_s11 }
0x1872   :  { %v2564_v59 = vpop.permute.xlu1 %2563 }
0x1873   :  { %v2566_v26 = vadd.f32 %v2564_v59, %v2556_v23 }
0x1875   :  { %4396 = vtanh.f32 %v2566_v26 }
0x187f   :  { %v4397_v8 = vpop.eup %4396 }
0x1880   :  { %2569 = vrot.lane.b32.xlu0 %v4397_v8, %s4430_s11 }
0x1891   :  { %v2673_v30 = vpop.permute.xlu0 %2672 }
0x1892   :  { %v5305_v4 = vadd.f32 %v2673_v30, %v2665_v48 }
0x1894   :  { %4398 = vtanh.f32 %v5305_v4 }
0x1895   :  { %v2784_v53 = vpop.permute.xlu1 %2783 }
0x1896   :  { %v5309_v62 = vadd.f32 %v2784_v53, %v2776_v56 }
0x1898   :  { %4400 = vtanh.f32 %v5309_v62 }
0x1899   :  { %v2575_v57 = vpop.permute.xlu1 %2574 }
0x189e   :  { %v4399_v12 = vpop.eup %4398 }
0x189f   :  { %2678 = vrot.lane.b32.xlu1 %v4399_v12, %s4430_s11 }
0x18a2   :  { %v4401_v34 = vpop.eup %4400 }
0x18a3   :  { %2789 = vrot.lane.b32.xlu0 %v4401_v34, %s4430_s11  ;;  %2794 = vrot.lane.b32.xlu1 %v2767_v24, %s4430_s11 }
0x18a7   :  { %2683 = vrot.lane.b32.xlu0 %v2656_v25, %s4430_s11 }
0x18f2   :  { %v2570_v14 = vpop.permute.xlu0 %2569 }
0x18f3   :  { %v2572_v39 = vmul.f32 %v4387_v51, %v2570_v14 }
0x18f5   :  { %v2577_v46 = vadd.f32 %v2575_v57, %v2572_v39 }
0x18f7   :  { %2799 = vrot.lane.b32.xlu0 %v2577_v46, %s4430_s11 }
0x1911   :  { %v2679_v29 = vpop.permute.xlu1 %2678 }
0x1912   :  { %v2681_v55 = vmul.f32 %v4393_v6, %v2679_v29 }
0x1915   :  { %v2790_v43 = vpop.permute.xlu0 %2789  ;;  %v2795_v35 = vpop.permute.xlu1 %2794 }
0x1916   :  { %v2792_v3 = vmul.f32 %v4395_v17, %v2790_v43 }
0x1918   :  { %v2797_v45 = vadd.f32 %v2795_v35, %v2792_v3 }
0x1919   :  { %v2684_v2 = vpop.permute.xlu0 %2683 }
0x191a   :  { %v2686_v20 = vadd.f32 %v2684_v2, %v2681_v55 }
0x191c   :  { %2910 = vrot.lane.b32.xlu0 %v2686_v20, %s4430_s11  ;;  %2803 = vrot.lane.b32.xlu1 %v2686_v20, %s4431_s12 }
0x1920   :  { %2914 = vrot.lane.b32.xlu1 %v2797_v45, %s4431_s12 }
0x1969   :  { %v2800_v49 = vpop.permute.xlu0 %2799 }
0x198e   :  { %v2804_v54 = vpop.permute.xlu1 %2803  ;;  %v2911_v40 = vpop.permute.xlu0 %2910 }
0x198f   :  { %v2806_v60 = vsel %vm537_vm6, %v2800_v49, %v2804_v54  ;;  %v3133_v49 = vld [vmem:[%s5497_s2 + $0x90] sm:$0xff]  ;;  %v3134_v54 = vld [vmem:[%s5497_s2 + $0x98] sm:$0xff] }
0x1990   :  { %3544 = vmatmul.mubr.msk.f32.vlgmr.msra.gmra.mrb[36].mxu1 %vm748_vm7, %v2806_v60  ;;  %v3135_v60 = vld [vmem:[%s5497_s2 + $0xa0] sm:$0xff] }
0x1991   :  { %4155 = vmatpush1.bf16.msra.mxu1 %v4878_v63  ;;  %3097 = vmatprep.mubr.f32.mxu1 %v4427_v15 }
0x1992   :  { %v2915_v61 = vpop.permute.xlu1 %2914  ;;  %4157 = vmatprep.subr.bf16.mxu1 %v4880_v5 }
0x1993   :  { %v2917_v50 = vsel %vm537_vm6, %v2911_v40, %v2915_v61  ;;  %v4169_v40 = vpack.c.bf16 %v3134_v54, %v3133_v49  ;;  %v3400_v49 = vld [vmem:[%s5497_s2 + $0x1a0] sm:$0xff] }
0x1994   :  { %3546 = vmatmul.mubr.msk.f32.vlgmr.msra.gmra.mrb[26].mxu0 %vm748_vm7, %v2917_v50 }
0x1995   :  { %4159 = vmatpush1.bf16.msra.mxu1 %v4896_v21  ;;  %3773 = vmatprep.mubr.msk.f32.mxu0 %vm4428_vm2, %v4427_v15 }
0x1996   :  { %4161 = vmatprep.subr.bf16.mxu1 %v4900_v22  ;;  %4170 = vmatpush3.bf16.msra.mxu0 %v4169_v40 }
0x1997   :  { %4171 = vmatprep.subr.bf16.mxu0 %v4426_v58 }
0x1999   :  { %4163 = vmatpush1.bf16.msra.mxu1 %v4909_v28 }
0x199a   :  { %4165 = vmatprep.subr.bf16.mxu1 %v4920_v31 }
0x199d   :  { %4167 = vmatpush1.bf16.msra.mxu1 %v4928_v33 }
0x199e   :  { %4198 = vmatprep.subr.bf16.mxu1 %v4426_v58 }
0x1a63   :  { %v2876_v63 = vpop.f32.mrb[36].mxu1 }
0x1a64   :  { %v2877_v5 = vadd.f32 %v2876_v63, %v4836_v9  ;;  %v2878_v0 = vpop.f32.mrb[37].mxu1 }
0x1a65   :  { %v2879_v23 = vadd.f32 %v2878_v0, %v4845_v36 }
0x1a66   :  { %4402 = vtanh.f32 %v2877_v5  ;;  %v3545_v28 = vmul.f32 -1.442695, %v2877_v5 }
0x1a67   :  { %v2987_v10 = vpop.f32.mrb[26].mxu0 }
0x1a68   :  { %v2988_v21 = vadd.f32 %v2987_v10, %v4970_v18  ;;  %v2989_v32 = vpop.f32.mrb[27].mxu0 }
0x1a69   :  { %v2990_v26 = vadd.f32 %v2989_v32, %v4992_v27  ;;  %v3219_v32 = vld [vmem:[%s5497_s2 + $0xc0] sm:$0xff] }
0x1a6a   :  { %4404 = vtanh.f32 %v2988_v21  ;;  %v3547_v31 = vmul.f32 -1.442695, %v2988_v21  ;;  %v3218_v21 = vld [vmem:[%s5497_s2 + $0xb8] sm:$0xff] }
0x1a6b   :  { %4406 = vpow2.f32 %v3545_v28  ;;  %v3221_v28 = vld [vmem:[%s5497_s2 + $0xd0] sm:$0xff] }
0x1a6c   :  { %4408 = vpow2.f32 %v3547_v31 }
0x1a70   :  { %v4403_v11 = vpop.eup %4402 }
0x1a71   :  { %2890 = vrot.lane.b32.xlu0 %v4403_v11, %s4430_s11  ;;  %v4175_v11 = vpack.c.bf16 %v3219_v32, %v3218_v21 }
0x1a74   :  { %v4405_v22 = vpop.eup %4404 }
0x1a75   :  { %3001 = vrot.lane.b32.xlu1 %v4405_v22, %s4430_s11  ;;  %v4407_v33 = vpop.eup %4406  ;;  %v3220_v22 = vld [vmem:[%s5497_s2 + $0xc8] sm:$0xff] }
0x1a76   :  { %v2884_v51 = vadd.f32 1.0, %v4407_v33  ;;  %v4409_v9 = vpop.eup %4408  ;;  %v4178_v33 = vpack.c.bf16 %v3221_v28, %v3220_v22 }
0x1a77   :  { %v2995_v1 = vadd.f32 1.0, %v4409_v9  ;;  %v3223_v9 = vld [vmem:[%s5497_s2 + $0xe0] sm:$0xff] }
0x1a78   :  { %4410 = vrcp.f32 %v2884_v51  ;;  %v3222_v51 = vld [vmem:[%s5497_s2 + $0xd8] sm:$0xff] }
0x1a79   :  { %4412 = vrcp.f32 %v2995_v1  ;;  %v4181_v1 = vpack.c.bf16 %v3223_v9, %v3222_v51 }
0x1a82   :  { %v4411_v19 = vpop.eup %4410 }
0x1a83   :  { %v4413_v52 = vpop.eup %4412  ;;  %v2888_v7 = vmul.f32 %v4411_v19, %v5305_v4 }
0x1a84   :  { %v2999_v37 = vmul.f32 %v4413_v52, %v5309_v62 }
0x1ae3   :  { %v2891_v13 = vpop.permute.xlu0 %2890 }
0x1ae4   :  { %v2893_v41 = vmul.f32 %v4411_v19, %v2891_v13  ;;  %v3225_v13 = vld [vmem:[%s5497_s2 + $0xf0] sm:$0xff] }
0x1ae6   :  { %2895 = vrot.lane.b32.xlu0 %v2893_v41, %s4431_s12 }
0x1ae7   :  { %v3002_v38 = vpop.permute.xlu1 %3001 }
0x1ae8   :  { %v3004_v16 = vmul.f32 %v4413_v52, %v3002_v38  ;;  %v3227_v38 = vld [vmem:[%s5497_s2 + $0x100] sm:$0xff] }
0x1aea   :  { %3006 = vrot.lane.b32.xlu1 %v3004_v16, %s4431_s12 }
0x1b58   :  { %v2896_v6 = vpop.permute.xlu0 %2895 }
0x1b59   :  { %v2898_v42 = vadd.f32 %v2896_v6, %v2888_v7  ;;  %v3228_v7 = vld [vmem:[%s5497_s2 + $0x108] sm:$0xff]  ;;  %v3229_v6 = vld [vmem:[%s5497_s2 + $0x110] sm:$0xff] }
0x1b5b   :  { %4414 = vtanh.f32 %v2898_v42  ;;  %v4190_v42 = vpack.c.bf16 %v3229_v6, %v3228_v7 }
0x1b5c   :  { %v3007_v17 = vpop.permute.xlu1 %3006 }
0x1b5d   :  { %v3009_v47 = vadd.f32 %v3007_v17, %v2999_v37  ;;  %v3230_v37 = vld [vmem:[%s5497_s2 + $0x118] sm:$0xff]  ;;  %v3231_v17 = vld [vmem:[%s5497_s2 + $0x120] sm:$0xff] }
0x1b5f   :  { %4416 = vtanh.f32 %v3009_v47 }
0x1b65   :  { %v4415_v44 = vpop.eup %4414 }
0x1b66   :  { %2901 = vrot.lane.b32.xlu0 %v4415_v44, %s4430_s11  ;;  %v3232_v44 = vld [vmem:[%s5497_s2 + $0x128] sm:$0xff] }
0x1b69   :  { %v4417_v59 = vpop.eup %4416 }
0x1b6a   :  { %3012 = vrot.lane.b32.xlu1 %v4417_v59, %s4430_s11  ;;  %2906 = vrot.lane.b32.xlu0 %v2879_v23, %s4430_s11  ;;  %v3233_v23 = vld [vmem:[%s5497_s2 + $0x130] sm:$0xff] }
0x1b6b   :  { %v4196_v59 = vpack.c.bf16 %v3233_v23, %v3232_v44 }
0x1b6e   :  { %3017 = vrot.lane.b32.xlu1 %v2990_v26, %s4430_s11  ;;  %v3310_v26 = vld [vmem:[%s5497_s2 + $0x140] sm:$0xff] }
0x1bd8   :  { %v2902_v8 = vpop.permute.xlu0 %2901 }
0x1bd9   :  { %v2904_v48 = vmul.f32 %v4411_v19, %v2902_v8  ;;  %v3224_v19 = vld [vmem:[%s5497_s2 + $0xe8] sm:$0xff] }
0x1bda   :  { %v4184_v41 = vpack.c.bf16 %v3225_v13, %v3224_v19  ;;  %v3311_v8 = vld [vmem:[%s5497_s2 + $0x148] sm:$0xff] }
0x1bdc   :  { %v3013_v30 = vpop.permute.xlu1 %3012  ;;  %v2907_v4 = vpop.permute.xlu0 %2906 }
0x1bdd   :  { %v2909_v56 = vadd.f32 %v2907_v4, %v2904_v48  ;;  %v3015_v53 = vmul.f32 %v4413_v52, %v3013_v30  ;;  %v3226_v52 = vld [vmem:[%s5497_s2 + $0xf8] sm:$0xff]  ;;  %v3312_v48 = vld [vmem:[%s5497_s2 + $0x150] sm:$0xff]  ;;  %v4199_v30 = vpack.c.bf16 %v3311_v8, %v3310_v26 }
0x1bde   :  { %v4187_v16 = vpack.c.bf16 %v3227_v38, %v3226_v52  ;;  %v3313_v4 = vld [vmem:[%s5497_s2 + $0x158] sm:$0xff] }
0x1bdf   :  { %3022 = vrot.lane.b32.xlu0 %v2909_v56, %s4430_s11  ;;  %v4202_v56 = vpack.c.bf16 %v3313_v4, %v3312_v48 }
0x1be0   :  { %v3018_v62 = vpop.permute.xlu1 %3017 }
0x1be1   :  { %v3020_v12 = vadd.f32 %v3018_v62, %v3015_v53  ;;  %v3314_v53 = vld [vmem:[%s5497_s2 + $0x160] sm:$0xff]  ;;  %v3315_v62 = vld [vmem:[%s5497_s2 + $0x168] sm:$0xff] }
0x1be3   :  { %3026 = vrot.lane.b32.xlu1 %v3020_v12, %s4431_s12  ;;  %v4205_v12 = vpack.c.bf16 %v3315_v62, %v3314_v53 }
0x1c51   :  { %v3023_v36 = vpop.permute.xlu0 %3022 }
0x1c55   :  { %v3027_v24 = vpop.permute.xlu1 %3026 }
0x1c56   :  { %v3029_v34 = vsel %vm537_vm6, %v3023_v36, %v3027_v24  ;;  %v3550_v36 = vld [vmem:[%s5497_s2 + $0xb0] ss:$0 sm:$0xff] }
0x1c57   :  { %3548 = vmatmul.mubr.msk.f32.vlgmr.msra.gmra.mrb[38].mxu1 %vm748_vm7, %v3029_v34 }
0x1c58   :  { %3827 = vmatprep.mubr.msk.f32.mxu1 %vm4428_vm2, %v4427_v15  ;;  %4200 = vmatpush3.bf16.msra.mxu1 %v4199_v30 }
0x1c59   :  { %4201 = vmatprep.subr.bf16.mxu1 %v4426_v58 }
0x1c5c   :  { %4203 = vmatpush3.bf16.msra.mxu1 %v4202_v56 }
0x1c5d   :  { %4204 = vmatprep.subr.bf16.mxu1 %v4426_v58 }
0x1c60   :  { %4206 = vmatpush3.bf16.msra.mxu1 %v4205_v12 }
0x1c61   :  { %4207 = vmatprep.subr.bf16.mxu1 %v4426_v58 }
0x1d2a   :  { %v3099_v25 = vpop.f32.mrb[38].mxu1 }
0x1d2b   :  { %v3100_v14 = vadd.f32 %v3099_v25, %v4970_v18  ;;  %v3101_v39 = vpop.f32.mrb[39].mxu1 }
0x1d2c   :  { %v3102_v20 = vadd.f32 %v3101_v39, %v4992_v27  ;;  %v3136_v27 = vld [vmem:[%s5497_s2 + $0xa8] sm:$0xff]  ;;  %v3316_v39 = vld [vmem:[%s5497_s2 + $0x170] sm:$0xff] }
0x1d2d   :  { %4418 = vtanh.f32 %v3100_v14  ;;  %v3549_v46 = vmul.f32 -1.442695, %v3100_v14  ;;  %v4172_v61 = vpack.c.bf16 %v3136_v27, %v3135_v60  ;;  %v3553_v60 = vld [vmem:[%s5497_s2 + $0x180] ss:$0 sm:$0xff] }
0x1d2f   :  { %4420 = vpow2.f32 %v3549_v46  ;;  %4173 = vmatpush3.bf16.msra.mxu0 %v4172_v61 }
0x1d30   :  { %4174 = vmatprep.subr.bf16.mxu0 %v4426_v58 }
0x1d37   :  { %v4419_v57 = vpop.eup %4418 }
0x1d38   :  { %3113 = vrot.lane.b32.xlu0 %v4419_v57, %s4430_s11  ;;  %v3317_v57 = vld [vmem:[%s5497_s2 + $0x178] sm:$0xff] }
0x1d39   :  { %v4421_v29 = vpop.eup %4420  ;;  %v4208_v46 = vpack.c.bf16 %v3317_v57, %v3316_v39 }
0x1d3a   :  { %v3107_v43 = vadd.f32 1.0, %v4421_v29  ;;  %v3552_v29 = vld [vmem:[%s5497_s2 + $0x138] ss:$0 sm:$0xff] }
0x1d3b   :  { %4209 = vmatpush3.bf16.msra.mxu1 %v4208_v46 }
0x1d3c   :  { %4422 = vrcp.f32 %v3107_v43  ;;  %4210 = vmatprep.subr.bf16.mxu1 %v4426_v58  ;;  %v3397_v43 = vld [vmem:[%s5497_s2 + $0x188] sm:$0xff] }
0x1d46   :  { %v4423_v55 = vpop.eup %4422 }
0x1d47   :  { %v3111_v18 = vmul.f32 %v4423_v55, %v3009_v47  ;;  %v4193_v47 = vpack.c.bf16 %v3231_v17, %v3230_v37 }
0x1daa   :  { %v3114_v2 = vpop.permute.xlu0 %3113 }
0x1dab   :  { %v3116_v3 = vmul.f32 %v4423_v55, %v3114_v2 }
0x1dad   :  { %3118 = vrot.lane.b32.xlu1 %v3116_v3, %s4431_s12 }
0x1db1   :  { %3129 = vrot.lane.b32.xlu1 %v3102_v20, %s4430_s11 }
0x1e1f   :  { %v3119_v35 = vpop.permute.xlu1 %3118 }
0x1e20   :  { %v3121_v45 = vadd.f32 %v3119_v35, %v3111_v18 }
0x1e22   :  { %4424 = vtanh.f32 %v3121_v45  ;;  %v3399_v45 = vld [vmem:[%s5497_s2 + $0x198] sm:$0xff] }
0x1e23   :  { %v3130_v0 = vpop.permute.xlu1 %3129  ;;  %v4214_v54 = vpack.c.bf16 %v3400_v49, %v3399_v45 }
0x1e2c   :  { %v4425_v50 = vpop.eup %4424 }
0x1e2d   :  { %3124 = vrot.lane.b32.xlu0 %v4425_v50, %s4430_s11 }
0x1e9f   :  { %v3125_v63 = vpop.permute.xlu0 %3124 }
0x1ea0   :  { %v3127_v5 = vmul.f32 %v4423_v55, %v3125_v63  ;;  %v3398_v55 = vld [vmem:[%s5497_s2 + $0x190] sm:$0xff] }
0x1ea1   :  { %v4211_v18 = vpack.c.bf16 %v3398_v55, %v3397_v43 }
0x1ea2   :  { %v3132_v10 = vadd.f32 %v3130_v0, %v3127_v5 }
0x1ea4   :  { %3143 = vrot.lane.b32.xlu0 %v3132_v10, %s4430_s11 }
0x1f16   :  { %v3144_v31 = vpop.permute.xlu0 %3143 }
0x1f17   :  { %3774 = vmatmul.mubr.msk.f32.vlgmr.msra.gmra.mrb[28].mxu0 %vm537_vm6, %v3144_v31 }
0x1f18   :  { %4176 = vmatpush3.bf16.msra.mxu0 %v4175_v11  ;;  %3808 = vmatprep.mubr.msk.f32.mxu0 %vm4428_vm2, %v4427_v15 }
0x1f19   :  { %4177 = vmatprep.subr.bf16.mxu0 %v4426_v58 }
0x1f1c   :  { %4179 = vmatpush3.bf16.msra.mxu0 %v4178_v33 }
0x1f1d   :  { %4180 = vmatprep.subr.bf16.mxu0 %v4426_v58 }
0x1f20   :  { %4182 = vmatpush3.bf16.msra.mxu0 %v4181_v1 }
0x1f21   :  { %4183 = vmatprep.subr.bf16.mxu0 %v4426_v58 }
0x1f24   :  { %4185 = vmatpush3.bf16.msra.mxu0 %v4184_v41 }
0x1f25   :  { %4186 = vmatprep.subr.bf16.mxu0 %v4426_v58 }
0x1f28   :  { %4188 = vmatpush3.bf16.msra.mxu0 %v4187_v16 }
0x1f29   :  { %4189 = vmatprep.subr.bf16.mxu0 %v4426_v58 }
0x1f2c   :  { %4191 = vmatpush3.bf16.msra.mxu0 %v4190_v42 }
0x1f2d   :  { %4192 = vmatprep.subr.bf16.mxu0 %v4426_v58 }
0x1f30   :  { %4194 = vmatpush3.bf16.msra.mxu0 %v4193_v47 }
0x1f31   :  { %4195 = vmatprep.subr.bf16.mxu0 %v4426_v58 }
0x1f34   :  { %4197 = vmatpush3.bf16.msra.mxu0 %v4196_v59 }
0x1fea   :  { %v3213_v24 = vpop.f32.mrb[28].mxu0 }
0x1feb   :  { %v3214_v34 = vadd.f32 %v3550_v36, %v3213_v24  ;;  %v3775_v25 = vpop.f32.mrb[29].mxu0 }
0x1fed   :  { %v3217_v14 = vmax.f32 %v3214_v34, 0.0 }
0x1fef   :  { %3809 = vmatmul.mubr.f32.vlgmr.msra.gmra.mrb[30].mxu0 %v3217_v14 }
0x20c2   :  { %v3305_v2 = vpop.f32.mrb[30].mxu0 }
0x20c3   :  { %v3306_v3 = vadd.f32 %v3552_v29, %v3305_v2  ;;  %v3810_v20 = vpop.f32.mrb[31].mxu0 }
0x20c5   :  { %v3309_v35 = vmax.f32 %v3306_v3, 0.0 }
0x20c7   :  { %3828 = vmatmul.mubr.msk.f32.vlgmr.msra.gmra.mrb[40].mxu1 %vm748_vm7, %v3309_v35 }
0x20c8   :  { %4212 = vmatpush3.bf16.msra.mxu1 %v4211_v18  ;;  %3838 = vmatprep.mubr.msk.f32.mxu1 %vm4428_vm2, %v4427_v15 }
0x20c9   :  { %4213 = vmatprep.subr.bf16.mxu1 %v4426_v58  ;;  %v3555_v58 = vld [vmem:[%s5497_s2 + $0x1a8] ss:$0 sm:$0xff] }
0x20cc   :  { %4215 = vmatpush3.bf16.msra.mxu1 %v4214_v54 }
0x219a   :  { %v3392_v40 = vpop.f32.mrb[40].mxu1 }
0x219b   :  { %v3393_v27 = vadd.f32 %v3553_v60, %v3392_v40  ;;  %v3829_v61 = vpop.f32.mrb[41].mxu1 }
0x219d   :  { %v3396_v15 = vmax.f32 %v3393_v27, 0.0 }
0x219f   :  { %3839 = vmatmul.mubr.msk.f32.vlgmr.msra.gmra.mrb[42].mxu1 %vm537_vm6, %v3396_v15 }
0x2272   :  { %v3475_v50 = vpop.f32.mrb[42].mxu1 }
0x2273   :  { %v3476_v63 = vadd.f32 %v3555_v58, %v3475_v50  ;;  %v3840_v5 = vpop.f32.mrb[43].mxu1 }
0x2275   :  { %3479 = vst [vmem:[%s5499_s3] sm:$0xff] %v3476_v63 }

</bundles_post_ra>
